<compile_context>
chip_gen: v5e
topology: v5e:2x2
jax: 0.10.0
libtpu: 0.0.40
codegen_flags: <defaults>
</compile_context>

<pallas_src>
import functools

import jax
import jax.numpy as jnp
from jax import lax
from jax.experimental import pallas as pl
from jax.experimental.pallas import tpu as pltpu

EPS = 1e-5   # torch.nn.functional.instance_norm default eps
G = 8        # images per sublane group (one (8,128)-tile row group)


def _fylm_head_kernel(x_ref, w1_ref, b1_ref, w2_ref, b2_ref, out_ref,
                      *, H, W, pad, nb, c1):
    # x_ref  : (nb, HW + 2*pad) VMEM  -- batch on sublanes, flat padded image on lanes
    # w1_ref : (c1, 9)          SMEM  -- 3x3 taps as scalars
    # b1_ref : (c1,)            SMEM
    # w2_ref : (c1,)            SMEM  -- 1x1 conv weights
    # b2_ref : (1,)             SMEM
    # out_ref: (nb, HW)         VMEM  -- lane-dense output
    HW = H * W
    inv_hw = 1.0 / HW

    # lane index -> image column (horizontal-border masks for the 3x3 conv)
    col = lax.broadcasted_iota(jnp.int32, (G, HW), 1) % W
    left_ok = col >= 1          # tap column dx==0 needs w-1 >= 0
    right_ok = col <= W - 2     # tap column dx==2 needs w+1 <= W-1

    def group_body(i, carry):
        r0 = pl.multiple_of(i * G, G)
        rows = pl.ds(r0, G)

        # ---- 9 shifted tap slabs, (G, HW) each -----------------------------
        # Vertical out-of-bounds reads land in the flat zero padding;
        # horizontal out-of-bounds lanes are masked per column.
        taps = []
        for k in range(9):
            dy, dx = k // 3, k % 3
            d = (dy - 1) * W + (dx - 1)
            t = x_ref[rows, pad + d: pad + d + HW]
            if dx == 0:
                t = jnp.where(left_ok, t, 0.0)
            elif dx == 2:
                t = jnp.where(right_ok, t, 0.0)
            taps.append(t)

        # ---- conv1 (3x3) + instance norm + conv2 (1x1), fused per channel --
        #   w2[c]*(y_c - mu_c)*rstd_c = (w2[c]*rstd_c)*y_c - (w2[c]*rstd_c)*mu_c
        # so the normalised 16-channel map never needs to be materialised.
        # All reductions are along the lane (HW) axis only, so per-image stats
        # never mix across sublane rows (batch-padding rows stay isolated).
        zacc = jnp.zeros((G, HW), jnp.float32)
        zcor = jnp.zeros((G, 1), jnp.float32)
        for c in range(c1):
            y = jnp.full((G, HW), b1_ref[c], jnp.float32)   # bias folded into init
            for k in range(9):
                y = y + w1_ref[c, k] * taps[k]               # VPU MACs, no MXU
            s1 = jnp.sum(y, axis=1, keepdims=True)           # (G, 1) per-image
            s2 = jnp.sum(y * y, axis=1, keepdims=True)
            mu = s1 * inv_hw
            var = s2 * inv_hw - mu * mu                      # E[x^2] - mu^2
            alpha = w2_ref[c] * lax.rsqrt(var + EPS)         # (G, 1)
            zacc = zacc + alpha * y
            zcor = zcor + alpha * mu
        z = zacc - zcor + b2_ref[0]                          # conv2 output, (G, HW)

        # ---- instance norm (single channel) + sigmoid -----------------------
        s1 = jnp.sum(z, axis=1, keepdims=True)
        s2 = jnp.sum(z * z, axis=1, keepdims=True)
        mu = s1 * inv_hw
        var = s2 * inv_hw - mu * mu
        zn = (z - mu) * lax.rsqrt(var + EPS)
        out_ref[rows, :] = jax.nn.sigmoid(zn)                # dense (8, HW) store
        return carry

    lax.fori_loop(0, nb // G, group_body, 0)


def _round_up(a, m):
    return (a + m - 1) // m * m


def fylm_head_forward(x, w1, b1, w2, b2, *, images_per_step=256):
    """x: (N,1,H,W) f32; w1: (C1,1,3,3); b1: (C1,); w2: (1,C1,1,1); b2: (1,)."""
    N, C, H, W = x.shape
    assert C == 1, "fylmHead has a single input channel"
    C1 = w1.shape[0]
    HW = H * W
    PAD = W + 1                      # covers the largest flat tap offset (W+1)
    HWP = HW + 2 * PAD

    # ---- images per grid step: a multiple of the 8-image sublane group -----
    nb = max(G, images_per_step // G * G)
    Np = _round_up(N, G)             # batch padded with zero images (eps>0 => safe)
    nb = min(nb, Np)
    while Np % nb:                   # keep batch padding below one group
        nb -= G
    if Np // nb == 1 and nb % (2 * G) == 0:
        nb //= 2                     # >= 2 grid steps so both v7x TCs get work

    # ---- glue: (N,1,H,W) -> (Np, HWP) batch-on-sublane, flat zero-padded ---
    xf = jnp.pad(x.reshape(N, HW).astype(jnp.float32),
                 ((0, Np - N), (PAD, PAD)))

    w1s = w1.reshape(C1, 9).astype(jnp.float32)    # 3x3 taps as SMEM scalars
    b1s = b1.reshape(C1).astype(jnp.float32)
    w2s = w2.reshape(C1).astype(jnp.float32)
    b2s = b2.reshape(1).astype(jnp.float32)

    kernel = functools.partial(_fylm_head_kernel,
                               H=H, W=W, pad=PAD, nb=nb, c1=C1)

    # Raise the scoped-VMEM limit only if nb is pushed high enough to threaten
    # v5e's 16 MiB default (double-buffered input + output blocks).
    blk_bytes = 2 * 4 * nb * (_round_up(HWP, 128) + _round_up(HW, 128))
    cparams = dict(dimension_semantics=("parallel",))
    if blk_bytes > 12 * 1024 * 1024:
        cparams["vmem_limit_bytes"] = min(blk_bytes + (8 << 20), 120 << 20)

    smem = pl.BlockSpec(memory_space=pltpu.MemorySpace.SMEM)
    out = pl.pallas_call(
        kernel,
        out_shape=jax.ShapeDtypeStruct((Np, HW), jnp.float32),
        grid=(Np // nb,),
        in_specs=[
            pl.BlockSpec((nb, HWP), lambda n: (n, 0)),   # dense (8,128)-tiled slabs
            smem, smem, smem, smem,                      # w1, b1, w2, b2
        ],
        out_specs=pl.BlockSpec((nb, HW), lambda n: (n, 0)),
        compiler_params=pltpu.CompilerParams(**cparams),
    )(xf, w1s, b1s, w2s, b2s)

    return out[:N].reshape(N, 1, H, W)


def reference_forward(x, w1, b1, w2, b2):
    """Pure-JAX reference matching the torch module (NCHW)."""
    c1 = w1.shape[0]
    y = lax.conv_general_dilated(
        x, w1, (1, 1), ((1, 1), (1, 1)),
        dimension_numbers=("NCHW", "OIHW", "NCHW")) + b1.reshape(1, c1, 1, 1)
    mu = jnp.mean(y, axis=(2, 3), keepdims=True)
    var = jnp.mean(jnp.square(y - mu), axis=(2, 3), keepdims=True)
    y = (y - mu) / jnp.sqrt(var + EPS)
    z = lax.conv_general_dilated(
        y, w2, (1, 1), ((0, 0), (0, 0)),
        dimension_numbers=("NCHW", "OIHW", "NCHW")) + b2.reshape(1, 1, 1, 1)
    mu2 = jnp.mean(z, axis=(2, 3), keepdims=True)
    var2 = jnp.mean(jnp.square(z - mu2), axis=(2, 3), keepdims=True)
    z = (z - mu2) / jnp.sqrt(var2 + EPS)
    return jax.nn.sigmoid(z)


if __name__ == "__main__":
    key = jax.random.PRNGKey(0)
    kx, k1, k2, k3, k4 = jax.random.split(key, 5)

    H, W, C1 = 16, 16, 16

    # Deterministic parameter init (shapes / bounds from nn.Conv2d defaults).
    bound1 = 1.0 / (1 * 3 * 3) ** 0.5
    w1 = jax.random.uniform(k1, (C1, 1, 3, 3), jnp.float32, -bound1, bound1)
    b1 = jax.random.uniform(k2, (C1,), jnp.float32, -bound1, bound1)
    bound2 = 1.0 / C1 ** 0.5
    w2 = jax.random.uniform(k3, (1, C1, 1, 1), jnp.float32, -bound2, bound2)
    b2 = jax.random.uniform(k4, (1,), jnp.float32, -bound2, bound2)

    x_all = jax.random.normal(kx, (16, 1, H, W), dtype=jnp.float32)

    # N=16 exercises the multi-step grid (2 steps x 8 images -> both v7x TCs);
    # N=2 exercises the batch-padding path (padded up to one 8-image group).
    for n in (16, 2):
        x = x_all[:n]
        out = jax.block_until_ready(fylm_head_forward(x, w1, b1, w2, b2))
        ref = jax.block_until_ready(reference_forward(x, w1, b1, w2, b2))
        assert out.shape == (n, 1, H, W)
        err = float(jnp.max(jnp.abs(out - ref)))
        assert err < 5e-3, "N=%d: max abs diff %g" % (n, err)

    print("KERNEL_OK")
</pallas_src>

<mosaic_0001>
module attributes {stable_mosaic.version = 11 : i64} {
  func.func @_fylm_head_kernel(%arg0: i32, %arg1: memref<8x290xf32, #tpu.memory_space<vmem>>, %arg2: memref<16x9xf32, #tpu.memory_space<smem>>, %arg3: memref<16xf32, #tpu.memory_space<smem>>, %arg4: memref<16xf32, #tpu.memory_space<smem>>, %arg5: memref<1xf32, #tpu.memory_space<smem>>, %arg6: memref<8x256xf32, #tpu.memory_space<vmem>>) attributes {dimension_semantics = [#tpu.dimension_semantics<parallel>], iteration_bounds = array<i64: 2>, scalar_prefetch = 0 : i64, scratch_operands = 0 : i64, tpu.core_type = #tpu.core_type<tc>, window_params = [{transform_indices = @transform_0, window_bounds = array<i64: 8, 290>}, {transform_indices = @transform_1, window_bounds = array<i64: 16, 9>}, {transform_indices = @transform_2, window_bounds = array<i64: 16>}, {transform_indices = @transform_3, window_bounds = array<i64: 16>}, {transform_indices = @transform_4, window_bounds = array<i64: 1>}, {transform_indices = @transform_5, window_bounds = array<i64: 8, 256>}]} {
    %0 = tpu.iota {dimensions = array<i32: 1>} : vector<8x256xi32>
    %c16_i32 = arith.constant 16 : i32
    %c0_i32 = arith.constant 0 : i32
    %1 = arith.cmpi eq, %c16_i32, %c0_i32 : i32
    %c1_i32 = arith.constant 1 : i32
    %2 = arith.select %1, %c1_i32, %c16_i32 : i32
    %3 = vector.broadcast %2 : i32 to vector<8x256xi32>
    %4 = arith.remsi %0, %3 : vector<8x256xi32>
    %c0_i32_0 = arith.constant 0 : i32
    %5 = vector.broadcast %c0_i32_0 : i32 to vector<8x256xi32>
    %6 = arith.cmpi ne, %4, %5 : vector<8x256xi32>
    %c0_i32_1 = arith.constant 0 : i32
    %7 = vector.broadcast %c0_i32_1 : i32 to vector<8x256xi32>
    %8 = arith.cmpi slt, %4, %7 : vector<8x256xi32>
    %c0_i32_2 = arith.constant 0 : i32
    %9 = arith.cmpi slt, %2, %c0_i32_2 : i32
    %10 = vector.broadcast %9 : i1 to vector<8x256xi1>
    %11 = vector.broadcast %10 : vector<8x256xi1> to vector<8x256xi1>
    %12 = arith.xori %8, %11 : vector<8x256xi1>
    %13 = arith.andi %12, %6 : vector<8x256xi1>
    %14 = vector.broadcast %2 : i32 to vector<8x256xi32>
    %15 = arith.addi %4, %14 : vector<8x256xi32>
    %16 = arith.select %13, %15, %4 : vector<8x256xi1>, vector<8x256xi32>
    %c1_i32_3 = arith.constant 1 : i32
    %17 = vector.broadcast %c1_i32_3 : i32 to vector<8x256xi32>
    %18 = arith.cmpi sge, %16, %17 : vector<8x256xi32>
    %c14_i32 = arith.constant 14 : i32
    %19 = vector.broadcast %c14_i32 : i32 to vector<8x256xi32>
    %20 = arith.cmpi sle, %16, %19 : vector<8x256xi32>
    %c0_i32_4 = arith.constant 0 : i32
    %c8_i32 = arith.constant 8 : i32
    %21 = arith.muli %c0_i32_4, %c8_i32 : i32
    %22 = tpu.assume_multiple %21, 8 : i32
    %23 = arith.index_cast %22 : i32 to index
    %c0 = arith.constant 0 : index
    %24 = vector.load %arg1[%23, %c0] : memref<8x290xf32, #tpu.memory_space<vmem>>, vector<8x256xf32>
    %cst = arith.constant 0.000000e+00 : f32
    %25 = vector.broadcast %cst : f32 to vector<8x256xf32>
    %26 = arith.select %18, %24, %25 : vector<8x256xi1>, vector<8x256xf32>
    %27 = arith.index_cast %22 : i32 to index
    %c1 = arith.constant 1 : index
    %28 = vector.load %arg1[%27, %c1] : memref<8x290xf32, #tpu.memory_space<vmem>>, vector<8x256xf32>
    %29 = arith.index_cast %22 : i32 to index
    %c2 = arith.constant 2 : index
    %30 = vector.load %arg1[%29, %c2] : memref<8x290xf32, #tpu.memory_space<vmem>>, vector<8x256xf32>
    %cst_5 = arith.constant 0.000000e+00 : f32
    %31 = vector.broadcast %cst_5 : f32 to vector<8x256xf32>
    %32 = arith.select %20, %30, %31 : vector<8x256xi1>, vector<8x256xf32>
    %33 = arith.index_cast %22 : i32 to index
    %c16 = arith.constant 16 : index
    %34 = vector.load %arg1[%33, %c16] : memref<8x290xf32, #tpu.memory_space<vmem>>, vector<8x256xf32>
    %cst_6 = arith.constant 0.000000e+00 : f32
    %35 = vector.broadcast %cst_6 : f32 to vector<8x256xf32>
    %36 = arith.select %18, %34, %35 : vector<8x256xi1>, vector<8x256xf32>
    %37 = arith.index_cast %22 : i32 to index
    %c17 = arith.constant 17 : index
    %38 = vector.load %arg1[%37, %c17] : memref<8x290xf32, #tpu.memory_space<vmem>>, vector<8x256xf32>
    %39 = arith.index_cast %22 : i32 to index
    %c18 = arith.constant 18 : index
    %40 = vector.load %arg1[%39, %c18] : memref<8x290xf32, #tpu.memory_space<vmem>>, vector<8x256xf32>
    %cst_7 = arith.constant 0.000000e+00 : f32
    %41 = vector.broadcast %cst_7 : f32 to vector<8x256xf32>
    %42 = arith.select %20, %40, %41 : vector<8x256xi1>, vector<8x256xf32>
    %43 = arith.index_cast %22 : i32 to index
    %c32 = arith.constant 32 : index
    %44 = vector.load %arg1[%43, %c32] : memref<8x290xf32, #tpu.memory_space<vmem>>, vector<8x256xf32>
    %cst_8 = arith.constant 0.000000e+00 : f32
    %45 = vector.broadcast %cst_8 : f32 to vector<8x256xf32>
    %46 = arith.select %18, %44, %45 : vector<8x256xi1>, vector<8x256xf32>
    %47 = arith.index_cast %22 : i32 to index
    %c33 = arith.constant 33 : index
    %48 = vector.load %arg1[%47, %c33] : memref<8x290xf32, #tpu.memory_space<vmem>>, vector<8x256xf32>
    %49 = arith.index_cast %22 : i32 to index
    %c34 = arith.constant 34 : index
    %50 = vector.load %arg1[%49, %c34] : memref<8x290xf32, #tpu.memory_space<vmem>>, vector<8x256xf32>
    %cst_9 = arith.constant 0.000000e+00 : f32
    %51 = vector.broadcast %cst_9 : f32 to vector<8x256xf32>
    %52 = arith.select %20, %50, %51 : vector<8x256xi1>, vector<8x256xf32>
    %cst_10 = arith.constant 0.000000e+00 : f32
    %53 = vector.broadcast %cst_10 : f32 to vector<8x256xf32>
    %cst_11 = arith.constant 0.000000e+00 : f32
    %54 = vector.broadcast %cst_11 : f32 to vector<8x1xf32>
    %c0_12 = arith.constant 0 : index
    %55 = memref.load %arg3[%c0_12] : memref<16xf32, #tpu.memory_space<smem>>
    %56 = vector.broadcast %55 : f32 to vector<8x256xf32>
    %c0_13 = arith.constant 0 : index
    %c0_14 = arith.constant 0 : index
    %57 = memref.load %arg2[%c0_13, %c0_14] : memref<16x9xf32, #tpu.memory_space<smem>>
    %58 = vector.broadcast %57 : f32 to vector<8x256xf32>
    %59 = arith.mulf %58, %26 : vector<8x256xf32>
    %60 = arith.addf %56, %59 : vector<8x256xf32>
    %c0_15 = arith.constant 0 : index
    %c1_16 = arith.constant 1 : index
    %61 = memref.load %arg2[%c0_15, %c1_16] : memref<16x9xf32, #tpu.memory_space<smem>>
    %62 = vector.broadcast %61 : f32 to vector<8x256xf32>
    %63 = arith.mulf %62, %28 : vector<8x256xf32>
    %64 = arith.addf %60, %63 : vector<8x256xf32>
    %c0_17 = arith.constant 0 : index
    %c2_18 = arith.constant 2 : index
    %65 = memref.load %arg2[%c0_17, %c2_18] : memref<16x9xf32, #tpu.memory_space<smem>>
    %66 = vector.broadcast %65 : f32 to vector<8x256xf32>
    %67 = arith.mulf %66, %32 : vector<8x256xf32>
    %68 = arith.addf %64, %67 : vector<8x256xf32>
    %c0_19 = arith.constant 0 : index
    %c3 = arith.constant 3 : index
    %69 = memref.load %arg2[%c0_19, %c3] : memref<16x9xf32, #tpu.memory_space<smem>>
    %70 = vector.broadcast %69 : f32 to vector<8x256xf32>
    %71 = arith.mulf %70, %36 : vector<8x256xf32>
    %72 = arith.addf %68, %71 : vector<8x256xf32>
    %c0_20 = arith.constant 0 : index
    %c4 = arith.constant 4 : index
    %73 = memref.load %arg2[%c0_20, %c4] : memref<16x9xf32, #tpu.memory_space<smem>>
    %74 = vector.broadcast %73 : f32 to vector<8x256xf32>
    %75 = arith.mulf %74, %38 : vector<8x256xf32>
    %76 = arith.addf %72, %75 : vector<8x256xf32>
    %c0_21 = arith.constant 0 : index
    %c5 = arith.constant 5 : index
    %77 = memref.load %arg2[%c0_21, %c5] : memref<16x9xf32, #tpu.memory_space<smem>>
    %78 = vector.broadcast %77 : f32 to vector<8x256xf32>
    %79 = arith.mulf %78, %42 : vector<8x256xf32>
    %80 = arith.addf %76, %79 : vector<8x256xf32>
    %c0_22 = arith.constant 0 : index
    %c6 = arith.constant 6 : index
    %81 = memref.load %arg2[%c0_22, %c6] : memref<16x9xf32, #tpu.memory_space<smem>>
    %82 = vector.broadcast %81 : f32 to vector<8x256xf32>
    %83 = arith.mulf %82, %46 : vector<8x256xf32>
    %84 = arith.addf %80, %83 : vector<8x256xf32>
    %c0_23 = arith.constant 0 : index
    %c7 = arith.constant 7 : index
    %85 = memref.load %arg2[%c0_23, %c7] : memref<16x9xf32, #tpu.memory_space<smem>>
    %86 = vector.broadcast %85 : f32 to vector<8x256xf32>
    %87 = arith.mulf %86, %48 : vector<8x256xf32>
    %88 = arith.addf %84, %87 : vector<8x256xf32>
    %c0_24 = arith.constant 0 : index
    %c8 = arith.constant 8 : index
    %89 = memref.load %arg2[%c0_24, %c8] : memref<16x9xf32, #tpu.memory_space<smem>>
    %90 = vector.broadcast %89 : f32 to vector<8x256xf32>
    %91 = arith.mulf %90, %52 : vector<8x256xf32>
    %92 = arith.addf %88, %91 : vector<8x256xf32>
    %cst_25 = arith.constant dense<0.000000e+00> : vector<8xf32>
    %93 = vector.multi_reduction <add>, %92, %cst_25 [1] : vector<8x256xf32> to vector<8xf32>
    %94 = vector.shape_cast %93 : vector<8xf32> to vector<8x1xf32>
    %95 = arith.mulf %92, %92 : vector<8x256xf32>
    %cst_26 = arith.constant dense<0.000000e+00> : vector<8xf32>
    %96 = vector.multi_reduction <add>, %95, %cst_26 [1] : vector<8x256xf32> to vector<8xf32>
    %97 = vector.shape_cast %96 : vector<8xf32> to vector<8x1xf32>
    %cst_27 = arith.constant 3.906250e-03 : f32
    %98 = vector.broadcast %cst_27 : f32 to vector<8x1xf32>
    %99 = arith.mulf %94, %98 : vector<8x1xf32>
    %cst_28 = arith.constant 3.906250e-03 : f32
    %100 = vector.broadcast %cst_28 : f32 to vector<8x1xf32>
    %101 = arith.mulf %97, %100 : vector<8x1xf32>
    %102 = arith.mulf %99, %99 : vector<8x1xf32>
    %103 = arith.subf %101, %102 : vector<8x1xf32>
    %c0_29 = arith.constant 0 : index
    %104 = memref.load %arg4[%c0_29] : memref<16xf32, #tpu.memory_space<smem>>
    %cst_30 = arith.constant 9.99999974E-6 : f32
    %105 = vector.broadcast %cst_30 : f32 to vector<8x1xf32>
    %106 = arith.addf %103, %105 : vector<8x1xf32>
    %107 = math.rsqrt %106 : vector<8x1xf32>
    %108 = vector.broadcast %104 : f32 to vector<8x1xf32>
    %109 = arith.mulf %108, %107 : vector<8x1xf32>
    %110 = vector.broadcast %109 : vector<8x1xf32> to vector<8x256xf32>
    %111 = arith.mulf %110, %92 : vector<8x256xf32>
    %112 = arith.addf %53, %111 : vector<8x256xf32>
    %113 = arith.mulf %109, %99 : vector<8x1xf32>
    %114 = arith.addf %54, %113 : vector<8x1xf32>
    %c1_31 = arith.constant 1 : index
    %115 = memref.load %arg3[%c1_31] : memref<16xf32, #tpu.memory_space<smem>>
    %116 = vector.broadcast %115 : f32 to vector<8x256xf32>
    %c1_32 = arith.constant 1 : index
    %c0_33 = arith.constant 0 : index
    %117 = memref.load %arg2[%c1_32, %c0_33] : memref<16x9xf32, #tpu.memory_space<smem>>
    %118 = vector.broadcast %117 : f32 to vector<8x256xf32>
    %119 = arith.mulf %118, %26 : vector<8x256xf32>
    %120 = arith.addf %116, %119 : vector<8x256xf32>
    %c1_34 = arith.constant 1 : index
    %c1_35 = arith.constant 1 : index
    %121 = memref.load %arg2[%c1_34, %c1_35] : memref<16x9xf32, #tpu.memory_space<smem>>
    %122 = vector.broadcast %121 : f32 to vector<8x256xf32>
    %123 = arith.mulf %122, %28 : vector<8x256xf32>
    %124 = arith.addf %120, %123 : vector<8x256xf32>
    %c1_36 = arith.constant 1 : index
    %c2_37 = arith.constant 2 : index
    %125 = memref.load %arg2[%c1_36, %c2_37] : memref<16x9xf32, #tpu.memory_space<smem>>
    %126 = vector.broadcast %125 : f32 to vector<8x256xf32>
    %127 = arith.mulf %126, %32 : vector<8x256xf32>
    %128 = arith.addf %124, %127 : vector<8x256xf32>
    %c1_38 = arith.constant 1 : index
    %c3_39 = arith.constant 3 : index
    %129 = memref.load %arg2[%c1_38, %c3_39] : memref<16x9xf32, #tpu.memory_space<smem>>
    %130 = vector.broadcast %129 : f32 to vector<8x256xf32>
    %131 = arith.mulf %130, %36 : vector<8x256xf32>
    %132 = arith.addf %128, %131 : vector<8x256xf32>
    %c1_40 = arith.constant 1 : index
    %c4_41 = arith.constant 4 : index
    %133 = memref.load %arg2[%c1_40, %c4_41] : memref<16x9xf32, #tpu.memory_space<smem>>
    %134 = vector.broadcast %133 : f32 to vector<8x256xf32>
    %135 = arith.mulf %134, %38 : vector<8x256xf32>
    %136 = arith.addf %132, %135 : vector<8x256xf32>
    %c1_42 = arith.constant 1 : index
    %c5_43 = arith.constant 5 : index
    %137 = memref.load %arg2[%c1_42, %c5_43] : memref<16x9xf32, #tpu.memory_space<smem>>
    %138 = vector.broadcast %137 : f32 to vector<8x256xf32>
    %139 = arith.mulf %138, %42 : vector<8x256xf32>
    %140 = arith.addf %136, %139 : vector<8x256xf32>
    %c1_44 = arith.constant 1 : index
    %c6_45 = arith.constant 6 : index
    %141 = memref.load %arg2[%c1_44, %c6_45] : memref<16x9xf32, #tpu.memory_space<smem>>
    %142 = vector.broadcast %141 : f32 to vector<8x256xf32>
    %143 = arith.mulf %142, %46 : vector<8x256xf32>
    %144 = arith.addf %140, %143 : vector<8x256xf32>
    %c1_46 = arith.constant 1 : index
    %c7_47 = arith.constant 7 : index
    %145 = memref.load %arg2[%c1_46, %c7_47] : memref<16x9xf32, #tpu.memory_space<smem>>
    %146 = vector.broadcast %145 : f32 to vector<8x256xf32>
    %147 = arith.mulf %146, %48 : vector<8x256xf32>
    %148 = arith.addf %144, %147 : vector<8x256xf32>
    %c1_48 = arith.constant 1 : index
    %c8_49 = arith.constant 8 : index
    %149 = memref.load %arg2[%c1_48, %c8_49] : memref<16x9xf32, #tpu.memory_space<smem>>
    %150 = vector.broadcast %149 : f32 to vector<8x256xf32>
    %151 = arith.mulf %150, %52 : vector<8x256xf32>
    %152 = arith.addf %148, %151 : vector<8x256xf32>
    %cst_50 = arith.constant dense<0.000000e+00> : vector<8xf32>
    %153 = vector.multi_reduction <add>, %152, %cst_50 [1] : vector<8x256xf32> to vector<8xf32>
    %154 = vector.shape_cast %153 : vector<8xf32> to vector<8x1xf32>
    %155 = arith.mulf %152, %152 : vector<8x256xf32>
    %cst_51 = arith.constant dense<0.000000e+00> : vector<8xf32>
    %156 = vector.multi_reduction <add>, %155, %cst_51 [1] : vector<8x256xf32> to vector<8xf32>
    %157 = vector.shape_cast %156 : vector<8xf32> to vector<8x1xf32>
    %cst_52 = arith.constant 3.906250e-03 : f32
    %158 = vector.broadcast %cst_52 : f32 to vector<8x1xf32>
    %159 = arith.mulf %154, %158 : vector<8x1xf32>
    %cst_53 = arith.constant 3.906250e-03 : f32
    %160 = vector.broadcast %cst_53 : f32 to vector<8x1xf32>
    %161 = arith.mulf %157, %160 : vector<8x1xf32>
    %162 = arith.mulf %159, %159 : vector<8x1xf32>
    %163 = arith.subf %161, %162 : vector<8x1xf32>
    %c1_54 = arith.constant 1 : index
    %164 = memref.load %arg4[%c1_54] : memref<16xf32, #tpu.memory_space<smem>>
    %cst_55 = arith.constant 9.99999974E-6 : f32
    %165 = vector.broadcast %cst_55 : f32 to vector<8x1xf32>
    %166 = arith.addf %163, %165 : vector<8x1xf32>
    %167 = math.rsqrt %166 : vector<8x1xf32>
    %168 = vector.broadcast %164 : f32 to vector<8x1xf32>
    %169 = arith.mulf %168, %167 : vector<8x1xf32>
    %170 = vector.broadcast %169 : vector<8x1xf32> to vector<8x256xf32>
    %171 = arith.mulf %170, %152 : vector<8x256xf32>
    %172 = arith.addf %112, %171 : vector<8x256xf32>
    %173 = arith.mulf %169, %159 : vector<8x1xf32>
    %174 = arith.addf %114, %173 : vector<8x1xf32>
    %c2_56 = arith.constant 2 : index
    %175 = memref.load %arg3[%c2_56] : memref<16xf32, #tpu.memory_space<smem>>
    %176 = vector.broadcast %175 : f32 to vector<8x256xf32>
    %c2_57 = arith.constant 2 : index
    %c0_58 = arith.constant 0 : index
    %177 = memref.load %arg2[%c2_57, %c0_58] : memref<16x9xf32, #tpu.memory_space<smem>>
    %178 = vector.broadcast %177 : f32 to vector<8x256xf32>
    %179 = arith.mulf %178, %26 : vector<8x256xf32>
    %180 = arith.addf %176, %179 : vector<8x256xf32>
    %c2_59 = arith.constant 2 : index
    %c1_60 = arith.constant 1 : index
    %181 = memref.load %arg2[%c2_59, %c1_60] : memref<16x9xf32, #tpu.memory_space<smem>>
    %182 = vector.broadcast %181 : f32 to vector<8x256xf32>
    %183 = arith.mulf %182, %28 : vector<8x256xf32>
    %184 = arith.addf %180, %183 : vector<8x256xf32>
    %c2_61 = arith.constant 2 : index
    %c2_62 = arith.constant 2 : index
    %185 = memref.load %arg2[%c2_61, %c2_62] : memref<16x9xf32, #tpu.memory_space<smem>>
    %186 = vector.broadcast %185 : f32 to vector<8x256xf32>
    %187 = arith.mulf %186, %32 : vector<8x256xf32>
    %188 = arith.addf %184, %187 : vector<8x256xf32>
    %c2_63 = arith.constant 2 : index
    %c3_64 = arith.constant 3 : index
    %189 = memref.load %arg2[%c2_63, %c3_64] : memref<16x9xf32, #tpu.memory_space<smem>>
    %190 = vector.broadcast %189 : f32 to vector<8x256xf32>
    %191 = arith.mulf %190, %36 : vector<8x256xf32>
    %192 = arith.addf %188, %191 : vector<8x256xf32>
    %c2_65 = arith.constant 2 : index
    %c4_66 = arith.constant 4 : index
    %193 = memref.load %arg2[%c2_65, %c4_66] : memref<16x9xf32, #tpu.memory_space<smem>>
    %194 = vector.broadcast %193 : f32 to vector<8x256xf32>
    %195 = arith.mulf %194, %38 : vector<8x256xf32>
    %196 = arith.addf %192, %195 : vector<8x256xf32>
    %c2_67 = arith.constant 2 : index
    %c5_68 = arith.constant 5 : index
    %197 = memref.load %arg2[%c2_67, %c5_68] : memref<16x9xf32, #tpu.memory_space<smem>>
    %198 = vector.broadcast %197 : f32 to vector<8x256xf32>
    %199 = arith.mulf %198, %42 : vector<8x256xf32>
    %200 = arith.addf %196, %199 : vector<8x256xf32>
    %c2_69 = arith.constant 2 : index
    %c6_70 = arith.constant 6 : index
    %201 = memref.load %arg2[%c2_69, %c6_70] : memref<16x9xf32, #tpu.memory_space<smem>>
    %202 = vector.broadcast %201 : f32 to vector<8x256xf32>
    %203 = arith.mulf %202, %46 : vector<8x256xf32>
    %204 = arith.addf %200, %203 : vector<8x256xf32>
    %c2_71 = arith.constant 2 : index
    %c7_72 = arith.constant 7 : index
    %205 = memref.load %arg2[%c2_71, %c7_72] : memref<16x9xf32, #tpu.memory_space<smem>>
    %206 = vector.broadcast %205 : f32 to vector<8x256xf32>
    %207 = arith.mulf %206, %48 : vector<8x256xf32>
    %208 = arith.addf %204, %207 : vector<8x256xf32>
    %c2_73 = arith.constant 2 : index
    %c8_74 = arith.constant 8 : index
    %209 = memref.load %arg2[%c2_73, %c8_74] : memref<16x9xf32, #tpu.memory_space<smem>>
    %210 = vector.broadcast %209 : f32 to vector<8x256xf32>
    %211 = arith.mulf %210, %52 : vector<8x256xf32>
    %212 = arith.addf %208, %211 : vector<8x256xf32>
    %cst_75 = arith.constant dense<0.000000e+00> : vector<8xf32>
    %213 = vector.multi_reduction <add>, %212, %cst_75 [1] : vector<8x256xf32> to vector<8xf32>
    %214 = vector.shape_cast %213 : vector<8xf32> to vector<8x1xf32>
    %215 = arith.mulf %212, %212 : vector<8x256xf32>
    %cst_76 = arith.constant dense<0.000000e+00> : vector<8xf32>
    %216 = vector.multi_reduction <add>, %215, %cst_76 [1] : vector<8x256xf32> to vector<8xf32>
    %217 = vector.shape_cast %216 : vector<8xf32> to vector<8x1xf32>
    %cst_77 = arith.constant 3.906250e-03 : f32
    %218 = vector.broadcast %cst_77 : f32 to vector<8x1xf32>
    %219 = arith.mulf %214, %218 : vector<8x1xf32>
    %cst_78 = arith.constant 3.906250e-03 : f32
    %220 = vector.broadcast %cst_78 : f32 to vector<8x1xf32>
    %221 = arith.mulf %217, %220 : vector<8x1xf32>
    %222 = arith.mulf %219, %219 : vector<8x1xf32>
    %223 = arith.subf %221, %222 : vector<8x1xf32>
    %c2_79 = arith.constant 2 : index
    %224 = memref.load %arg4[%c2_79] : memref<16xf32, #tpu.memory_space<smem>>
    %cst_80 = arith.constant 9.99999974E-6 : f32
    %225 = vector.broadcast %cst_80 : f32 to vector<8x1xf32>
    %226 = arith.addf %223, %225 : vector<8x1xf32>
    %227 = math.rsqrt %226 : vector<8x1xf32>
    %228 = vector.broadcast %224 : f32 to vector<8x1xf32>
    %229 = arith.mulf %228, %227 : vector<8x1xf32>
    %230 = vector.broadcast %229 : vector<8x1xf32> to vector<8x256xf32>
    %231 = arith.mulf %230, %212 : vector<8x256xf32>
    %232 = arith.addf %172, %231 : vector<8x256xf32>
    %233 = arith.mulf %229, %219 : vector<8x1xf32>
    %234 = arith.addf %174, %233 : vector<8x1xf32>
    %c3_81 = arith.constant 3 : index
    %235 = memref.load %arg3[%c3_81] : memref<16xf32, #tpu.memory_space<smem>>
    %236 = vector.broadcast %235 : f32 to vector<8x256xf32>
    %c3_82 = arith.constant 3 : index
    %c0_83 = arith.constant 0 : index
    %237 = memref.load %arg2[%c3_82, %c0_83] : memref<16x9xf32, #tpu.memory_space<smem>>
    %238 = vector.broadcast %237 : f32 to vector<8x256xf32>
    %239 = arith.mulf %238, %26 : vector<8x256xf32>
    %240 = arith.addf %236, %239 : vector<8x256xf32>
    %c3_84 = arith.constant 3 : index
    %c1_85 = arith.constant 1 : index
    %241 = memref.load %arg2[%c3_84, %c1_85] : memref<16x9xf32, #tpu.memory_space<smem>>
    %242 = vector.broadcast %241 : f32 to vector<8x256xf32>
    %243 = arith.mulf %242, %28 : vector<8x256xf32>
    %244 = arith.addf %240, %243 : vector<8x256xf32>
    %c3_86 = arith.constant 3 : index
    %c2_87 = arith.constant 2 : index
    %245 = memref.load %arg2[%c3_86, %c2_87] : memref<16x9xf32, #tpu.memory_space<smem>>
    %246 = vector.broadcast %245 : f32 to vector<8x256xf32>
    %247 = arith.mulf %246, %32 : vector<8x256xf32>
    %248 = arith.addf %244, %247 : vector<8x256xf32>
    %c3_88 = arith.constant 3 : index
    %c3_89 = arith.constant 3 : index
    %249 = memref.load %arg2[%c3_88, %c3_89] : memref<16x9xf32, #tpu.memory_space<smem>>
    %250 = vector.broadcast %249 : f32 to vector<8x256xf32>
    %251 = arith.mulf %250, %36 : vector<8x256xf32>
    %252 = arith.addf %248, %251 : vector<8x256xf32>
    %c3_90 = arith.constant 3 : index
    %c4_91 = arith.constant 4 : index
    %253 = memref.load %arg2[%c3_90, %c4_91] : memref<16x9xf32, #tpu.memory_space<smem>>
    %254 = vector.broadcast %253 : f32 to vector<8x256xf32>
    %255 = arith.mulf %254, %38 : vector<8x256xf32>
    %256 = arith.addf %252, %255 : vector<8x256xf32>
    %c3_92 = arith.constant 3 : index
    %c5_93 = arith.constant 5 : index
    %257 = memref.load %arg2[%c3_92, %c5_93] : memref<16x9xf32, #tpu.memory_space<smem>>
    %258 = vector.broadcast %257 : f32 to vector<8x256xf32>
    %259 = arith.mulf %258, %42 : vector<8x256xf32>
    %260 = arith.addf %256, %259 : vector<8x256xf32>
    %c3_94 = arith.constant 3 : index
    %c6_95 = arith.constant 6 : index
    %261 = memref.load %arg2[%c3_94, %c6_95] : memref<16x9xf32, #tpu.memory_space<smem>>
    %262 = vector.broadcast %261 : f32 to vector<8x256xf32>
    %263 = arith.mulf %262, %46 : vector<8x256xf32>
    %264 = arith.addf %260, %263 : vector<8x256xf32>
    %c3_96 = arith.constant 3 : index
    %c7_97 = arith.constant 7 : index
    %265 = memref.load %arg2[%c3_96, %c7_97] : memref<16x9xf32, #tpu.memory_space<smem>>
    %266 = vector.broadcast %265 : f32 to vector<8x256xf32>
    %267 = arith.mulf %266, %48 : vector<8x256xf32>
    %268 = arith.addf %264, %267 : vector<8x256xf32>
    %c3_98 = arith.constant 3 : index
    %c8_99 = arith.constant 8 : index
    %269 = memref.load %arg2[%c3_98, %c8_99] : memref<16x9xf32, #tpu.memory_space<smem>>
    %270 = vector.broadcast %269 : f32 to vector<8x256xf32>
    %271 = arith.mulf %270, %52 : vector<8x256xf32>
    %272 = arith.addf %268, %271 : vector<8x256xf32>
    %cst_100 = arith.constant dense<0.000000e+00> : vector<8xf32>
    %273 = vector.multi_reduction <add>, %272, %cst_100 [1] : vector<8x256xf32> to vector<8xf32>
    %274 = vector.shape_cast %273 : vector<8xf32> to vector<8x1xf32>
    %275 = arith.mulf %272, %272 : vector<8x256xf32>
    %cst_101 = arith.constant dense<0.000000e+00> : vector<8xf32>
    %276 = vector.multi_reduction <add>, %275, %cst_101 [1] : vector<8x256xf32> to vector<8xf32>
    %277 = vector.shape_cast %276 : vector<8xf32> to vector<8x1xf32>
    %cst_102 = arith.constant 3.906250e-03 : f32
    %278 = vector.broadcast %cst_102 : f32 to vector<8x1xf32>
    %279 = arith.mulf %274, %278 : vector<8x1xf32>
    %cst_103 = arith.constant 3.906250e-03 : f32
    %280 = vector.broadcast %cst_103 : f32 to vector<8x1xf32>
    %281 = arith.mulf %277, %280 : vector<8x1xf32>
    %282 = arith.mulf %279, %279 : vector<8x1xf32>
    %283 = arith.subf %281, %282 : vector<8x1xf32>
    %c3_104 = arith.constant 3 : index
    %284 = memref.load %arg4[%c3_104] : memref<16xf32, #tpu.memory_space<smem>>
    %cst_105 = arith.constant 9.99999974E-6 : f32
    %285 = vector.broadcast %cst_105 : f32 to vector<8x1xf32>
    %286 = arith.addf %283, %285 : vector<8x1xf32>
    %287 = math.rsqrt %286 : vector<8x1xf32>
    %288 = vector.broadcast %284 : f32 to vector<8x1xf32>
    %289 = arith.mulf %288, %287 : vector<8x1xf32>
    %290 = vector.broadcast %289 : vector<8x1xf32> to vector<8x256xf32>
    %291 = arith.mulf %290, %272 : vector<8x256xf32>
    %292 = arith.addf %232, %291 : vector<8x256xf32>
    %293 = arith.mulf %289, %279 : vector<8x1xf32>
    %294 = arith.addf %234, %293 : vector<8x1xf32>
    %c4_106 = arith.constant 4 : index
    %295 = memref.load %arg3[%c4_106] : memref<16xf32, #tpu.memory_space<smem>>
    %296 = vector.broadcast %295 : f32 to vector<8x256xf32>
    %c4_107 = arith.constant 4 : index
    %c0_108 = arith.constant 0 : index
    %297 = memref.load %arg2[%c4_107, %c0_108] : memref<16x9xf32, #tpu.memory_space<smem>>
    %298 = vector.broadcast %297 : f32 to vector<8x256xf32>
    %299 = arith.mulf %298, %26 : vector<8x256xf32>
    %300 = arith.addf %296, %299 : vector<8x256xf32>
    %c4_109 = arith.constant 4 : index
    %c1_110 = arith.constant 1 : index
    %301 = memref.load %arg2[%c4_109, %c1_110] : memref<16x9xf32, #tpu.memory_space<smem>>
    %302 = vector.broadcast %301 : f32 to vector<8x256xf32>
    %303 = arith.mulf %302, %28 : vector<8x256xf32>
    %304 = arith.addf %300, %303 : vector<8x256xf32>
    %c4_111 = arith.constant 4 : index
    %c2_112 = arith.constant 2 : index
    %305 = memref.load %arg2[%c4_111, %c2_112] : memref<16x9xf32, #tpu.memory_space<smem>>
    %306 = vector.broadcast %305 : f32 to vector<8x256xf32>
    %307 = arith.mulf %306, %32 : vector<8x256xf32>
    %308 = arith.addf %304, %307 : vector<8x256xf32>
    %c4_113 = arith.constant 4 : index
    %c3_114 = arith.constant 3 : index
    %309 = memref.load %arg2[%c4_113, %c3_114] : memref<16x9xf32, #tpu.memory_space<smem>>
    %310 = vector.broadcast %309 : f32 to vector<8x256xf32>
    %311 = arith.mulf %310, %36 : vector<8x256xf32>
    %312 = arith.addf %308, %311 : vector<8x256xf32>
    %c4_115 = arith.constant 4 : index
    %c4_116 = arith.constant 4 : index
    %313 = memref.load %arg2[%c4_115, %c4_116] : memref<16x9xf32, #tpu.memory_space<smem>>
    %314 = vector.broadcast %313 : f32 to vector<8x256xf32>
    %315 = arith.mulf %314, %38 : vector<8x256xf32>
    %316 = arith.addf %312, %315 : vector<8x256xf32>
    %c4_117 = arith.constant 4 : index
    %c5_118 = arith.constant 5 : index
    %317 = memref.load %arg2[%c4_117, %c5_118] : memref<16x9xf32, #tpu.memory_space<smem>>
    %318 = vector.broadcast %317 : f32 to vector<8x256xf32>
    %319 = arith.mulf %318, %42 : vector<8x256xf32>
    %320 = arith.addf %316, %319 : vector<8x256xf32>
    %c4_119 = arith.constant 4 : index
    %c6_120 = arith.constant 6 : index
    %321 = memref.load %arg2[%c4_119, %c6_120] : memref<16x9xf32, #tpu.memory_space<smem>>
    %322 = vector.broadcast %321 : f32 to vector<8x256xf32>
    %323 = arith.mulf %322, %46 : vector<8x256xf32>
    %324 = arith.addf %320, %323 : vector<8x256xf32>
    %c4_121 = arith.constant 4 : index
    %c7_122 = arith.constant 7 : index
    %325 = memref.load %arg2[%c4_121, %c7_122] : memref<16x9xf32, #tpu.memory_space<smem>>
    %326 = vector.broadcast %325 : f32 to vector<8x256xf32>
    %327 = arith.mulf %326, %48 : vector<8x256xf32>
    %328 = arith.addf %324, %327 : vector<8x256xf32>
    %c4_123 = arith.constant 4 : index
    %c8_124 = arith.constant 8 : index
    %329 = memref.load %arg2[%c4_123, %c8_124] : memref<16x9xf32, #tpu.memory_space<smem>>
    %330 = vector.broadcast %329 : f32 to vector<8x256xf32>
    %331 = arith.mulf %330, %52 : vector<8x256xf32>
    %332 = arith.addf %328, %331 : vector<8x256xf32>
    %cst_125 = arith.constant dense<0.000000e+00> : vector<8xf32>
    %333 = vector.multi_reduction <add>, %332, %cst_125 [1] : vector<8x256xf32> to vector<8xf32>
    %334 = vector.shape_cast %333 : vector<8xf32> to vector<8x1xf32>
    %335 = arith.mulf %332, %332 : vector<8x256xf32>
    %cst_126 = arith.constant dense<0.000000e+00> : vector<8xf32>
    %336 = vector.multi_reduction <add>, %335, %cst_126 [1] : vector<8x256xf32> to vector<8xf32>
    %337 = vector.shape_cast %336 : vector<8xf32> to vector<8x1xf32>
    %cst_127 = arith.constant 3.906250e-03 : f32
    %338 = vector.broadcast %cst_127 : f32 to vector<8x1xf32>
    %339 = arith.mulf %334, %338 : vector<8x1xf32>
    %cst_128 = arith.constant 3.906250e-03 : f32
    %340 = vector.broadcast %cst_128 : f32 to vector<8x1xf32>
    %341 = arith.mulf %337, %340 : vector<8x1xf32>
    %342 = arith.mulf %339, %339 : vector<8x1xf32>
    %343 = arith.subf %341, %342 : vector<8x1xf32>
    %c4_129 = arith.constant 4 : index
    %344 = memref.load %arg4[%c4_129] : memref<16xf32, #tpu.memory_space<smem>>
    %cst_130 = arith.constant 9.99999974E-6 : f32
    %345 = vector.broadcast %cst_130 : f32 to vector<8x1xf32>
    %346 = arith.addf %343, %345 : vector<8x1xf32>
    %347 = math.rsqrt %346 : vector<8x1xf32>
    %348 = vector.broadcast %344 : f32 to vector<8x1xf32>
    %349 = arith.mulf %348, %347 : vector<8x1xf32>
    %350 = vector.broadcast %349 : vector<8x1xf32> to vector<8x256xf32>
    %351 = arith.mulf %350, %332 : vector<8x256xf32>
    %352 = arith.addf %292, %351 : vector<8x256xf32>
    %353 = arith.mulf %349, %339 : vector<8x1xf32>
    %354 = arith.addf %294, %353 : vector<8x1xf32>
    %c5_131 = arith.constant 5 : index
    %355 = memref.load %arg3[%c5_131] : memref<16xf32, #tpu.memory_space<smem>>
    %356 = vector.broadcast %355 : f32 to vector<8x256xf32>
    %c5_132 = arith.constant 5 : index
    %c0_133 = arith.constant 0 : index
    %357 = memref.load %arg2[%c5_132, %c0_133] : memref<16x9xf32, #tpu.memory_space<smem>>
    %358 = vector.broadcast %357 : f32 to vector<8x256xf32>
    %359 = arith.mulf %358, %26 : vector<8x256xf32>
    %360 = arith.addf %356, %359 : vector<8x256xf32>
    %c5_134 = arith.constant 5 : index
    %c1_135 = arith.constant 1 : index
    %361 = memref.load %arg2[%c5_134, %c1_135] : memref<16x9xf32, #tpu.memory_space<smem>>
    %362 = vector.broadcast %361 : f32 to vector<8x256xf32>
    %363 = arith.mulf %362, %28 : vector<8x256xf32>
    %364 = arith.addf %360, %363 : vector<8x256xf32>
    %c5_136 = arith.constant 5 : index
    %c2_137 = arith.constant 2 : index
    %365 = memref.load %arg2[%c5_136, %c2_137] : memref<16x9xf32, #tpu.memory_space<smem>>
    %366 = vector.broadcast %365 : f32 to vector<8x256xf32>
    %367 = arith.mulf %366, %32 : vector<8x256xf32>
    %368 = arith.addf %364, %367 : vector<8x256xf32>
    %c5_138 = arith.constant 5 : index
    %c3_139 = arith.constant 3 : index
    %369 = memref.load %arg2[%c5_138, %c3_139] : memref<16x9xf32, #tpu.memory_space<smem>>
    %370 = vector.broadcast %369 : f32 to vector<8x256xf32>
    %371 = arith.mulf %370, %36 : vector<8x256xf32>
    %372 = arith.addf %368, %371 : vector<8x256xf32>
    %c5_140 = arith.constant 5 : index
    %c4_141 = arith.constant 4 : index
    %373 = memref.load %arg2[%c5_140, %c4_141] : memref<16x9xf32, #tpu.memory_space<smem>>
    %374 = vector.broadcast %373 : f32 to vector<8x256xf32>
    %375 = arith.mulf %374, %38 : vector<8x256xf32>
    %376 = arith.addf %372, %375 : vector<8x256xf32>
    %c5_142 = arith.constant 5 : index
    %c5_143 = arith.constant 5 : index
    %377 = memref.load %arg2[%c5_142, %c5_143] : memref<16x9xf32, #tpu.memory_space<smem>>
    %378 = vector.broadcast %377 : f32 to vector<8x256xf32>
    %379 = arith.mulf %378, %42 : vector<8x256xf32>
    %380 = arith.addf %376, %379 : vector<8x256xf32>
    %c5_144 = arith.constant 5 : index
    %c6_145 = arith.constant 6 : index
    %381 = memref.load %arg2[%c5_144, %c6_145] : memref<16x9xf32, #tpu.memory_space<smem>>
    %382 = vector.broadcast %381 : f32 to vector<8x256xf32>
    %383 = arith.mulf %382, %46 : vector<8x256xf32>
    %384 = arith.addf %380, %383 : vector<8x256xf32>
    %c5_146 = arith.constant 5 : index
    %c7_147 = arith.constant 7 : index
    %385 = memref.load %arg2[%c5_146, %c7_147] : memref<16x9xf32, #tpu.memory_space<smem>>
    %386 = vector.broadcast %385 : f32 to vector<8x256xf32>
    %387 = arith.mulf %386, %48 : vector<8x256xf32>
    %388 = arith.addf %384, %387 : vector<8x256xf32>
    %c5_148 = arith.constant 5 : index
    %c8_149 = arith.constant 8 : index
    %389 = memref.load %arg2[%c5_148, %c8_149] : memref<16x9xf32, #tpu.memory_space<smem>>
    %390 = vector.broadcast %389 : f32 to vector<8x256xf32>
    %391 = arith.mulf %390, %52 : vector<8x256xf32>
    %392 = arith.addf %388, %391 : vector<8x256xf32>
    %cst_150 = arith.constant dense<0.000000e+00> : vector<8xf32>
    %393 = vector.multi_reduction <add>, %392, %cst_150 [1] : vector<8x256xf32> to vector<8xf32>
    %394 = vector.shape_cast %393 : vector<8xf32> to vector<8x1xf32>
    %395 = arith.mulf %392, %392 : vector<8x256xf32>
    %cst_151 = arith.constant dense<0.000000e+00> : vector<8xf32>
    %396 = vector.multi_reduction <add>, %395, %cst_151 [1] : vector<8x256xf32> to vector<8xf32>
    %397 = vector.shape_cast %396 : vector<8xf32> to vector<8x1xf32>
    %cst_152 = arith.constant 3.906250e-03 : f32
    %398 = vector.broadcast %cst_152 : f32 to vector<8x1xf32>
    %399 = arith.mulf %394, %398 : vector<8x1xf32>
    %cst_153 = arith.constant 3.906250e-03 : f32
    %400 = vector.broadcast %cst_153 : f32 to vector<8x1xf32>
    %401 = arith.mulf %397, %400 : vector<8x1xf32>
    %402 = arith.mulf %399, %399 : vector<8x1xf32>
    %403 = arith.subf %401, %402 : vector<8x1xf32>
    %c5_154 = arith.constant 5 : index
    %404 = memref.load %arg4[%c5_154] : memref<16xf32, #tpu.memory_space<smem>>
    %cst_155 = arith.constant 9.99999974E-6 : f32
    %405 = vector.broadcast %cst_155 : f32 to vector<8x1xf32>
    %406 = arith.addf %403, %405 : vector<8x1xf32>
    %407 = math.rsqrt %406 : vector<8x1xf32>
    %408 = vector.broadcast %404 : f32 to vector<8x1xf32>
    %409 = arith.mulf %408, %407 : vector<8x1xf32>
    %410 = vector.broadcast %409 : vector<8x1xf32> to vector<8x256xf32>
    %411 = arith.mulf %410, %392 : vector<8x256xf32>
    %412 = arith.addf %352, %411 : vector<8x256xf32>
    %413 = arith.mulf %409, %399 : vector<8x1xf32>
    %414 = arith.addf %354, %413 : vector<8x1xf32>
    %c6_156 = arith.constant 6 : index
    %415 = memref.load %arg3[%c6_156] : memref<16xf32, #tpu.memory_space<smem>>
    %416 = vector.broadcast %415 : f32 to vector<8x256xf32>
    %c6_157 = arith.constant 6 : index
    %c0_158 = arith.constant 0 : index
    %417 = memref.load %arg2[%c6_157, %c0_158] : memref<16x9xf32, #tpu.memory_space<smem>>
    %418 = vector.broadcast %417 : f32 to vector<8x256xf32>
    %419 = arith.mulf %418, %26 : vector<8x256xf32>
    %420 = arith.addf %416, %419 : vector<8x256xf32>
    %c6_159 = arith.constant 6 : index
    %c1_160 = arith.constant 1 : index
    %421 = memref.load %arg2[%c6_159, %c1_160] : memref<16x9xf32, #tpu.memory_space<smem>>
    %422 = vector.broadcast %421 : f32 to vector<8x256xf32>
    %423 = arith.mulf %422, %28 : vector<8x256xf32>
    %424 = arith.addf %420, %423 : vector<8x256xf32>
    %c6_161 = arith.constant 6 : index
    %c2_162 = arith.constant 2 : index
    %425 = memref.load %arg2[%c6_161, %c2_162] : memref<16x9xf32, #tpu.memory_space<smem>>
    %426 = vector.broadcast %425 : f32 to vector<8x256xf32>
    %427 = arith.mulf %426, %32 : vector<8x256xf32>
    %428 = arith.addf %424, %427 : vector<8x256xf32>
    %c6_163 = arith.constant 6 : index
    %c3_164 = arith.constant 3 : index
    %429 = memref.load %arg2[%c6_163, %c3_164] : memref<16x9xf32, #tpu.memory_space<smem>>
    %430 = vector.broadcast %429 : f32 to vector<8x256xf32>
    %431 = arith.mulf %430, %36 : vector<8x256xf32>
    %432 = arith.addf %428, %431 : vector<8x256xf32>
    %c6_165 = arith.constant 6 : index
    %c4_166 = arith.constant 4 : index
    %433 = memref.load %arg2[%c6_165, %c4_166] : memref<16x9xf32, #tpu.memory_space<smem>>
    %434 = vector.broadcast %433 : f32 to vector<8x256xf32>
    %435 = arith.mulf %434, %38 : vector<8x256xf32>
    %436 = arith.addf %432, %435 : vector<8x256xf32>
    %c6_167 = arith.constant 6 : index
    %c5_168 = arith.constant 5 : index
    %437 = memref.load %arg2[%c6_167, %c5_168] : memref<16x9xf32, #tpu.memory_space<smem>>
    %438 = vector.broadcast %437 : f32 to vector<8x256xf32>
    %439 = arith.mulf %438, %42 : vector<8x256xf32>
    %440 = arith.addf %436, %439 : vector<8x256xf32>
    %c6_169 = arith.constant 6 : index
    %c6_170 = arith.constant 6 : index
    %441 = memref.load %arg2[%c6_169, %c6_170] : memref<16x9xf32, #tpu.memory_space<smem>>
    %442 = vector.broadcast %441 : f32 to vector<8x256xf32>
    %443 = arith.mulf %442, %46 : vector<8x256xf32>
    %444 = arith.addf %440, %443 : vector<8x256xf32>
    %c6_171 = arith.constant 6 : index
    %c7_172 = arith.constant 7 : index
    %445 = memref.load %arg2[%c6_171, %c7_172] : memref<16x9xf32, #tpu.memory_space<smem>>
    %446 = vector.broadcast %445 : f32 to vector<8x256xf32>
    %447 = arith.mulf %446, %48 : vector<8x256xf32>
    %448 = arith.addf %444, %447 : vector<8x256xf32>
    %c6_173 = arith.constant 6 : index
    %c8_174 = arith.constant 8 : index
    %449 = memref.load %arg2[%c6_173, %c8_174] : memref<16x9xf32, #tpu.memory_space<smem>>
    %450 = vector.broadcast %449 : f32 to vector<8x256xf32>
    %451 = arith.mulf %450, %52 : vector<8x256xf32>
    %452 = arith.addf %448, %451 : vector<8x256xf32>
    %cst_175 = arith.constant dense<0.000000e+00> : vector<8xf32>
    %453 = vector.multi_reduction <add>, %452, %cst_175 [1] : vector<8x256xf32> to vector<8xf32>
    %454 = vector.shape_cast %453 : vector<8xf32> to vector<8x1xf32>
    %455 = arith.mulf %452, %452 : vector<8x256xf32>
    %cst_176 = arith.constant dense<0.000000e+00> : vector<8xf32>
    %456 = vector.multi_reduction <add>, %455, %cst_176 [1] : vector<8x256xf32> to vector<8xf32>
    %457 = vector.shape_cast %456 : vector<8xf32> to vector<8x1xf32>
    %cst_177 = arith.constant 3.906250e-03 : f32
    %458 = vector.broadcast %cst_177 : f32 to vector<8x1xf32>
    %459 = arith.mulf %454, %458 : vector<8x1xf32>
    %cst_178 = arith.constant 3.906250e-03 : f32
    %460 = vector.broadcast %cst_178 : f32 to vector<8x1xf32>
    %461 = arith.mulf %457, %460 : vector<8x1xf32>
    %462 = arith.mulf %459, %459 : vector<8x1xf32>
    %463 = arith.subf %461, %462 : vector<8x1xf32>
    %c6_179 = arith.constant 6 : index
    %464 = memref.load %arg4[%c6_179] : memref<16xf32, #tpu.memory_space<smem>>
    %cst_180 = arith.constant 9.99999974E-6 : f32
    %465 = vector.broadcast %cst_180 : f32 to vector<8x1xf32>
    %466 = arith.addf %463, %465 : vector<8x1xf32>
    %467 = math.rsqrt %466 : vector<8x1xf32>
    %468 = vector.broadcast %464 : f32 to vector<8x1xf32>
    %469 = arith.mulf %468, %467 : vector<8x1xf32>
    %470 = vector.broadcast %469 : vector<8x1xf32> to vector<8x256xf32>
    %471 = arith.mulf %470, %452 : vector<8x256xf32>
    %472 = arith.addf %412, %471 : vector<8x256xf32>
    %473 = arith.mulf %469, %459 : vector<8x1xf32>
    %474 = arith.addf %414, %473 : vector<8x1xf32>
    %c7_181 = arith.constant 7 : index
    %475 = memref.load %arg3[%c7_181] : memref<16xf32, #tpu.memory_space<smem>>
    %476 = vector.broadcast %475 : f32 to vector<8x256xf32>
    %c7_182 = arith.constant 7 : index
    %c0_183 = arith.constant 0 : index
    %477 = memref.load %arg2[%c7_182, %c0_183] : memref<16x9xf32, #tpu.memory_space<smem>>
    %478 = vector.broadcast %477 : f32 to vector<8x256xf32>
    %479 = arith.mulf %478, %26 : vector<8x256xf32>
    %480 = arith.addf %476, %479 : vector<8x256xf32>
    %c7_184 = arith.constant 7 : index
    %c1_185 = arith.constant 1 : index
    %481 = memref.load %arg2[%c7_184, %c1_185] : memref<16x9xf32, #tpu.memory_space<smem>>
    %482 = vector.broadcast %481 : f32 to vector<8x256xf32>
    %483 = arith.mulf %482, %28 : vector<8x256xf32>
    %484 = arith.addf %480, %483 : vector<8x256xf32>
    %c7_186 = arith.constant 7 : index
    %c2_187 = arith.constant 2 : index
    %485 = memref.load %arg2[%c7_186, %c2_187] : memref<16x9xf32, #tpu.memory_space<smem>>
    %486 = vector.broadcast %485 : f32 to vector<8x256xf32>
    %487 = arith.mulf %486, %32 : vector<8x256xf32>
    %488 = arith.addf %484, %487 : vector<8x256xf32>
    %c7_188 = arith.constant 7 : index
    %c3_189 = arith.constant 3 : index
    %489 = memref.load %arg2[%c7_188, %c3_189] : memref<16x9xf32, #tpu.memory_space<smem>>
    %490 = vector.broadcast %489 : f32 to vector<8x256xf32>
    %491 = arith.mulf %490, %36 : vector<8x256xf32>
    %492 = arith.addf %488, %491 : vector<8x256xf32>
    %c7_190 = arith.constant 7 : index
    %c4_191 = arith.constant 4 : index
    %493 = memref.load %arg2[%c7_190, %c4_191] : memref<16x9xf32, #tpu.memory_space<smem>>
    %494 = vector.broadcast %493 : f32 to vector<8x256xf32>
    %495 = arith.mulf %494, %38 : vector<8x256xf32>
    %496 = arith.addf %492, %495 : vector<8x256xf32>
    %c7_192 = arith.constant 7 : index
    %c5_193 = arith.constant 5 : index
    %497 = memref.load %arg2[%c7_192, %c5_193] : memref<16x9xf32, #tpu.memory_space<smem>>
    %498 = vector.broadcast %497 : f32 to vector<8x256xf32>
    %499 = arith.mulf %498, %42 : vector<8x256xf32>
    %500 = arith.addf %496, %499 : vector<8x256xf32>
    %c7_194 = arith.constant 7 : index
    %c6_195 = arith.constant 6 : index
    %501 = memref.load %arg2[%c7_194, %c6_195] : memref<16x9xf32, #tpu.memory_space<smem>>
    %502 = vector.broadcast %501 : f32 to vector<8x256xf32>
    %503 = arith.mulf %502, %46 : vector<8x256xf32>
    %504 = arith.addf %500, %503 : vector<8x256xf32>
    %c7_196 = arith.constant 7 : index
    %c7_197 = arith.constant 7 : index
    %505 = memref.load %arg2[%c7_196, %c7_197] : memref<16x9xf32, #tpu.memory_space<smem>>
    %506 = vector.broadcast %505 : f32 to vector<8x256xf32>
    %507 = arith.mulf %506, %48 : vector<8x256xf32>
    %508 = arith.addf %504, %507 : vector<8x256xf32>
    %c7_198 = arith.constant 7 : index
    %c8_199 = arith.constant 8 : index
    %509 = memref.load %arg2[%c7_198, %c8_199] : memref<16x9xf32, #tpu.memory_space<smem>>
    %510 = vector.broadcast %509 : f32 to vector<8x256xf32>
    %511 = arith.mulf %510, %52 : vector<8x256xf32>
    %512 = arith.addf %508, %511 : vector<8x256xf32>
    %cst_200 = arith.constant dense<0.000000e+00> : vector<8xf32>
    %513 = vector.multi_reduction <add>, %512, %cst_200 [1] : vector<8x256xf32> to vector<8xf32>
    %514 = vector.shape_cast %513 : vector<8xf32> to vector<8x1xf32>
    %515 = arith.mulf %512, %512 : vector<8x256xf32>
    %cst_201 = arith.constant dense<0.000000e+00> : vector<8xf32>
    %516 = vector.multi_reduction <add>, %515, %cst_201 [1] : vector<8x256xf32> to vector<8xf32>
    %517 = vector.shape_cast %516 : vector<8xf32> to vector<8x1xf32>
    %cst_202 = arith.constant 3.906250e-03 : f32
    %518 = vector.broadcast %cst_202 : f32 to vector<8x1xf32>
    %519 = arith.mulf %514, %518 : vector<8x1xf32>
    %cst_203 = arith.constant 3.906250e-03 : f32
    %520 = vector.broadcast %cst_203 : f32 to vector<8x1xf32>
    %521 = arith.mulf %517, %520 : vector<8x1xf32>
    %522 = arith.mulf %519, %519 : vector<8x1xf32>
    %523 = arith.subf %521, %522 : vector<8x1xf32>
    %c7_204 = arith.constant 7 : index
    %524 = memref.load %arg4[%c7_204] : memref<16xf32, #tpu.memory_space<smem>>
    %cst_205 = arith.constant 9.99999974E-6 : f32
    %525 = vector.broadcast %cst_205 : f32 to vector<8x1xf32>
    %526 = arith.addf %523, %525 : vector<8x1xf32>
    %527 = math.rsqrt %526 : vector<8x1xf32>
    %528 = vector.broadcast %524 : f32 to vector<8x1xf32>
    %529 = arith.mulf %528, %527 : vector<8x1xf32>
    %530 = vector.broadcast %529 : vector<8x1xf32> to vector<8x256xf32>
    %531 = arith.mulf %530, %512 : vector<8x256xf32>
    %532 = arith.addf %472, %531 : vector<8x256xf32>
    %533 = arith.mulf %529, %519 : vector<8x1xf32>
    %534 = arith.addf %474, %533 : vector<8x1xf32>
    %c8_206 = arith.constant 8 : index
    %535 = memref.load %arg3[%c8_206] : memref<16xf32, #tpu.memory_space<smem>>
    %536 = vector.broadcast %535 : f32 to vector<8x256xf32>
    %c8_207 = arith.constant 8 : index
    %c0_208 = arith.constant 0 : index
    %537 = memref.load %arg2[%c8_207, %c0_208] : memref<16x9xf32, #tpu.memory_space<smem>>
    %538 = vector.broadcast %537 : f32 to vector<8x256xf32>
    %539 = arith.mulf %538, %26 : vector<8x256xf32>
    %540 = arith.addf %536, %539 : vector<8x256xf32>
    %c8_209 = arith.constant 8 : index
    %c1_210 = arith.constant 1 : index
    %541 = memref.load %arg2[%c8_209, %c1_210] : memref<16x9xf32, #tpu.memory_space<smem>>
    %542 = vector.broadcast %541 : f32 to vector<8x256xf32>
    %543 = arith.mulf %542, %28 : vector<8x256xf32>
    %544 = arith.addf %540, %543 : vector<8x256xf32>
    %c8_211 = arith.constant 8 : index
    %c2_212 = arith.constant 2 : index
    %545 = memref.load %arg2[%c8_211, %c2_212] : memref<16x9xf32, #tpu.memory_space<smem>>
    %546 = vector.broadcast %545 : f32 to vector<8x256xf32>
    %547 = arith.mulf %546, %32 : vector<8x256xf32>
    %548 = arith.addf %544, %547 : vector<8x256xf32>
    %c8_213 = arith.constant 8 : index
    %c3_214 = arith.constant 3 : index
    %549 = memref.load %arg2[%c8_213, %c3_214] : memref<16x9xf32, #tpu.memory_space<smem>>
    %550 = vector.broadcast %549 : f32 to vector<8x256xf32>
    %551 = arith.mulf %550, %36 : vector<8x256xf32>
    %552 = arith.addf %548, %551 : vector<8x256xf32>
    %c8_215 = arith.constant 8 : index
    %c4_216 = arith.constant 4 : index
    %553 = memref.load %arg2[%c8_215, %c4_216] : memref<16x9xf32, #tpu.memory_space<smem>>
    %554 = vector.broadcast %553 : f32 to vector<8x256xf32>
    %555 = arith.mulf %554, %38 : vector<8x256xf32>
    %556 = arith.addf %552, %555 : vector<8x256xf32>
    %c8_217 = arith.constant 8 : index
    %c5_218 = arith.constant 5 : index
    %557 = memref.load %arg2[%c8_217, %c5_218] : memref<16x9xf32, #tpu.memory_space<smem>>
    %558 = vector.broadcast %557 : f32 to vector<8x256xf32>
    %559 = arith.mulf %558, %42 : vector<8x256xf32>
    %560 = arith.addf %556, %559 : vector<8x256xf32>
    %c8_219 = arith.constant 8 : index
    %c6_220 = arith.constant 6 : index
    %561 = memref.load %arg2[%c8_219, %c6_220] : memref<16x9xf32, #tpu.memory_space<smem>>
    %562 = vector.broadcast %561 : f32 to vector<8x256xf32>
    %563 = arith.mulf %562, %46 : vector<8x256xf32>
    %564 = arith.addf %560, %563 : vector<8x256xf32>
    %c8_221 = arith.constant 8 : index
    %c7_222 = arith.constant 7 : index
    %565 = memref.load %arg2[%c8_221, %c7_222] : memref<16x9xf32, #tpu.memory_space<smem>>
    %566 = vector.broadcast %565 : f32 to vector<8x256xf32>
    %567 = arith.mulf %566, %48 : vector<8x256xf32>
    %568 = arith.addf %564, %567 : vector<8x256xf32>
    %c8_223 = arith.constant 8 : index
    %c8_224 = arith.constant 8 : index
    %569 = memref.load %arg2[%c8_223, %c8_224] : memref<16x9xf32, #tpu.memory_space<smem>>
    %570 = vector.broadcast %569 : f32 to vector<8x256xf32>
    %571 = arith.mulf %570, %52 : vector<8x256xf32>
    %572 = arith.addf %568, %571 : vector<8x256xf32>
    %cst_225 = arith.constant dense<0.000000e+00> : vector<8xf32>
    %573 = vector.multi_reduction <add>, %572, %cst_225 [1] : vector<8x256xf32> to vector<8xf32>
    %574 = vector.shape_cast %573 : vector<8xf32> to vector<8x1xf32>
    %575 = arith.mulf %572, %572 : vector<8x256xf32>
    %cst_226 = arith.constant dense<0.000000e+00> : vector<8xf32>
    %576 = vector.multi_reduction <add>, %575, %cst_226 [1] : vector<8x256xf32> to vector<8xf32>
    %577 = vector.shape_cast %576 : vector<8xf32> to vector<8x1xf32>
    %cst_227 = arith.constant 3.906250e-03 : f32
    %578 = vector.broadcast %cst_227 : f32 to vector<8x1xf32>
    %579 = arith.mulf %574, %578 : vector<8x1xf32>
    %cst_228 = arith.constant 3.906250e-03 : f32
    %580 = vector.broadcast %cst_228 : f32 to vector<8x1xf32>
    %581 = arith.mulf %577, %580 : vector<8x1xf32>
    %582 = arith.mulf %579, %579 : vector<8x1xf32>
    %583 = arith.subf %581, %582 : vector<8x1xf32>
    %c8_229 = arith.constant 8 : index
    %584 = memref.load %arg4[%c8_229] : memref<16xf32, #tpu.memory_space<smem>>
    %cst_230 = arith.constant 9.99999974E-6 : f32
    %585 = vector.broadcast %cst_230 : f32 to vector<8x1xf32>
    %586 = arith.addf %583, %585 : vector<8x1xf32>
    %587 = math.rsqrt %586 : vector<8x1xf32>
    %588 = vector.broadcast %584 : f32 to vector<8x1xf32>
    %589 = arith.mulf %588, %587 : vector<8x1xf32>
    %590 = vector.broadcast %589 : vector<8x1xf32> to vector<8x256xf32>
    %591 = arith.mulf %590, %572 : vector<8x256xf32>
    %592 = arith.addf %532, %591 : vector<8x256xf32>
    %593 = arith.mulf %589, %579 : vector<8x1xf32>
    %594 = arith.addf %534, %593 : vector<8x1xf32>
    %c9 = arith.constant 9 : index
    %595 = memref.load %arg3[%c9] : memref<16xf32, #tpu.memory_space<smem>>
    %596 = vector.broadcast %595 : f32 to vector<8x256xf32>
    %c9_231 = arith.constant 9 : index
    %c0_232 = arith.constant 0 : index
    %597 = memref.load %arg2[%c9_231, %c0_232] : memref<16x9xf32, #tpu.memory_space<smem>>
    %598 = vector.broadcast %597 : f32 to vector<8x256xf32>
    %599 = arith.mulf %598, %26 : vector<8x256xf32>
    %600 = arith.addf %596, %599 : vector<8x256xf32>
    %c9_233 = arith.constant 9 : index
    %c1_234 = arith.constant 1 : index
    %601 = memref.load %arg2[%c9_233, %c1_234] : memref<16x9xf32, #tpu.memory_space<smem>>
    %602 = vector.broadcast %601 : f32 to vector<8x256xf32>
    %603 = arith.mulf %602, %28 : vector<8x256xf32>
    %604 = arith.addf %600, %603 : vector<8x256xf32>
    %c9_235 = arith.constant 9 : index
    %c2_236 = arith.constant 2 : index
    %605 = memref.load %arg2[%c9_235, %c2_236] : memref<16x9xf32, #tpu.memory_space<smem>>
    %606 = vector.broadcast %605 : f32 to vector<8x256xf32>
    %607 = arith.mulf %606, %32 : vector<8x256xf32>
    %608 = arith.addf %604, %607 : vector<8x256xf32>
    %c9_237 = arith.constant 9 : index
    %c3_238 = arith.constant 3 : index
    %609 = memref.load %arg2[%c9_237, %c3_238] : memref<16x9xf32, #tpu.memory_space<smem>>
    %610 = vector.broadcast %609 : f32 to vector<8x256xf32>
    %611 = arith.mulf %610, %36 : vector<8x256xf32>
    %612 = arith.addf %608, %611 : vector<8x256xf32>
    %c9_239 = arith.constant 9 : index
    %c4_240 = arith.constant 4 : index
    %613 = memref.load %arg2[%c9_239, %c4_240] : memref<16x9xf32, #tpu.memory_space<smem>>
    %614 = vector.broadcast %613 : f32 to vector<8x256xf32>
    %615 = arith.mulf %614, %38 : vector<8x256xf32>
    %616 = arith.addf %612, %615 : vector<8x256xf32>
    %c9_241 = arith.constant 9 : index
    %c5_242 = arith.constant 5 : index
    %617 = memref.load %arg2[%c9_241, %c5_242] : memref<16x9xf32, #tpu.memory_space<smem>>
    %618 = vector.broadcast %617 : f32 to vector<8x256xf32>
    %619 = arith.mulf %618, %42 : vector<8x256xf32>
    %620 = arith.addf %616, %619 : vector<8x256xf32>
    %c9_243 = arith.constant 9 : index
    %c6_244 = arith.constant 6 : index
    %621 = memref.load %arg2[%c9_243, %c6_244] : memref<16x9xf32, #tpu.memory_space<smem>>
    %622 = vector.broadcast %621 : f32 to vector<8x256xf32>
    %623 = arith.mulf %622, %46 : vector<8x256xf32>
    %624 = arith.addf %620, %623 : vector<8x256xf32>
    %c9_245 = arith.constant 9 : index
    %c7_246 = arith.constant 7 : index
    %625 = memref.load %arg2[%c9_245, %c7_246] : memref<16x9xf32, #tpu.memory_space<smem>>
    %626 = vector.broadcast %625 : f32 to vector<8x256xf32>
    %627 = arith.mulf %626, %48 : vector<8x256xf32>
    %628 = arith.addf %624, %627 : vector<8x256xf32>
    %c9_247 = arith.constant 9 : index
    %c8_248 = arith.constant 8 : index
    %629 = memref.load %arg2[%c9_247, %c8_248] : memref<16x9xf32, #tpu.memory_space<smem>>
    %630 = vector.broadcast %629 : f32 to vector<8x256xf32>
    %631 = arith.mulf %630, %52 : vector<8x256xf32>
    %632 = arith.addf %628, %631 : vector<8x256xf32>
    %cst_249 = arith.constant dense<0.000000e+00> : vector<8xf32>
    %633 = vector.multi_reduction <add>, %632, %cst_249 [1] : vector<8x256xf32> to vector<8xf32>
    %634 = vector.shape_cast %633 : vector<8xf32> to vector<8x1xf32>
    %635 = arith.mulf %632, %632 : vector<8x256xf32>
    %cst_250 = arith.constant dense<0.000000e+00> : vector<8xf32>
    %636 = vector.multi_reduction <add>, %635, %cst_250 [1] : vector<8x256xf32> to vector<8xf32>
    %637 = vector.shape_cast %636 : vector<8xf32> to vector<8x1xf32>
    %cst_251 = arith.constant 3.906250e-03 : f32
    %638 = vector.broadcast %cst_251 : f32 to vector<8x1xf32>
    %639 = arith.mulf %634, %638 : vector<8x1xf32>
    %cst_252 = arith.constant 3.906250e-03 : f32
    %640 = vector.broadcast %cst_252 : f32 to vector<8x1xf32>
    %641 = arith.mulf %637, %640 : vector<8x1xf32>
    %642 = arith.mulf %639, %639 : vector<8x1xf32>
    %643 = arith.subf %641, %642 : vector<8x1xf32>
    %c9_253 = arith.constant 9 : index
    %644 = memref.load %arg4[%c9_253] : memref<16xf32, #tpu.memory_space<smem>>
    %cst_254 = arith.constant 9.99999974E-6 : f32
    %645 = vector.broadcast %cst_254 : f32 to vector<8x1xf32>
    %646 = arith.addf %643, %645 : vector<8x1xf32>
    %647 = math.rsqrt %646 : vector<8x1xf32>
    %648 = vector.broadcast %644 : f32 to vector<8x1xf32>
    %649 = arith.mulf %648, %647 : vector<8x1xf32>
    %650 = vector.broadcast %649 : vector<8x1xf32> to vector<8x256xf32>
    %651 = arith.mulf %650, %632 : vector<8x256xf32>
    %652 = arith.addf %592, %651 : vector<8x256xf32>
    %653 = arith.mulf %649, %639 : vector<8x1xf32>
    %654 = arith.addf %594, %653 : vector<8x1xf32>
    %c10 = arith.constant 10 : index
    %655 = memref.load %arg3[%c10] : memref<16xf32, #tpu.memory_space<smem>>
    %656 = vector.broadcast %655 : f32 to vector<8x256xf32>
    %c10_255 = arith.constant 10 : index
    %c0_256 = arith.constant 0 : index
    %657 = memref.load %arg2[%c10_255, %c0_256] : memref<16x9xf32, #tpu.memory_space<smem>>
    %658 = vector.broadcast %657 : f32 to vector<8x256xf32>
    %659 = arith.mulf %658, %26 : vector<8x256xf32>
    %660 = arith.addf %656, %659 : vector<8x256xf32>
    %c10_257 = arith.constant 10 : index
    %c1_258 = arith.constant 1 : index
    %661 = memref.load %arg2[%c10_257, %c1_258] : memref<16x9xf32, #tpu.memory_space<smem>>
    %662 = vector.broadcast %661 : f32 to vector<8x256xf32>
    %663 = arith.mulf %662, %28 : vector<8x256xf32>
    %664 = arith.addf %660, %663 : vector<8x256xf32>
    %c10_259 = arith.constant 10 : index
    %c2_260 = arith.constant 2 : index
    %665 = memref.load %arg2[%c10_259, %c2_260] : memref<16x9xf32, #tpu.memory_space<smem>>
    %666 = vector.broadcast %665 : f32 to vector<8x256xf32>
    %667 = arith.mulf %666, %32 : vector<8x256xf32>
    %668 = arith.addf %664, %667 : vector<8x256xf32>
    %c10_261 = arith.constant 10 : index
    %c3_262 = arith.constant 3 : index
    %669 = memref.load %arg2[%c10_261, %c3_262] : memref<16x9xf32, #tpu.memory_space<smem>>
    %670 = vector.broadcast %669 : f32 to vector<8x256xf32>
    %671 = arith.mulf %670, %36 : vector<8x256xf32>
    %672 = arith.addf %668, %671 : vector<8x256xf32>
    %c10_263 = arith.constant 10 : index
    %c4_264 = arith.constant 4 : index
    %673 = memref.load %arg2[%c10_263, %c4_264] : memref<16x9xf32, #tpu.memory_space<smem>>
    %674 = vector.broadcast %673 : f32 to vector<8x256xf32>
    %675 = arith.mulf %674, %38 : vector<8x256xf32>
    %676 = arith.addf %672, %675 : vector<8x256xf32>
    %c10_265 = arith.constant 10 : index
    %c5_266 = arith.constant 5 : index
    %677 = memref.load %arg2[%c10_265, %c5_266] : memref<16x9xf32, #tpu.memory_space<smem>>
    %678 = vector.broadcast %677 : f32 to vector<8x256xf32>
    %679 = arith.mulf %678, %42 : vector<8x256xf32>
    %680 = arith.addf %676, %679 : vector<8x256xf32>
    %c10_267 = arith.constant 10 : index
    %c6_268 = arith.constant 6 : index
    %681 = memref.load %arg2[%c10_267, %c6_268] : memref<16x9xf32, #tpu.memory_space<smem>>
    %682 = vector.broadcast %681 : f32 to vector<8x256xf32>
    %683 = arith.mulf %682, %46 : vector<8x256xf32>
    %684 = arith.addf %680, %683 : vector<8x256xf32>
    %c10_269 = arith.constant 10 : index
    %c7_270 = arith.constant 7 : index
    %685 = memref.load %arg2[%c10_269, %c7_270] : memref<16x9xf32, #tpu.memory_space<smem>>
    %686 = vector.broadcast %685 : f32 to vector<8x256xf32>
    %687 = arith.mulf %686, %48 : vector<8x256xf32>
    %688 = arith.addf %684, %687 : vector<8x256xf32>
    %c10_271 = arith.constant 10 : index
    %c8_272 = arith.constant 8 : index
    %689 = memref.load %arg2[%c10_271, %c8_272] : memref<16x9xf32, #tpu.memory_space<smem>>
    %690 = vector.broadcast %689 : f32 to vector<8x256xf32>
    %691 = arith.mulf %690, %52 : vector<8x256xf32>
    %692 = arith.addf %688, %691 : vector<8x256xf32>
    %cst_273 = arith.constant dense<0.000000e+00> : vector<8xf32>
    %693 = vector.multi_reduction <add>, %692, %cst_273 [1] : vector<8x256xf32> to vector<8xf32>
    %694 = vector.shape_cast %693 : vector<8xf32> to vector<8x1xf32>
    %695 = arith.mulf %692, %692 : vector<8x256xf32>
    %cst_274 = arith.constant dense<0.000000e+00> : vector<8xf32>
    %696 = vector.multi_reduction <add>, %695, %cst_274 [1] : vector<8x256xf32> to vector<8xf32>
    %697 = vector.shape_cast %696 : vector<8xf32> to vector<8x1xf32>
    %cst_275 = arith.constant 3.906250e-03 : f32
    %698 = vector.broadcast %cst_275 : f32 to vector<8x1xf32>
    %699 = arith.mulf %694, %698 : vector<8x1xf32>
    %cst_276 = arith.constant 3.906250e-03 : f32
    %700 = vector.broadcast %cst_276 : f32 to vector<8x1xf32>
    %701 = arith.mulf %697, %700 : vector<8x1xf32>
    %702 = arith.mulf %699, %699 : vector<8x1xf32>
    %703 = arith.subf %701, %702 : vector<8x1xf32>
    %c10_277 = arith.constant 10 : index
    %704 = memref.load %arg4[%c10_277] : memref<16xf32, #tpu.memory_space<smem>>
    %cst_278 = arith.constant 9.99999974E-6 : f32
    %705 = vector.broadcast %cst_278 : f32 to vector<8x1xf32>
    %706 = arith.addf %703, %705 : vector<8x1xf32>
    %707 = math.rsqrt %706 : vector<8x1xf32>
    %708 = vector.broadcast %704 : f32 to vector<8x1xf32>
    %709 = arith.mulf %708, %707 : vector<8x1xf32>
    %710 = vector.broadcast %709 : vector<8x1xf32> to vector<8x256xf32>
    %711 = arith.mulf %710, %692 : vector<8x256xf32>
    %712 = arith.addf %652, %711 : vector<8x256xf32>
    %713 = arith.mulf %709, %699 : vector<8x1xf32>
    %714 = arith.addf %654, %713 : vector<8x1xf32>
    %c11 = arith.constant 11 : index
    %715 = memref.load %arg3[%c11] : memref<16xf32, #tpu.memory_space<smem>>
    %716 = vector.broadcast %715 : f32 to vector<8x256xf32>
    %c11_279 = arith.constant 11 : index
    %c0_280 = arith.constant 0 : index
    %717 = memref.load %arg2[%c11_279, %c0_280] : memref<16x9xf32, #tpu.memory_space<smem>>
    %718 = vector.broadcast %717 : f32 to vector<8x256xf32>
    %719 = arith.mulf %718, %26 : vector<8x256xf32>
    %720 = arith.addf %716, %719 : vector<8x256xf32>
    %c11_281 = arith.constant 11 : index
    %c1_282 = arith.constant 1 : index
    %721 = memref.load %arg2[%c11_281, %c1_282] : memref<16x9xf32, #tpu.memory_space<smem>>
    %722 = vector.broadcast %721 : f32 to vector<8x256xf32>
    %723 = arith.mulf %722, %28 : vector<8x256xf32>
    %724 = arith.addf %720, %723 : vector<8x256xf32>
    %c11_283 = arith.constant 11 : index
    %c2_284 = arith.constant 2 : index
    %725 = memref.load %arg2[%c11_283, %c2_284] : memref<16x9xf32, #tpu.memory_space<smem>>
    %726 = vector.broadcast %725 : f32 to vector<8x256xf32>
    %727 = arith.mulf %726, %32 : vector<8x256xf32>
    %728 = arith.addf %724, %727 : vector<8x256xf32>
    %c11_285 = arith.constant 11 : index
    %c3_286 = arith.constant 3 : index
    %729 = memref.load %arg2[%c11_285, %c3_286] : memref<16x9xf32, #tpu.memory_space<smem>>
    %730 = vector.broadcast %729 : f32 to vector<8x256xf32>
    %731 = arith.mulf %730, %36 : vector<8x256xf32>
    %732 = arith.addf %728, %731 : vector<8x256xf32>
    %c11_287 = arith.constant 11 : index
    %c4_288 = arith.constant 4 : index
    %733 = memref.load %arg2[%c11_287, %c4_288] : memref<16x9xf32, #tpu.memory_space<smem>>
    %734 = vector.broadcast %733 : f32 to vector<8x256xf32>
    %735 = arith.mulf %734, %38 : vector<8x256xf32>
    %736 = arith.addf %732, %735 : vector<8x256xf32>
    %c11_289 = arith.constant 11 : index
    %c5_290 = arith.constant 5 : index
    %737 = memref.load %arg2[%c11_289, %c5_290] : memref<16x9xf32, #tpu.memory_space<smem>>
    %738 = vector.broadcast %737 : f32 to vector<8x256xf32>
    %739 = arith.mulf %738, %42 : vector<8x256xf32>
    %740 = arith.addf %736, %739 : vector<8x256xf32>
    %c11_291 = arith.constant 11 : index
    %c6_292 = arith.constant 6 : index
    %741 = memref.load %arg2[%c11_291, %c6_292] : memref<16x9xf32, #tpu.memory_space<smem>>
    %742 = vector.broadcast %741 : f32 to vector<8x256xf32>
    %743 = arith.mulf %742, %46 : vector<8x256xf32>
    %744 = arith.addf %740, %743 : vector<8x256xf32>
    %c11_293 = arith.constant 11 : index
    %c7_294 = arith.constant 7 : index
    %745 = memref.load %arg2[%c11_293, %c7_294] : memref<16x9xf32, #tpu.memory_space<smem>>
    %746 = vector.broadcast %745 : f32 to vector<8x256xf32>
    %747 = arith.mulf %746, %48 : vector<8x256xf32>
    %748 = arith.addf %744, %747 : vector<8x256xf32>
    %c11_295 = arith.constant 11 : index
    %c8_296 = arith.constant 8 : index
    %749 = memref.load %arg2[%c11_295, %c8_296] : memref<16x9xf32, #tpu.memory_space<smem>>
    %750 = vector.broadcast %749 : f32 to vector<8x256xf32>
    %751 = arith.mulf %750, %52 : vector<8x256xf32>
    %752 = arith.addf %748, %751 : vector<8x256xf32>
    %cst_297 = arith.constant dense<0.000000e+00> : vector<8xf32>
    %753 = vector.multi_reduction <add>, %752, %cst_297 [1] : vector<8x256xf32> to vector<8xf32>
    %754 = vector.shape_cast %753 : vector<8xf32> to vector<8x1xf32>
    %755 = arith.mulf %752, %752 : vector<8x256xf32>
    %cst_298 = arith.constant dense<0.000000e+00> : vector<8xf32>
    %756 = vector.multi_reduction <add>, %755, %cst_298 [1] : vector<8x256xf32> to vector<8xf32>
    %757 = vector.shape_cast %756 : vector<8xf32> to vector<8x1xf32>
    %cst_299 = arith.constant 3.906250e-03 : f32
    %758 = vector.broadcast %cst_299 : f32 to vector<8x1xf32>
    %759 = arith.mulf %754, %758 : vector<8x1xf32>
    %cst_300 = arith.constant 3.906250e-03 : f32
    %760 = vector.broadcast %cst_300 : f32 to vector<8x1xf32>
    %761 = arith.mulf %757, %760 : vector<8x1xf32>
    %762 = arith.mulf %759, %759 : vector<8x1xf32>
    %763 = arith.subf %761, %762 : vector<8x1xf32>
    %c11_301 = arith.constant 11 : index
    %764 = memref.load %arg4[%c11_301] : memref<16xf32, #tpu.memory_space<smem>>
    %cst_302 = arith.constant 9.99999974E-6 : f32
    %765 = vector.broadcast %cst_302 : f32 to vector<8x1xf32>
    %766 = arith.addf %763, %765 : vector<8x1xf32>
    %767 = math.rsqrt %766 : vector<8x1xf32>
    %768 = vector.broadcast %764 : f32 to vector<8x1xf32>
    %769 = arith.mulf %768, %767 : vector<8x1xf32>
    %770 = vector.broadcast %769 : vector<8x1xf32> to vector<8x256xf32>
    %771 = arith.mulf %770, %752 : vector<8x256xf32>
    %772 = arith.addf %712, %771 : vector<8x256xf32>
    %773 = arith.mulf %769, %759 : vector<8x1xf32>
    %774 = arith.addf %714, %773 : vector<8x1xf32>
    %c12 = arith.constant 12 : index
    %775 = memref.load %arg3[%c12] : memref<16xf32, #tpu.memory_space<smem>>
    %776 = vector.broadcast %775 : f32 to vector<8x256xf32>
    %c12_303 = arith.constant 12 : index
    %c0_304 = arith.constant 0 : index
    %777 = memref.load %arg2[%c12_303, %c0_304] : memref<16x9xf32, #tpu.memory_space<smem>>
    %778 = vector.broadcast %777 : f32 to vector<8x256xf32>
    %779 = arith.mulf %778, %26 : vector<8x256xf32>
    %780 = arith.addf %776, %779 : vector<8x256xf32>
    %c12_305 = arith.constant 12 : index
    %c1_306 = arith.constant 1 : index
    %781 = memref.load %arg2[%c12_305, %c1_306] : memref<16x9xf32, #tpu.memory_space<smem>>
    %782 = vector.broadcast %781 : f32 to vector<8x256xf32>
    %783 = arith.mulf %782, %28 : vector<8x256xf32>
    %784 = arith.addf %780, %783 : vector<8x256xf32>
    %c12_307 = arith.constant 12 : index
    %c2_308 = arith.constant 2 : index
    %785 = memref.load %arg2[%c12_307, %c2_308] : memref<16x9xf32, #tpu.memory_space<smem>>
    %786 = vector.broadcast %785 : f32 to vector<8x256xf32>
    %787 = arith.mulf %786, %32 : vector<8x256xf32>
    %788 = arith.addf %784, %787 : vector<8x256xf32>
    %c12_309 = arith.constant 12 : index
    %c3_310 = arith.constant 3 : index
    %789 = memref.load %arg2[%c12_309, %c3_310] : memref<16x9xf32, #tpu.memory_space<smem>>
    %790 = vector.broadcast %789 : f32 to vector<8x256xf32>
    %791 = arith.mulf %790, %36 : vector<8x256xf32>
    %792 = arith.addf %788, %791 : vector<8x256xf32>
    %c12_311 = arith.constant 12 : index
    %c4_312 = arith.constant 4 : index
    %793 = memref.load %arg2[%c12_311, %c4_312] : memref<16x9xf32, #tpu.memory_space<smem>>
    %794 = vector.broadcast %793 : f32 to vector<8x256xf32>
    %795 = arith.mulf %794, %38 : vector<8x256xf32>
    %796 = arith.addf %792, %795 : vector<8x256xf32>
    %c12_313 = arith.constant 12 : index
    %c5_314 = arith.constant 5 : index
    %797 = memref.load %arg2[%c12_313, %c5_314] : memref<16x9xf32, #tpu.memory_space<smem>>
    %798 = vector.broadcast %797 : f32 to vector<8x256xf32>
    %799 = arith.mulf %798, %42 : vector<8x256xf32>
    %800 = arith.addf %796, %799 : vector<8x256xf32>
    %c12_315 = arith.constant 12 : index
    %c6_316 = arith.constant 6 : index
    %801 = memref.load %arg2[%c12_315, %c6_316] : memref<16x9xf32, #tpu.memory_space<smem>>
    %802 = vector.broadcast %801 : f32 to vector<8x256xf32>
    %803 = arith.mulf %802, %46 : vector<8x256xf32>
    %804 = arith.addf %800, %803 : vector<8x256xf32>
    %c12_317 = arith.constant 12 : index
    %c7_318 = arith.constant 7 : index
    %805 = memref.load %arg2[%c12_317, %c7_318] : memref<16x9xf32, #tpu.memory_space<smem>>
    %806 = vector.broadcast %805 : f32 to vector<8x256xf32>
    %807 = arith.mulf %806, %48 : vector<8x256xf32>
    %808 = arith.addf %804, %807 : vector<8x256xf32>
    %c12_319 = arith.constant 12 : index
    %c8_320 = arith.constant 8 : index
    %809 = memref.load %arg2[%c12_319, %c8_320] : memref<16x9xf32, #tpu.memory_space<smem>>
    %810 = vector.broadcast %809 : f32 to vector<8x256xf32>
    %811 = arith.mulf %810, %52 : vector<8x256xf32>
    %812 = arith.addf %808, %811 : vector<8x256xf32>
    %cst_321 = arith.constant dense<0.000000e+00> : vector<8xf32>
    %813 = vector.multi_reduction <add>, %812, %cst_321 [1] : vector<8x256xf32> to vector<8xf32>
    %814 = vector.shape_cast %813 : vector<8xf32> to vector<8x1xf32>
    %815 = arith.mulf %812, %812 : vector<8x256xf32>
    %cst_322 = arith.constant dense<0.000000e+00> : vector<8xf32>
    %816 = vector.multi_reduction <add>, %815, %cst_322 [1] : vector<8x256xf32> to vector<8xf32>
    %817 = vector.shape_cast %816 : vector<8xf32> to vector<8x1xf32>
    %cst_323 = arith.constant 3.906250e-03 : f32
    %818 = vector.broadcast %cst_323 : f32 to vector<8x1xf32>
    %819 = arith.mulf %814, %818 : vector<8x1xf32>
    %cst_324 = arith.constant 3.906250e-03 : f32
    %820 = vector.broadcast %cst_324 : f32 to vector<8x1xf32>
    %821 = arith.mulf %817, %820 : vector<8x1xf32>
    %822 = arith.mulf %819, %819 : vector<8x1xf32>
    %823 = arith.subf %821, %822 : vector<8x1xf32>
    %c12_325 = arith.constant 12 : index
    %824 = memref.load %arg4[%c12_325] : memref<16xf32, #tpu.memory_space<smem>>
    %cst_326 = arith.constant 9.99999974E-6 : f32
    %825 = vector.broadcast %cst_326 : f32 to vector<8x1xf32>
    %826 = arith.addf %823, %825 : vector<8x1xf32>
    %827 = math.rsqrt %826 : vector<8x1xf32>
    %828 = vector.broadcast %824 : f32 to vector<8x1xf32>
    %829 = arith.mulf %828, %827 : vector<8x1xf32>
    %830 = vector.broadcast %829 : vector<8x1xf32> to vector<8x256xf32>
    %831 = arith.mulf %830, %812 : vector<8x256xf32>
    %832 = arith.addf %772, %831 : vector<8x256xf32>
    %833 = arith.mulf %829, %819 : vector<8x1xf32>
    %834 = arith.addf %774, %833 : vector<8x1xf32>
    %c13 = arith.constant 13 : index
    %835 = memref.load %arg3[%c13] : memref<16xf32, #tpu.memory_space<smem>>
    %836 = vector.broadcast %835 : f32 to vector<8x256xf32>
    %c13_327 = arith.constant 13 : index
    %c0_328 = arith.constant 0 : index
    %837 = memref.load %arg2[%c13_327, %c0_328] : memref<16x9xf32, #tpu.memory_space<smem>>
    %838 = vector.broadcast %837 : f32 to vector<8x256xf32>
    %839 = arith.mulf %838, %26 : vector<8x256xf32>
    %840 = arith.addf %836, %839 : vector<8x256xf32>
    %c13_329 = arith.constant 13 : index
    %c1_330 = arith.constant 1 : index
    %841 = memref.load %arg2[%c13_329, %c1_330] : memref<16x9xf32, #tpu.memory_space<smem>>
    %842 = vector.broadcast %841 : f32 to vector<8x256xf32>
    %843 = arith.mulf %842, %28 : vector<8x256xf32>
    %844 = arith.addf %840, %843 : vector<8x256xf32>
    %c13_331 = arith.constant 13 : index
    %c2_332 = arith.constant 2 : index
    %845 = memref.load %arg2[%c13_331, %c2_332] : memref<16x9xf32, #tpu.memory_space<smem>>
    %846 = vector.broadcast %845 : f32 to vector<8x256xf32>
    %847 = arith.mulf %846, %32 : vector<8x256xf32>
    %848 = arith.addf %844, %847 : vector<8x256xf32>
    %c13_333 = arith.constant 13 : index
    %c3_334 = arith.constant 3 : index
    %849 = memref.load %arg2[%c13_333, %c3_334] : memref<16x9xf32, #tpu.memory_space<smem>>
    %850 = vector.broadcast %849 : f32 to vector<8x256xf32>
    %851 = arith.mulf %850, %36 : vector<8x256xf32>
    %852 = arith.addf %848, %851 : vector<8x256xf32>
    %c13_335 = arith.constant 13 : index
    %c4_336 = arith.constant 4 : index
    %853 = memref.load %arg2[%c13_335, %c4_336] : memref<16x9xf32, #tpu.memory_space<smem>>
    %854 = vector.broadcast %853 : f32 to vector<8x256xf32>
    %855 = arith.mulf %854, %38 : vector<8x256xf32>
    %856 = arith.addf %852, %855 : vector<8x256xf32>
    %c13_337 = arith.constant 13 : index
    %c5_338 = arith.constant 5 : index
    %857 = memref.load %arg2[%c13_337, %c5_338] : memref<16x9xf32, #tpu.memory_space<smem>>
    %858 = vector.broadcast %857 : f32 to vector<8x256xf32>
    %859 = arith.mulf %858, %42 : vector<8x256xf32>
    %860 = arith.addf %856, %859 : vector<8x256xf32>
    %c13_339 = arith.constant 13 : index
    %c6_340 = arith.constant 6 : index
    %861 = memref.load %arg2[%c13_339, %c6_340] : memref<16x9xf32, #tpu.memory_space<smem>>
    %862 = vector.broadcast %861 : f32 to vector<8x256xf32>
    %863 = arith.mulf %862, %46 : vector<8x256xf32>
    %864 = arith.addf %860, %863 : vector<8x256xf32>
    %c13_341 = arith.constant 13 : index
    %c7_342 = arith.constant 7 : index
    %865 = memref.load %arg2[%c13_341, %c7_342] : memref<16x9xf32, #tpu.memory_space<smem>>
    %866 = vector.broadcast %865 : f32 to vector<8x256xf32>
    %867 = arith.mulf %866, %48 : vector<8x256xf32>
    %868 = arith.addf %864, %867 : vector<8x256xf32>
    %c13_343 = arith.constant 13 : index
    %c8_344 = arith.constant 8 : index
    %869 = memref.load %arg2[%c13_343, %c8_344] : memref<16x9xf32, #tpu.memory_space<smem>>
    %870 = vector.broadcast %869 : f32 to vector<8x256xf32>
    %871 = arith.mulf %870, %52 : vector<8x256xf32>
    %872 = arith.addf %868, %871 : vector<8x256xf32>
    %cst_345 = arith.constant dense<0.000000e+00> : vector<8xf32>
    %873 = vector.multi_reduction <add>, %872, %cst_345 [1] : vector<8x256xf32> to vector<8xf32>
    %874 = vector.shape_cast %873 : vector<8xf32> to vector<8x1xf32>
    %875 = arith.mulf %872, %872 : vector<8x256xf32>
    %cst_346 = arith.constant dense<0.000000e+00> : vector<8xf32>
    %876 = vector.multi_reduction <add>, %875, %cst_346 [1] : vector<8x256xf32> to vector<8xf32>
    %877 = vector.shape_cast %876 : vector<8xf32> to vector<8x1xf32>
    %cst_347 = arith.constant 3.906250e-03 : f32
    %878 = vector.broadcast %cst_347 : f32 to vector<8x1xf32>
    %879 = arith.mulf %874, %878 : vector<8x1xf32>
    %cst_348 = arith.constant 3.906250e-03 : f32
    %880 = vector.broadcast %cst_348 : f32 to vector<8x1xf32>
    %881 = arith.mulf %877, %880 : vector<8x1xf32>
    %882 = arith.mulf %879, %879 : vector<8x1xf32>
    %883 = arith.subf %881, %882 : vector<8x1xf32>
    %c13_349 = arith.constant 13 : index
    %884 = memref.load %arg4[%c13_349] : memref<16xf32, #tpu.memory_space<smem>>
    %cst_350 = arith.constant 9.99999974E-6 : f32
    %885 = vector.broadcast %cst_350 : f32 to vector<8x1xf32>
    %886 = arith.addf %883, %885 : vector<8x1xf32>
    %887 = math.rsqrt %886 : vector<8x1xf32>
    %888 = vector.broadcast %884 : f32 to vector<8x1xf32>
    %889 = arith.mulf %888, %887 : vector<8x1xf32>
    %890 = vector.broadcast %889 : vector<8x1xf32> to vector<8x256xf32>
    %891 = arith.mulf %890, %872 : vector<8x256xf32>
    %892 = arith.addf %832, %891 : vector<8x256xf32>
    %893 = arith.mulf %889, %879 : vector<8x1xf32>
    %894 = arith.addf %834, %893 : vector<8x1xf32>
    %c14 = arith.constant 14 : index
    %895 = memref.load %arg3[%c14] : memref<16xf32, #tpu.memory_space<smem>>
    %896 = vector.broadcast %895 : f32 to vector<8x256xf32>
    %c14_351 = arith.constant 14 : index
    %c0_352 = arith.constant 0 : index
    %897 = memref.load %arg2[%c14_351, %c0_352] : memref<16x9xf32, #tpu.memory_space<smem>>
    %898 = vector.broadcast %897 : f32 to vector<8x256xf32>
    %899 = arith.mulf %898, %26 : vector<8x256xf32>
    %900 = arith.addf %896, %899 : vector<8x256xf32>
    %c14_353 = arith.constant 14 : index
    %c1_354 = arith.constant 1 : index
    %901 = memref.load %arg2[%c14_353, %c1_354] : memref<16x9xf32, #tpu.memory_space<smem>>
    %902 = vector.broadcast %901 : f32 to vector<8x256xf32>
    %903 = arith.mulf %902, %28 : vector<8x256xf32>
    %904 = arith.addf %900, %903 : vector<8x256xf32>
    %c14_355 = arith.constant 14 : index
    %c2_356 = arith.constant 2 : index
    %905 = memref.load %arg2[%c14_355, %c2_356] : memref<16x9xf32, #tpu.memory_space<smem>>
    %906 = vector.broadcast %905 : f32 to vector<8x256xf32>
    %907 = arith.mulf %906, %32 : vector<8x256xf32>
    %908 = arith.addf %904, %907 : vector<8x256xf32>
    %c14_357 = arith.constant 14 : index
    %c3_358 = arith.constant 3 : index
    %909 = memref.load %arg2[%c14_357, %c3_358] : memref<16x9xf32, #tpu.memory_space<smem>>
    %910 = vector.broadcast %909 : f32 to vector<8x256xf32>
    %911 = arith.mulf %910, %36 : vector<8x256xf32>
    %912 = arith.addf %908, %911 : vector<8x256xf32>
    %c14_359 = arith.constant 14 : index
    %c4_360 = arith.constant 4 : index
    %913 = memref.load %arg2[%c14_359, %c4_360] : memref<16x9xf32, #tpu.memory_space<smem>>
    %914 = vector.broadcast %913 : f32 to vector<8x256xf32>
    %915 = arith.mulf %914, %38 : vector<8x256xf32>
    %916 = arith.addf %912, %915 : vector<8x256xf32>
    %c14_361 = arith.constant 14 : index
    %c5_362 = arith.constant 5 : index
    %917 = memref.load %arg2[%c14_361, %c5_362] : memref<16x9xf32, #tpu.memory_space<smem>>
    %918 = vector.broadcast %917 : f32 to vector<8x256xf32>
    %919 = arith.mulf %918, %42 : vector<8x256xf32>
    %920 = arith.addf %916, %919 : vector<8x256xf32>
    %c14_363 = arith.constant 14 : index
    %c6_364 = arith.constant 6 : index
    %921 = memref.load %arg2[%c14_363, %c6_364] : memref<16x9xf32, #tpu.memory_space<smem>>
    %922 = vector.broadcast %921 : f32 to vector<8x256xf32>
    %923 = arith.mulf %922, %46 : vector<8x256xf32>
    %924 = arith.addf %920, %923 : vector<8x256xf32>
    %c14_365 = arith.constant 14 : index
    %c7_366 = arith.constant 7 : index
    %925 = memref.load %arg2[%c14_365, %c7_366] : memref<16x9xf32, #tpu.memory_space<smem>>
    %926 = vector.broadcast %925 : f32 to vector<8x256xf32>
    %927 = arith.mulf %926, %48 : vector<8x256xf32>
    %928 = arith.addf %924, %927 : vector<8x256xf32>
    %c14_367 = arith.constant 14 : index
    %c8_368 = arith.constant 8 : index
    %929 = memref.load %arg2[%c14_367, %c8_368] : memref<16x9xf32, #tpu.memory_space<smem>>
    %930 = vector.broadcast %929 : f32 to vector<8x256xf32>
    %931 = arith.mulf %930, %52 : vector<8x256xf32>
    %932 = arith.addf %928, %931 : vector<8x256xf32>
    %cst_369 = arith.constant dense<0.000000e+00> : vector<8xf32>
    %933 = vector.multi_reduction <add>, %932, %cst_369 [1] : vector<8x256xf32> to vector<8xf32>
    %934 = vector.shape_cast %933 : vector<8xf32> to vector<8x1xf32>
    %935 = arith.mulf %932, %932 : vector<8x256xf32>
    %cst_370 = arith.constant dense<0.000000e+00> : vector<8xf32>
    %936 = vector.multi_reduction <add>, %935, %cst_370 [1] : vector<8x256xf32> to vector<8xf32>
    %937 = vector.shape_cast %936 : vector<8xf32> to vector<8x1xf32>
    %cst_371 = arith.constant 3.906250e-03 : f32
    %938 = vector.broadcast %cst_371 : f32 to vector<8x1xf32>
    %939 = arith.mulf %934, %938 : vector<8x1xf32>
    %cst_372 = arith.constant 3.906250e-03 : f32
    %940 = vector.broadcast %cst_372 : f32 to vector<8x1xf32>
    %941 = arith.mulf %937, %940 : vector<8x1xf32>
    %942 = arith.mulf %939, %939 : vector<8x1xf32>
    %943 = arith.subf %941, %942 : vector<8x1xf32>
    %c14_373 = arith.constant 14 : index
    %944 = memref.load %arg4[%c14_373] : memref<16xf32, #tpu.memory_space<smem>>
    %cst_374 = arith.constant 9.99999974E-6 : f32
    %945 = vector.broadcast %cst_374 : f32 to vector<8x1xf32>
    %946 = arith.addf %943, %945 : vector<8x1xf32>
    %947 = math.rsqrt %946 : vector<8x1xf32>
    %948 = vector.broadcast %944 : f32 to vector<8x1xf32>
    %949 = arith.mulf %948, %947 : vector<8x1xf32>
    %950 = vector.broadcast %949 : vector<8x1xf32> to vector<8x256xf32>
    %951 = arith.mulf %950, %932 : vector<8x256xf32>
    %952 = arith.addf %892, %951 : vector<8x256xf32>
    %953 = arith.mulf %949, %939 : vector<8x1xf32>
    %954 = arith.addf %894, %953 : vector<8x1xf32>
    %c15 = arith.constant 15 : index
    %955 = memref.load %arg3[%c15] : memref<16xf32, #tpu.memory_space<smem>>
    %956 = vector.broadcast %955 : f32 to vector<8x256xf32>
    %c15_375 = arith.constant 15 : index
    %c0_376 = arith.constant 0 : index
    %957 = memref.load %arg2[%c15_375, %c0_376] : memref<16x9xf32, #tpu.memory_space<smem>>
    %958 = vector.broadcast %957 : f32 to vector<8x256xf32>
    %959 = arith.mulf %958, %26 : vector<8x256xf32>
    %960 = arith.addf %956, %959 : vector<8x256xf32>
    %c15_377 = arith.constant 15 : index
    %c1_378 = arith.constant 1 : index
    %961 = memref.load %arg2[%c15_377, %c1_378] : memref<16x9xf32, #tpu.memory_space<smem>>
    %962 = vector.broadcast %961 : f32 to vector<8x256xf32>
    %963 = arith.mulf %962, %28 : vector<8x256xf32>
    %964 = arith.addf %960, %963 : vector<8x256xf32>
    %c15_379 = arith.constant 15 : index
    %c2_380 = arith.constant 2 : index
    %965 = memref.load %arg2[%c15_379, %c2_380] : memref<16x9xf32, #tpu.memory_space<smem>>
    %966 = vector.broadcast %965 : f32 to vector<8x256xf32>
    %967 = arith.mulf %966, %32 : vector<8x256xf32>
    %968 = arith.addf %964, %967 : vector<8x256xf32>
    %c15_381 = arith.constant 15 : index
    %c3_382 = arith.constant 3 : index
    %969 = memref.load %arg2[%c15_381, %c3_382] : memref<16x9xf32, #tpu.memory_space<smem>>
    %970 = vector.broadcast %969 : f32 to vector<8x256xf32>
    %971 = arith.mulf %970, %36 : vector<8x256xf32>
    %972 = arith.addf %968, %971 : vector<8x256xf32>
    %c15_383 = arith.constant 15 : index
    %c4_384 = arith.constant 4 : index
    %973 = memref.load %arg2[%c15_383, %c4_384] : memref<16x9xf32, #tpu.memory_space<smem>>
    %974 = vector.broadcast %973 : f32 to vector<8x256xf32>
    %975 = arith.mulf %974, %38 : vector<8x256xf32>
    %976 = arith.addf %972, %975 : vector<8x256xf32>
    %c15_385 = arith.constant 15 : index
    %c5_386 = arith.constant 5 : index
    %977 = memref.load %arg2[%c15_385, %c5_386] : memref<16x9xf32, #tpu.memory_space<smem>>
    %978 = vector.broadcast %977 : f32 to vector<8x256xf32>
    %979 = arith.mulf %978, %42 : vector<8x256xf32>
    %980 = arith.addf %976, %979 : vector<8x256xf32>
    %c15_387 = arith.constant 15 : index
    %c6_388 = arith.constant 6 : index
    %981 = memref.load %arg2[%c15_387, %c6_388] : memref<16x9xf32, #tpu.memory_space<smem>>
    %982 = vector.broadcast %981 : f32 to vector<8x256xf32>
    %983 = arith.mulf %982, %46 : vector<8x256xf32>
    %984 = arith.addf %980, %983 : vector<8x256xf32>
    %c15_389 = arith.constant 15 : index
    %c7_390 = arith.constant 7 : index
    %985 = memref.load %arg2[%c15_389, %c7_390] : memref<16x9xf32, #tpu.memory_space<smem>>
    %986 = vector.broadcast %985 : f32 to vector<8x256xf32>
    %987 = arith.mulf %986, %48 : vector<8x256xf32>
    %988 = arith.addf %984, %987 : vector<8x256xf32>
    %c15_391 = arith.constant 15 : index
    %c8_392 = arith.constant 8 : index
    %989 = memref.load %arg2[%c15_391, %c8_392] : memref<16x9xf32, #tpu.memory_space<smem>>
    %990 = vector.broadcast %989 : f32 to vector<8x256xf32>
    %991 = arith.mulf %990, %52 : vector<8x256xf32>
    %992 = arith.addf %988, %991 : vector<8x256xf32>
    %cst_393 = arith.constant dense<0.000000e+00> : vector<8xf32>
    %993 = vector.multi_reduction <add>, %992, %cst_393 [1] : vector<8x256xf32> to vector<8xf32>
    %994 = vector.shape_cast %993 : vector<8xf32> to vector<8x1xf32>
    %995 = arith.mulf %992, %992 : vector<8x256xf32>
    %cst_394 = arith.constant dense<0.000000e+00> : vector<8xf32>
    %996 = vector.multi_reduction <add>, %995, %cst_394 [1] : vector<8x256xf32> to vector<8xf32>
    %997 = vector.shape_cast %996 : vector<8xf32> to vector<8x1xf32>
    %cst_395 = arith.constant 3.906250e-03 : f32
    %998 = vector.broadcast %cst_395 : f32 to vector<8x1xf32>
    %999 = arith.mulf %994, %998 : vector<8x1xf32>
    %cst_396 = arith.constant 3.906250e-03 : f32
    %1000 = vector.broadcast %cst_396 : f32 to vector<8x1xf32>
    %1001 = arith.mulf %997, %1000 : vector<8x1xf32>
    %1002 = arith.mulf %999, %999 : vector<8x1xf32>
    %1003 = arith.subf %1001, %1002 : vector<8x1xf32>
    %c15_397 = arith.constant 15 : index
    %1004 = memref.load %arg4[%c15_397] : memref<16xf32, #tpu.memory_space<smem>>
    %cst_398 = arith.constant 9.99999974E-6 : f32
    %1005 = vector.broadcast %cst_398 : f32 to vector<8x1xf32>
    %1006 = arith.addf %1003, %1005 : vector<8x1xf32>
    %1007 = math.rsqrt %1006 : vector<8x1xf32>
    %1008 = vector.broadcast %1004 : f32 to vector<8x1xf32>
    %1009 = arith.mulf %1008, %1007 : vector<8x1xf32>
    %1010 = vector.broadcast %1009 : vector<8x1xf32> to vector<8x256xf32>
    %1011 = arith.mulf %1010, %992 : vector<8x256xf32>
    %1012 = arith.addf %952, %1011 : vector<8x256xf32>
    %1013 = arith.mulf %1009, %999 : vector<8x1xf32>
    %1014 = arith.addf %954, %1013 : vector<8x1xf32>
    %1015 = vector.broadcast %1014 : vector<8x1xf32> to vector<8x256xf32>
    %1016 = arith.subf %1012, %1015 : vector<8x256xf32>
    %c0_399 = arith.constant 0 : index
    %1017 = memref.load %arg5[%c0_399] : memref<1xf32, #tpu.memory_space<smem>>
    %1018 = vector.broadcast %1017 : f32 to vector<8x256xf32>
    %1019 = arith.addf %1016, %1018 : vector<8x256xf32>
    %cst_400 = arith.constant dense<0.000000e+00> : vector<8xf32>
    %1020 = vector.multi_reduction <add>, %1019, %cst_400 [1] : vector<8x256xf32> to vector<8xf32>
    %1021 = vector.shape_cast %1020 : vector<8xf32> to vector<8x1xf32>
    %1022 = arith.mulf %1019, %1019 : vector<8x256xf32>
    %cst_401 = arith.constant dense<0.000000e+00> : vector<8xf32>
    %1023 = vector.multi_reduction <add>, %1022, %cst_401 [1] : vector<8x256xf32> to vector<8xf32>
    %1024 = vector.shape_cast %1023 : vector<8xf32> to vector<8x1xf32>
    %cst_402 = arith.constant 3.906250e-03 : f32
    %1025 = vector.broadcast %cst_402 : f32 to vector<8x1xf32>
    %1026 = arith.mulf %1021, %1025 : vector<8x1xf32>
    %cst_403 = arith.constant 3.906250e-03 : f32
    %1027 = vector.broadcast %cst_403 : f32 to vector<8x1xf32>
    %1028 = arith.mulf %1024, %1027 : vector<8x1xf32>
    %1029 = arith.mulf %1026, %1026 : vector<8x1xf32>
    %1030 = arith.subf %1028, %1029 : vector<8x1xf32>
    %1031 = vector.broadcast %1026 : vector<8x1xf32> to vector<8x256xf32>
    %1032 = arith.subf %1019, %1031 : vector<8x256xf32>
    %cst_404 = arith.constant 9.99999974E-6 : f32
    %1033 = vector.broadcast %cst_404 : f32 to vector<8x1xf32>
    %1034 = arith.addf %1030, %1033 : vector<8x1xf32>
    %1035 = math.rsqrt %1034 : vector<8x1xf32>
    %1036 = vector.broadcast %1035 : vector<8x1xf32> to vector<8x256xf32>
    %1037 = arith.mulf %1032, %1036 : vector<8x256xf32>
    %1038 = arith.negf %1037 : vector<8x256xf32>
    %1039 = math.exp %1038 : vector<8x256xf32>
    %cst_405 = arith.constant 1.000000e+00 : f32
    %1040 = vector.broadcast %cst_405 : f32 to vector<8x256xf32>
    %1041 = arith.addf %1040, %1039 : vector<8x256xf32>
    %1042 = arith.divf %1040, %1041 : vector<8x256xf32>
    %1043 = arith.index_cast %22 : i32 to index
    %c0_406 = arith.constant 0 : index
    %1044 = vector.load %arg6[%1043, %c0_406] : memref<8x256xf32, #tpu.memory_space<vmem>>, vector<8x256xf32>
    tpu.vector_store %arg6[%1043, %c0_406], %1042 {strides = array<i32>} : memref<8x256xf32, #tpu.memory_space<vmem>>, vector<8x256xf32>,
    %c1_i32_407 = arith.constant 1 : i32
    return
  }
  func.func @transform_0(%arg0: i32) -> (i32, i32) {
    %c0_i32 = arith.constant 0 : i32
    %c0_i32_0 = arith.constant 0 : i32
    return %arg0, %c0_i32 : i32, i32
  }
  func.func @transform_1(%arg0: i32) -> (i32, i32) {
    %c0_i32 = arith.constant 0 : i32
    %c0_i32_0 = arith.constant 0 : i32
    %c0_i32_1 = arith.constant 0 : i32
    return %c0_i32, %c0_i32_0 : i32, i32
  }
  func.func @transform_2(%arg0: i32) -> i32 {
    %c0_i32 = arith.constant 0 : i32
    %c0_i32_0 = arith.constant 0 : i32
    return %c0_i32 : i32
  }
  func.func @transform_3(%arg0: i32) -> i32 {
    %c0_i32 = arith.constant 0 : i32
    %c0_i32_0 = arith.constant 0 : i32
    return %c0_i32 : i32
  }
  func.func @transform_4(%arg0: i32) -> i32 {
    %c0_i32 = arith.constant 0 : i32
    %c0_i32_0 = arith.constant 0 : i32
    return %c0_i32 : i32
  }
  func.func @transform_5(%arg0: i32) -> (i32, i32) {
    %c0_i32 = arith.constant 0 : i32
    %c0_i32_0 = arith.constant 0 : i32
    return %arg0, %c0_i32 : i32, i32
  }
}

</mosaic_0001>

<bundles_post_ra>
// kernel: tpu_custom_call.1
= control target key start
LH: loop header
LB: loop body
LE: loop exit
PB: predicated region body
PF: predicated region fallthrough
CT: control target
= control target key end

     0   :  { %s5029_s0 = inlined_call_operand.hbm [shape: f32[16,290], index: 0, kind: input, shape index: {}]   ;;  %s5030_s1 = inlined_call_operand.hbm [shape: f32[16,9], index: 1, kind: input, shape index: {}]   ;;  %s5031_s2 = inlined_call_operand.vmem [shape: f32[16], index: 2, kind: input, shape index: {}]   ;;  %s5032_s3 = inlined_call_operand.vmem [shape: f32[16], index: 3, kind: input, shape index: {}]   ;;  %s5033_s4 = inlined_call_operand.<no memory space> [shape: f32[1], index: 4, kind: input, shape index: {}]   ;;  %s5034_s5 = inlined_call_operand.hbm [shape: f32[16,256], index: 5, kind: output, shape index: {}]  }
   0x1   :  { %5035 = sst [smem:[#allocation18_spill]] %s5030_s1 }
   0x2   :  { %10 = sst [smem:[#allocation2]] %s5033_s4 }
   0x3   :  { %11 = vsyncpa [#allocation4], 0 }
   0x4   :  { %13 = vsyncpa [#allocation4 + $0x1], 0 }
   0x5   :  { %14 = vsyncpa [#allocation6], 0 }
   0x6   :  { %15 = vsyncpa [#allocation7], 0 }
   0x7   :  { %16 = vsyncpa [#allocation11], 0 }
   0x8   :  { %17 = vsyncpa [#allocation5], 0 }
   0x9   :  { %19 = vsyncpa [#allocation5 + $0x1], 0  ;;  %s3205_s20 = smov 0   ;;  %s3207_s21 = smov 0  }
   0xa   :  { %s3209_s22 = smov 0   ;;  %s3211_s23 = smov 0  }
   0xb LB: > { %s5036_s1 = sld [smem:[#allocation18_spill]]  ;;  %s3229_s26 = sadd.s32 4294967295, %s3157_s23   ;;  %s3157_s23 = sphi %s3211_s23, %s5056_s23   ;;  %s3153_s22 = sphi %s3209_s22, %s5055_s22   ;;  %s3149_s21 = sphi %s3207_s21, %s5054_s21   ;;  %s3145_s20 = sphi %s3205_s20, %s5053_s20  }
   0xc   : > { %p2674_p0 = scmp.ge.s32.totalorder %s3157_s23, 1  ;;  %p46_p1 = scmp.eq.s32.totalorder %s3229_s26, 0 }
   0xd   : > { %p166_p2 = scmp.lt.s32.totalorder %s3157_s23, 3  ;;  %s190_s30 = sshll.u32 %s5031_s2, 4  ;;  %s191_s30 = int_to_ptr.vmem [resolvable:$true] %s190_s30 }
   0xe   : > { %s200_s8 = sshll.u32 %s5032_s3, 4  ;;  %s3159_s9 = smov [#allocation8]   ;;  %s201_s8 = int_to_ptr.vmem [resolvable:$true] %s200_s8 }
   0xf   : > { %p3234_p3 = pnand %p2674_p0, %p166_p2  ;;  %s3160_s10 = smov 128  }
  0x10   : > { %s3161_s11 = smov 8   ;;  %s3162_s12 = smov [#allocation9]  }
  0x11   : > { %s177_s25 = sshll.u32 %s5036_s1, 4  ;;  %p2885_p5 = pneg %p3234_p3  ;;  %s178_s25 = int_to_ptr.hbm [resolvable:$true] %s177_s25 }
  0x12   : > { %s3163_s13 = smov [#allocation10]   ;;  %s2673_s14 = sadd.s32 4294967294, %s3157_s23  }
  0x13   : > { %p2886_p6 = pnand %p2885_p5, %p46_p1  ;;  %s3251_s15 = sadd.s32 1, %s3157_s23  }
  0x14   : > { %s32_s16 = sadd.s32 1, %s3153_s22  ;;  %s29_s17 = ssub.s32 %s3157_s23, %s3251_s15 }
  0x15   : > { %2888 = dma.hbm_to_smem (!%p2886_p6), %s178_s25, 256, %s3159_s9, [#allocation6], %s3160_s10, %s3160_s10, %s3161_s11  }
  0x16   : > { %2891 = dma.vmem_to_smem (!%p2886_p6), %s191_s30, 16, %s3162_s12, [#allocation7]  }
  0x17   : > { %2894 = dma.vmem_to_smem (!%p2886_p6), %s201_s8, 16, %s3163_s13, [#allocation11]  }
  0x18   : > { %p39_p7 = scmp.ne.s32.totalorder %s3153_s22, %s3149_s21  ;;  %p30_p8 = scmp.eq.s32.totalorder %s29_s17, 0 }
  0x19   : > { %p40_p9 = scmp.eq.s32.totalorder %s3157_s23, 0  ;;  %p45_p10 = scmp.ne.s32.totalorder %s3149_s21, %s3145_s20 }
  0x1a   : > { %p153_p11 = scmp.eq.s32.totalorder %s3229_s26, 1  ;;  %p159_p2 = scmp.eq.s32.totalorder %s2673_s14, 1 }
  0x1b   : > { %s3263_s18 = scalar_select %p30_p8, %s3153_s22, %s32_s16  }
  0x1c   : > { %p41_p12 = por %p40_p9, %p39_p7  ;;  %p3267_p13 = por %p46_p1, %p45_p10 }
  0x1d   : > { %p3271_p0 = por %p153_p11, %p39_p7  ;;  %p2906_p5 = scmp.lt.s32.totalorder %s3157_s23, 2 }
  0x1e   : > { %s214_s24 = sand.u32 1, %s3153_s22   ;;  %p3277_p6 = por %p159_p2, %p45_p10 }
  0x1f   : > { %s2866_s28 = smul.u32 24, %s214_s24  ;;  %p3281_p8 = pnand %p2906_p5, %p41_p12 }
  0x20   : > { %s2867_s30 = smul.u32 24, %s3157_s23  ;;  %s215_s12 = scalar_lea.sflag [#allocation4], %s214_s24 }
  0x21   : > { %s218_s9 = scalar_lea.vmem [#allocation3], %s2866_s28  ;;  %p3053_p9 = pneg %p3281_p8 }
  0x22   : > { %s223_s8 = scalar_lea.hbm %s5029_s0, %s2867_s30  ;;  %s227_s10 = sshll.u32 %s218_s9, 4  ;;  %s228_s10 = int_to_ptr.vmem [resolvable:$true] %s227_s10 }
  0x23   : > { %s225_s11 = sshll.u32 %s223_s8, 4  ;;  %s3056_s1 = scalar_lea.hbm %s5029_s0, 48  ;;  %s226_s11 = int_to_ptr.hbm [resolvable:$true] %s225_s11 }
  0x24   : > { %s3049_s13 = sshra.s32 %s226_s11, 4  ;;  %s3050_s13 = int_to_ptr.hbm [resolvable:$true] %s3049_s13 }
  0x25   : > { %s3051_s14 = scalar_lea.hbm %s3050_s13, 24  ;;  %p3057_p12 = scmp.lt.s32.totalorder %s3050_s13, %s5029_s0 }
  0x26   : > { %p3052_p7 = scmp.ne.s32.totalorder %s3050_s13, %s3051_s14  ;;  %p3058_p2 = scmp.lt.s32.totalorder %s3056_s1, %s3051_s14 }
  0x28   : > { %p3054_p10 = pnand %p3053_p9, %p3052_p7  ;;  %p3059_p5 = por %p3058_p2, %p3057_p12 }
  0x2a   : > { %p3055_p11 = pneg %p3054_p10 }
  0x2c   : > { %p3060_p4 = pnand %p3059_p5, %p3055_p11 }
  0x2e   : > { %3063 = shalt.err (!%p3060_p4)
}
  0x2f   : > { %2898 = dma.hbm_to_vmem [thread:$0]  (!%p3281_p8), %s226_s11, 384, %s228_s10, %s215_s12  }
  0x30   : > { %236 = sbr.rel (%p3234_p3) target bundleno = 2187 (0x88b), region = 40  ;;  %s3302_s24 = sand.u32 (!%p3234_p3), 1, %s3149_s21  }
  0x31   : > { %s2868_s28 = smul.u32 (!%p3234_p3), 24, %s3302_s24  ;;  %s239_s7 = scalar_lea.sflag (!%p3234_p3), [#allocation4], %s3302_s24 }
  0x33   : > { %s3306_s8 = scalar_lea.vmem (!%p3234_p3), [#allocation3], %s2868_s28 }
  0x35   : > { %3124 = dma.done.wait (%p3267_p13), %s239_s7, 384  }
  0x36   : > { %3126 = vsyncadd (%p3267_p13), %s239_s7, 4294966912 }
  0x37   : > { %3128 = dma.done.wait (%p46_p1), [#allocation6], 256  }
  0x38   : > { %3130 = vsyncadd (%p46_p1), [#allocation6], 4294967040 }
  0x39   : > { %3132 = dma.done.wait (%p46_p1), [#allocation7], 16  }
  0x3a   : > { %3134 = vsyncadd (%p46_p1), [#allocation7], 4294967280 }
  0x3b   : > { %3136 = dma.done.wait (%p46_p1), [#allocation11], 16  }
  0x3c   : > { %3138 = vsyncadd (%p46_p1), [#allocation11], 4294967280 }
  0x3d   : > { %263 = sfence }
  0x3e   : > { %v3325_v0 = vld [vmem:[%s3306_s8 + $0x10] sm:$0xff]  ;;  %v3328_v1 = vld [vmem:[%s3306_s8 + $0x8] sm:$0xff]  ;;  %v3331_v2 = vld [vmem:[%s3306_s8] sm:$0xff]  ;;  %s3164_s1 = smov 126   ;;  %s3165_s27 = smov 112   ;;  %v286_v36 = vlaneseq  ;;  %vm334_vm2 = vcmask 1031168  }
  0x3f   : > { %332 = vrot.lane.b32.xlu1 %v3325_v0, %s3164_s1  ;;  %343 = vrot.lane.b32.xlu2 %v3328_v1, %s3165_s27  ;;  %s3166_s19 = smov 110   ;;  %s3167_s29 = smov 96   ;;  %vm347_vm4 = vcmask 916480   ;;  %vm415_vm6 = vcmask 1039360   ;;  %vm360_vm7 = vcmask 900096   ;;  %vm373_vm8 = vcmask 785408  }
  0x40   : > { %328 = vrot.lane.b32.xlu0 %v3331_v2, %s3164_s1  ;;  %s2685_s9 = sld [smem:[#allocation8 + $0x1]]  ;;  %s3168_s10 = smov 94   ;;  %v287_v40 = vand.u32 127, %v286_v36  ;;  %vm448_vm9 = vcmask 908288   ;;  %vm386_vm10 = vcmask 769024   ;;  %vm481_vm11 = vcmask 777216  }
  0x41   : > { %s2688_s11 = sld [smem:[#allocation8 + $0x4]]  ;;  %s3169_s12 = smov 127  }
  0x42   : > { %s2691_s13 = sld [smem:[#allocation8 + $0x7]]  ;;  %s3170_s14 = smov 111   ;;  %v288_v41 = vadd.s32 128, %v287_v40  ;;  %v293_v46 = vand.u32 15, %v287_v40 }
  0x43   : > { %s2695_s16 = sld [smem:[#allocation8 + $0x81]]  ;;  %s3171_s6 = smov 95  }
  0x44   : > { %s2701_s17 = sld [smem:[#allocation8 + $0x87]]  ;;  %v300_v45 = vand.u32 15, %v288_v41  ;;  %vm3400_vm1 = vcmp.ge.s32.totalorder %v293_v46, 1  ;;  %vm3430_vm5 = vcmp.le.s32.totalorder %v293_v46, 14 }
  0x45   : > { %s2698_s30 = sld [smem:[#allocation8 + $0x84]]  ;;  %v3414_v51 = vsel %vm3400_vm1, %v3331_v2, 0.0 }
  0x46   : > { %v402_v3 = vstv %s2685_s9  ;;  %s395_s28 = sld [smem:[#allocation8]]  ;;  %vm3396_vm0 = vcmp.ge.s32.totalorder %v300_v45, 1  ;;  %vm3426_vm3 = vcmp.le.s32.totalorder %v300_v45, 14 }
  0x47   : > { %345 = vrot.lane.b32.xlu2 %v3325_v0, %s3165_s27  ;;  %341 = vrot.lane.b32.xlu1 %v3331_v2, %s3165_s27  ;;  %v405_v4 = vmul.f32 %v402_v3, %v3325_v0  ;;  %v404_v5 = vmul.f32 %v402_v3, %v3328_v1  ;;  %v403_v6 = vmul.f32 %v402_v3, %v3331_v2  ;;  %v435_v7 = vstv %s2688_s11  ;;  %s393_s7 = sld [smem:[#allocation9]] }
  0x48   : > { %330 = vrot.lane.b32.xlu0 %v3328_v1, %s3164_s1  ;;  %v438_v8 = vmul.f32 %v435_v7, %v3325_v0  ;;  %v437_v9 = vmul.f32 %v435_v7, %v3328_v1  ;;  %v436_v10 = vmul.f32 %v435_v7, %v3331_v2  ;;  %v468_v11 = vstv %s2691_s13  ;;  %s3409_s1 = sld [smem:[#allocation8 + $0x2]] }
  0x49   : > { %v471_v12 = vmul.f32 %v468_v11, %v3325_v0  ;;  %v470_v13 = vmul.f32 %v468_v11, %v3328_v1  ;;  %v469_v14 = vmul.f32 %v468_v11, %v3331_v2  ;;  %v535_v15 = vstv %s2695_s16  ;;  %s3424_s27 = sld [smem:[#allocation8 + $0x3]] }
  0x4a   : > { %v599_v16 = vstv %s2701_s17  ;;  %v536_v17 = vmul.f32 %v535_v15, %v3331_v2  ;;  %v537_v20 = vmul.f32 %v535_v15, %v3328_v1  ;;  %v538_v21 = vmul.f32 %v535_v15, %v3325_v0  ;;  %s3463_s9 = sld [smem:[#allocation8 + $0x80]] }
  0x4b   : > { %v601_v18 = vmul.f32 %v599_v16, %v3328_v1  ;;  %v600_v19 = vmul.f32 %v599_v16, %v3331_v2  ;;  %v567_v22 = vstv %s2698_s30  ;;  %v602_v29 = vmul.f32 %v599_v16, %v3325_v0  ;;  %s3484_s11 = sld [smem:[#allocation9 + $0x1]] }
  0x4c   : > { %v568_v23 = vmul.f32 %v567_v22, %v3331_v2  ;;  %v569_v25 = vmul.f32 %v567_v22, %v3328_v1  ;;  %v570_v27 = vmul.f32 %v567_v22, %v3325_v0  ;;  %v3407_v49 = vsel %vm3396_vm0, %v3328_v1, 0.0  ;;  %s3508_s13 = sld [smem:[#allocation8 + $0x82]] }
  0x4d   : > { %v396_v50 = vstv %s395_s28  ;;  %v394_v56 = vstv %s393_s7  ;;  %s3529_s16 = sld [smem:[#allocation8 + $0x83]] }
  0x4e   : > { %v398_v55 = vmul.f32 %v396_v50, %v3407_v49  ;;  %v397_v57 = vmul.f32 %v396_v50, %v3414_v51  ;;  %v423_v3 = vstv %s3409_s1  ;;  %s3539_s17 = sld [smem:[#allocation8 + $0x85]] }
  0x4f   : > { %358 = vrot.lane.b32.xlu2 %v3325_v0, %s3166_s19  ;;  %356 = vrot.lane.b32.xlu1 %v3328_v1, %s3166_s19  ;;  %s2700_s30 = sld [smem:[#allocation8 + $0x86]] }
  0x50   : > { %354 = vrot.lane.b32.xlu0 %v3331_v2, %s3166_s19  ;;  %v400_v62 = vadd.f32 %v398_v55, %v394_v56  ;;  %s3439_s19 = sld [smem:[#allocation8 + $0x5]] }
  0x51   : > { %s2702_s28 = sld [smem:[#allocation8 + $0x88]] }
  0x52   : > { %s2706_s7 = sld [smem:[#allocation8 + $0x101]] }
  0x53   : > { %s2709_s1 = sld [smem:[#allocation8 + $0x104]] }
  0x57   : > { %371 = vrot.lane.b32.xlu2 %v3325_v0, %s3167_s29  ;;  %369 = vrot.lane.b32.xlu1 %v3328_v1, %s3167_s29 }
  0x58   : > { %367 = vrot.lane.b32.xlu0 %v3331_v2, %s3167_s29  ;;  %s3456_s29 = sld [smem:[#allocation8 + $0x6]] }
  0x5e   : > { %v462_v45 = vstv %s3456_s29  ;;  %s2720_s29 = sld [smem:[#allocation8 + $0x184]] }
  0x5f   : > { %384 = vrot.lane.b32.xlu2 %v3325_v0, %s3168_s10  ;;  %382 = vrot.lane.b32.xlu1 %v3328_v1, %s3168_s10 }
  0x60   : > { %380 = vrot.lane.b32.xlu0 %v3331_v2, %s3168_s10  ;;  %s3472_s10 = sld [smem:[#allocation8 + $0x8]] }
  0x66   : > { %v489_v48 = vstv %s3472_s10  ;;  %s3606_s10 = sld [smem:[#allocation9 + $0x2]] }
  0x67   : > { %413 = vrot.lane.b32.xlu2 %v405_v4, %s3169_s12  ;;  %411 = vrot.lane.b32.xlu1 %v404_v5, %s3169_s12  ;;  %v399_v4 = vadd.f32 %v397_v57, %v394_v56  ;;  %v529_v56 = vstv %s3463_s9  ;;  %s3604_s9 = sld [smem:[#allocation8 + $0x100]] }
  0x68   : > { %409 = vrot.lane.b32.xlu0 %v403_v6, %s3169_s12 }
  0x6f   : > { %446 = vrot.lane.b32.xlu2 %v438_v8, %s3170_s14  ;;  %444 = vrot.lane.b32.xlu1 %v437_v9, %s3170_s14 }
  0x70   : > { %442 = vrot.lane.b32.xlu0 %v436_v10, %s3170_s14 }
  0x77   : > { %479 = vrot.lane.b32.xlu2 %v471_v12, %s3171_s6  ;;  %477 = vrot.lane.b32.xlu1 %v470_v13, %s3171_s6 }
  0x78   : > { %475 = vrot.lane.b32.xlu0 %v469_v14, %s3171_s6 }
  0x7f   : > { %542 = vrot.lane.b32.xlu2 %v536_v17, %s3169_s12  ;;  %608 = vrot.lane.b32.xlu1 %v601_v18, %s3171_s6  ;;  %v429_v18 = vstv %s3424_s27  ;;  %s2712_s27 = sld [smem:[#allocation8 + $0x107]] }
  0x80   : > { %606 = vrot.lane.b32.xlu0 %v600_v19, %s3171_s6 }
  0x87   : > { %544 = vrot.lane.b32.xlu2 %v537_v20, %s3169_s12 }
  0x8f   : > { %546 = vrot.lane.b32.xlu2 %v538_v21, %s3169_s12 }
  0x97   : > { %574 = vrot.lane.b32.xlu2 %v568_v23, %s3170_s14 }
  0x99   : > { %v344_v24 = vpop.permute.xlu2 %343 }
  0x9f   : > { %576 = vrot.lane.b32.xlu2 %v569_v25, %s3170_s14 }
  0xa1   : > { %v346_v26 = vpop.permute.xlu2 %345 }
  0xa2   : > { %v349_v5 = vsel %vm347_vm4, %v344_v24, %v346_v26  ;;  %v456_v26 = vstv %s3439_s19  ;;  %s2717_s19 = sld [smem:[#allocation8 + $0x181]] }
  0xa3   : > { %v3452_v15 = vsel %vm3396_vm0, %v349_v5, 0.0 }
  0xa7   : > { %578 = vrot.lane.b32.xlu2 %v570_v27, %s3170_s14 }
  0xa9   : > { %v3382_v28 = vpop.permute.xlu2 %358 }
  0xaf   : > { %610 = vrot.lane.b32.xlu2 %v602_v29, %s3171_s6 }
  0xb1   : > { %v333_v30 = vpop.permute.xlu1 %332  ;;  %v3386_v31 = vpop.permute.xlu2 %371 }
  0xb2   : > { %v329_v32 = vpop.permute.xlu0 %328 }
  0xb9   : > { %v3388_v33 = vpop.permute.xlu2 %384  ;;  %v342_v34 = vpop.permute.xlu1 %341 }
  0xba   : > { %v331_v35 = vpop.permute.xlu0 %330  ;;  %v348_v9 = vsel %vm347_vm4, %v342_v34, %v344_v24  ;;  %v431_v24 = vmul.f32 %v429_v18, %v3452_v15 }
  0xbb   : > { %v336_v59 = vsel %vm334_vm2, %v331_v35, %v333_v30  ;;  %v335_v61 = vsel %vm334_vm2, %v329_v32, %v331_v35  ;;  %v3460_v19 = vsel %vm3400_vm1, %v348_v9, 0.0 }
  0xbc   : > { %v3436_v63 = vsel %vm3426_vm3, %v336_v59, 0.0  ;;  %v3443_v6 = vsel %vm3430_vm5, %v335_v61, 0.0  ;;  %v430_v27 = vmul.f32 %v429_v18, %v3460_v19  ;;  %v555_v18 = vstv %s3508_s13  ;;  %s3613_s13 = sld [smem:[#allocation8 + $0x103]] }
  0xbd   : > { %v425_v13 = vmul.f32 %v423_v3, %v3436_v63  ;;  %v424_v17 = vmul.f32 %v423_v3, %v3443_v6 }
  0xc1   : > { %v414_v37 = vpop.permute.xlu2 %413  ;;  %v357_v38 = vpop.permute.xlu1 %356 }
  0xc2   : > { %v355_v39 = vpop.permute.xlu0 %354  ;;  %v362_v20 = vsel %vm360_vm7, %v357_v38, %v3382_v28 }
  0xc3   : > { %v361_v22 = vsel %vm360_vm7, %v355_v39, %v357_v38  ;;  %v3468_v25 = vsel %vm3426_vm3, %v362_v20, 0.0 }
  0xc4   : > { %v3476_v28 = vsel %vm3430_vm5, %v361_v22, 0.0  ;;  %v458_v40 = vmul.f32 %v456_v26, %v3468_v25 }
  0xc9   : > { %v3390_v42 = vpop.permute.xlu2 %446  ;;  %v3392_v43 = vpop.permute.xlu1 %369 }
  0xca   : > { %v3394_v44 = vpop.permute.xlu0 %367  ;;  %v375_v29 = vsel %vm373_vm8, %v3392_v43, %v3386_v31 }
  0xcb   : > { %v374_v35 = vsel %vm373_vm8, %v3394_v44, %v3392_v43  ;;  %v3490_v41 = vsel %vm3396_vm0, %v375_v29, 0.0  ;;  %v457_v44 = vmul.f32 %v456_v26, %v3476_v28  ;;  %v556_v26 = vmul.f32 %v555_v18, %v3443_v6 }
  0xcc   : > { %v464_v57 = vmul.f32 %v462_v45, %v3490_v41 }
  0xd1   : > { %v3416_v52 = vpop.permute.xlu2 %479  ;;  %v3418_v53 = vpop.permute.xlu1 %382 }
  0xd2   : > { %v3420_v54 = vpop.permute.xlu0 %380  ;;  %v388_v46 = vsel %vm386_vm10, %v3418_v53, %v3388_v33 }
  0xd3   : > { %v387_v55 = vsel %vm386_vm10, %v3420_v54, %v3418_v53  ;;  %v3506_v59 = vsel %vm3426_vm3, %v388_v46, 0.0  ;;  %v530_v53 = vmul.f32 %v529_v56, %v3414_v51  ;;  %v593_v46 = vstv %s2700_s30  ;;  %s3629_s30 = sld [smem:[#allocation10]] }
  0xd4   : > { %v3514_v33 = vsel %vm3430_vm5, %v387_v55, 0.0 }
  0xd9   : > { %v412_v7 = vpop.permute.xlu1 %411  ;;  %v3445_v8 = vpop.permute.xlu2 %542 }
  0xda   : > { %v417_v10 = vsel %vm415_vm6, %v412_v7, %v414_v37  ;;  %v410_v11 = vpop.permute.xlu0 %409 }
  0xdb   : > { %v421_v12 = vadd.f32 %v417_v10, %v400_v62  ;;  %v416_v14 = vsel %vm415_vm6, %v410_v11, %v412_v7  ;;  %v491_v11 = vmul.f32 %v489_v48, %v3506_v59 }
  0xdc   : > { %v420_v16 = vadd.f32 %v416_v14, %v399_v4  ;;  %v527_v4 = vstv %s3484_s11  ;;  %s3609_s11 = sld [smem:[#allocation8 + $0x102]] }
  0xdd   : > { %v427_v21 = vadd.f32 %v425_v13, %v421_v12  ;;  %v490_v12 = vmul.f32 %v489_v48, %v3514_v33  ;;  %v532_v13 = vadd.f32 %v530_v53, %v527_v4 }
  0xde   : > { %v426_v23 = vadd.f32 %v424_v17, %v420_v16 }
  0xdf   : > { %v433_v32 = vadd.f32 %v431_v24, %v427_v21 }
  0xe0   : > { %v432_v38 = vadd.f32 %v430_v27, %v426_v23  ;;  %v531_v23 = vmul.f32 %v529_v56, %v3407_v49 }
  0xe1   : > { %v445_v30 = vpop.permute.xlu1 %444  ;;  %v545_v34 = vpop.permute.xlu2 %544 }
  0xe2   : > { %v450_v36 = vsel %vm448_vm9, %v445_v30, %v3390_v42  ;;  %v443_v37 = vpop.permute.xlu0 %442  ;;  %v3496_v42 = vsel %vm3400_vm1, %v374_v35, 0.0  ;;  %v548_v16 = vsel %vm415_vm6, %v3445_v8, %v545_v34  ;;  %v533_v29 = vadd.f32 %v531_v23, %v527_v4 }
  0xe3   : > { %v454_v39 = vadd.f32 %v450_v36, %v433_v32  ;;  %v449_v31 = vsel %vm448_vm9, %v443_v37, %v445_v30  ;;  %v463_v61 = vmul.f32 %v462_v45, %v3496_v42  ;;  %v552_v22 = vadd.f32 %v548_v16, %v532_v13 }
  0xe4   : > { %v453_v43 = vadd.f32 %v449_v31, %v432_v38  ;;  %v561_v32 = vstv %s3529_s16  ;;  %v557_v31 = vmul.f32 %v555_v18, %v3436_v63  ;;  %s3624_s16 = sld [smem:[#allocation8 + $0x105]] }
  0xe5   : > { %v460_v50 = vadd.f32 %v458_v40, %v454_v39  ;;  %v558_v27 = vadd.f32 %v556_v26, %v552_v22  ;;  %v562_v35 = vmul.f32 %v561_v32, %v3460_v19  ;;  %v587_v39 = vstv %s3539_s17  ;;  %s3627_s17 = sld [smem:[#allocation8 + $0x106]] }
  0xe6   : > { %v459_v47 = vadd.f32 %v457_v44, %v453_v43  ;;  %v588_v45 = vmul.f32 %v587_v39, %v3476_v28 }
  0xe7   : > { %v466_v62 = vadd.f32 %v464_v57, %v460_v50  ;;  %v564_v38 = vadd.f32 %v562_v35, %v558_v27  ;;  %v563_v50 = vmul.f32 %v561_v32, %v3452_v15  ;;  %v697_v27 = vstv %s2709_s1  ;;  %s3644_s1 = sld [smem:[#allocation9 + $0x3]] }
  0xe8   : > { %v465_v7 = vadd.f32 %v463_v61, %v459_v47  ;;  %v594_v47 = vmul.f32 %v593_v46, %v3496_v42  ;;  %v699_v35 = vmul.f32 %v697_v27, %v3328_v1 }
  0xe9   : > { %v478_v54 = vpop.permute.xlu1 %477  ;;  %v547_v3 = vpop.permute.xlu2 %546 }
  0xea   : > { %v483_v58 = vsel %vm481_vm11, %v478_v54, %v3416_v52  ;;  %v476_v5 = vpop.permute.xlu0 %475  ;;  %v549_v30 = vsel %vm415_vm6, %v545_v34, %v547_v3 }
  0xeb   : > { %v487_v9 = vadd.f32 %v483_v58, %v466_v62  ;;  %v482_v10 = vsel %vm481_vm11, %v476_v5, %v478_v54  ;;  %v553_v36 = vadd.f32 %v549_v30, %v533_v29  ;;  %v589_v62 = vmul.f32 %v587_v39, %v3468_v25 }
  0xec   : > { %v486_v60 = vadd.f32 %v482_v10, %v465_v7  ;;  %v619_v58 = vstv %s2702_s28  ;;  %v665_v5 = vstv %s2706_s7  ;;  %v729_v29 = vstv %s2712_s27  ;;  %s3631_s28 = sld [smem:[#allocation10 + $0x1]] }
  0xed   : > { %v3523_v14 = vadd.f32 %v491_v11, %v487_v9  ;;  %v559_v44 = vadd.f32 %v557_v31, %v553_v36  ;;  %v595_v9 = vmul.f32 %v593_v46, %v3490_v41  ;;  %v620_v10 = vmul.f32 %v619_v58, %v3514_v33  ;;  %s3635_s7 = sld [smem:[#allocation8 + $0x180]] }
  0xee   : > { %v3527_v17 = vadd.f32 %v490_v12, %v486_v60  ;;  %v666_v12 = vmul.f32 %v665_v5, %v3331_v2  ;;  %v621_v18 = vmul.f32 %v619_v58, %v3506_v59  ;;  %v668_v26 = vmul.f32 %v665_v5, %v3325_v0  ;;  %s2723_s27 = sld [smem:[#allocation8 + $0x187]] }
  0xef   : > { %v498_v52 = vmul.f32 %v3523_v14, %v3523_v14  ;;  %v565_v48 = vadd.f32 %v563_v50, %v559_v44  ;;  %v698_v30 = vmul.f32 %v697_v27, %v3331_v2  ;;  %v730_v32 = vmul.f32 %v729_v29, %v3331_v2 }
  0xf0   : > { %v494_v20 = vadd.f32 %v3523_v14, %v3527_v17  ;;  %v497_v21 = vmul.f32 %v3527_v17, %v3527_v17  ;;  %v795_v36 = vstv %s2717_s19  ;;  %v731_v39 = vmul.f32 %v729_v29, %v3328_v1  ;;  %s3647_s19 = sld [smem:[#allocation8 + $0x108]] }
  0xf1   : > { %v575_v24 = vpop.permute.xlu2 %574  ;;  %v609_v55 = vpop.permute.xlu1 %608  ;;  %v732_v31 = vmul.f32 %v729_v29, %v3325_v0  ;;  %v3592_v44 = vstv %s2720_s29  ;;  %s3655_s29 = sld [smem:[#allocation8 + $0x182]] }
  0xf2   : > { %495 = vadd.xlane.f32.xlu0 %v494_v20  ;;  %v499_v8 = vadd.f32 %v498_v52, %v497_v21  ;;  %v607_v56 = vpop.permute.xlu0 %606  ;;  %v829_v46 = vmul.f32 %v3592_v44, %v3328_v1 }
  0xf3   : > { %v612_v3 = vsel %vm481_vm11, %v607_v56, %v609_v55 }
  0xf4   : > { %500 = vadd.xlane.f32.xlu1 %v499_v8  ;;  %v667_v8 = vmul.f32 %v665_v5, %v3328_v1 }
  0xf9   : > { %v577_v37 = vpop.permute.xlu2 %576 }
  0xfa   : > { %v580_v40 = vsel %vm448_vm9, %v575_v24, %v577_v37 }
  0xfb   : > { %v584_v43 = vadd.f32 %v580_v40, %v564_v38  ;;  %v796_v38 = vmul.f32 %v795_v36, %v3331_v2  ;;  %v797_v40 = vmul.f32 %v795_v36, %v3328_v1 }
  0xfd   : > { %v590_v34 = vadd.f32 %v588_v45, %v584_v43  ;;  %v798_v43 = vmul.f32 %v795_v36, %v3325_v0  ;;  %v828_v45 = vmul.f32 %v3592_v44, %v3331_v2 }
  0xff   : > { %v596_v53 = vadd.f32 %v594_v47, %v590_v34 }
 0x101   : > { %v579_v57 = vpop.permute.xlu2 %578  ;;  %v616_v7 = vadd.f32 %v612_v3, %v596_v53  ;;  %v657_v3 = vstv %s3606_s10  ;;  %s3699_s10 = sld [smem:[#allocation8 + $0x185]] }
 0x102   : > { %v581_v61 = vsel %vm448_vm9, %v577_v37, %v579_v57  ;;  %v700_v37 = vmul.f32 %v697_v27, %v3325_v0 }
 0x103   : > { %v585_v54 = vadd.f32 %v581_v61, %v565_v48  ;;  %v3558_v16 = vadd.f32 %v620_v10, %v616_v7  ;;  %v659_v61 = vstv %s3604_s9  ;;  %s3671_s9 = sld [smem:[#allocation8 + $0x183]] }
 0x105   : > { %v591_v4 = vadd.f32 %v589_v62, %v585_v54  ;;  %v627_v22 = vmul.f32 %v3558_v16, %v3558_v16  ;;  %v660_v54 = vmul.f32 %v659_v61, %v3414_v51 }
 0x107   : > { %v597_v60 = vadd.f32 %v595_v9, %v591_v4  ;;  %v662_v7 = vadd.f32 %v660_v54, %v657_v3  ;;  %v685_v9 = vstv %s3609_s11  ;;  %s3701_s11 = sld [smem:[#allocation8 + $0x186]] }
 0x109   : > { %v611_v11 = vpop.permute.xlu2 %610 }
 0x10a   : > { %v613_v13 = vsel %vm481_vm11, %v609_v55, %v611_v11 }
 0x10b   : > { %v617_v52 = vadd.f32 %v613_v13, %v597_v60 }
 0x10d   : > { %v3561_v20 = vadd.f32 %v621_v18, %v617_v52  ;;  %672 = vrot.lane.b32.xlu1 %v666_v12, %s3169_s12  ;;  %v686_v18 = vmul.f32 %v685_v9, %v3443_v6 }
 0x10f   : > { %v624_v21 = vadd.f32 %v3561_v20, %v3558_v16  ;;  %v628_v23 = vmul.f32 %v3561_v20, %v3561_v20 }
 0x111   : > { %625 = vadd.xlane.f32.xlu2 %v624_v21  ;;  %v629_v24 = vadd.f32 %v628_v23, %v627_v22  ;;  %v691_v23 = vstv %s3613_s13  ;;  %s2728_s13 = sld [smem:[#allocation8 + $0x201]] }
 0x113   : > { %630 = vadd.xlane.f32.xlu0 %v629_v24 }
 0x115   : > { %674 = vrot.lane.b32.xlu1 %v667_v8, %s3169_s12 }
 0x11d   : > { %676 = vrot.lane.b32.xlu1 %v668_v26, %s3169_s12  ;;  %v692_v26 = vmul.f32 %v691_v23, %v3460_v19 }
 0x125   : > { %704 = vrot.lane.b32.xlu1 %v698_v30, %s3170_s14  ;;  %v661_v30 = vmul.f32 %v659_v61, %v3407_v49  ;;  %v518_v61 = vstv %s3629_s30  ;;  %s2714_s30 = sld [smem:[#allocation10 + $0x2]] }
 0x127   : > { %736 = vrot.lane.b32.xlu0 %v730_v32, %s3171_s6 }
 0x129   : > { %706 = vrot.lane.b32.xlu2 %v699_v35, %s3170_s14 }
 0x12d   : > { %708 = vrot.lane.b32.xlu1 %v700_v37, %s3170_s14  ;;  %v663_v37 = vadd.f32 %v661_v30, %v657_v3 }
 0x12f   : > { %802 = vrot.lane.b32.xlu0 %v796_v38, %s3169_s12 }
 0x135   : > { %738 = vrot.lane.b32.xlu1 %v731_v39, %s3171_s6 }
 0x137   : > { %804 = vrot.lane.b32.xlu0 %v797_v40, %s3169_s12 }
 0x13d   : > { %740 = vrot.lane.b32.xlu1 %v732_v31, %s3171_s6 }
 0x13f   : > { %806 = vrot.lane.b32.xlu0 %v798_v43, %s3169_s12 }
 0x147   : > { %834 = vrot.lane.b32.xlu0 %v828_v45, %s3170_s14  ;;  %v717_v45 = vstv %s3624_s16  ;;  %s2731_s16 = sld [smem:[#allocation8 + $0x204]] }
 0x148   : > { %v718_v54 = vmul.f32 %v717_v45, %v3476_v28 }
 0x14f   : > { %836 = vrot.lane.b32.xlu0 %v829_v46, %s3170_s14 }
 0x165   : > { %v496_v34 = vpop.xlane.xlu0 %495 }
 0x166   : > { %v3600_v50 = vmul.f32 0.00390625, %v496_v34 }
 0x167   : > { %v501_v55 = vpop.xlane.xlu1 %500 }
 0x168   : > { %v504_v56 = vmul.f32 %v3600_v50, %v3600_v50  ;;  %v503_v47 = vmul.f32 0.00390625, %v501_v55 }
 0x16a   : > { %v505_v57 = vsub.f32 %v503_v47, %v504_v56  ;;  %v687_v56 = vmul.f32 %v685_v9, %v3436_v63 }
 0x16c   : > { %v507_v48 = vadd.f32 1e-05, %v505_v57  ;;  %v723_v57 = vstv %s3627_s17  ;;  %s2734_s17 = sld [smem:[#allocation8 + $0x207]] }
 0x16e   : > { %2956 = vrsqrt.f32 %v507_v48  ;;  %vm514_vm13 = vweird.f32 %v507_v48 }
 0x174   : > { %v2957_v62 = vpop.eup %2956 }
 0x175   : > { %v509_v58 = vmul.f32 %v2957_v62, %v507_v48  ;;  %vm515_vm12 = vweird.f32 %v2957_v62 }
 0x176   : > { %vm516_vm14 = vmor %vm514_vm13, %vm515_vm12 }
 0x177   : > { %v510_v52 = vmul.f32 %v2957_v62, %v509_v58 }
 0x179   : > { %v511_v27 = vmul.f32 0.5, %v510_v52 }
 0x17b   : > { %v512_v35 = vsub.f32 1.5, %v511_v27 }
 0x17d   : > { %v513_v40 = vmul.f32 %v2957_v62, %v512_v35 }
 0x17f   : > { %v673_v53 = vpop.permute.xlu1 %672 }
 0x184   : > { %v626_v4 = vpop.xlane.xlu2 %625 }
 0x185   : > { %v3615_v5 = vmul.f32 0.00390625, %v626_v4 }
 0x186   : > { %v631_v10 = vpop.xlane.xlu0 %630 }
 0x187   : > { %v634_v11 = vmul.f32 %v3615_v5, %v3615_v5  ;;  %v675_v60 = vpop.permute.xlu1 %674  ;;  %v633_v12 = vmul.f32 0.00390625, %v631_v10  ;;  %v724_v10 = vmul.f32 %v723_v57, %v3496_v42 }
 0x188   : > { %v678_v13 = vsel %vm415_vm6, %v673_v53, %v675_v60  ;;  %v517_v53 = vsel %vm516_vm14, %v2957_v62, %v513_v40  ;;  %v693_v62 = vmul.f32 %v691_v23, %v3452_v15  ;;  %v749_v40 = vstv %s3647_s19  ;;  %s3783_s19 = sld [smem:[#allocation8 + $0x203]] }
 0x189   : > { %v682_v21 = vadd.f32 %v678_v13, %v662_v7  ;;  %v635_v22 = vsub.f32 %v633_v12, %v634_v11  ;;  %v519_v11 = vmul.f32 %v518_v61, %v517_v53 }
 0x18b   : > { %v688_v24 = vadd.f32 %v686_v18, %v682_v21  ;;  %v637_v8 = vadd.f32 1e-05, %v635_v22  ;;  %v719_v21 = vmul.f32 %v717_v45, %v3468_v25  ;;  %v524_v27 = vmul.f32 %v519_v11, %v3600_v50 }
 0x18c   : > { %v707_v31 = vpop.permute.xlu2 %706 }
 0x18d   : > { %2958 = vrsqrt.f32 %v637_v8  ;;  %v694_v29 = vadd.f32 %v692_v26, %v688_v24  ;;  %vm644_vm0 = vweird.f32 %v637_v8  ;;  %v789_v24 = vstv %s3635_s7  ;;  %s3748_s7 = sld [smem:[#allocation8 + $0x200]] }
 0x18e   : > { %v520_v26 = vmul.f32 %v519_v11, %v3527_v17  ;;  %v725_v17 = vmul.f32 %v723_v57, %v3490_v41 }
 0x18f   : > { %v677_v32 = vpop.permute.xlu1 %676 }
 0x190   : > { %v679_v39 = vsel %vm415_vm6, %v675_v60, %v677_v32  ;;  %v648_v60 = vstv %s3631_s28  ;;  %s2724_s28 = sld [smem:[#allocation8 + $0x188]] }
 0x191   : > { %v683_v46 = vadd.f32 %v679_v39, %v663_v37  ;;  %v787_v39 = vstv %s3644_s1  ;;  %s3757_s1 = sld [smem:[#allocation9 + $0x4]] }
 0x193   : > { %v2959_v36 = vpop.eup %2958  ;;  %v689_v48 = vadd.f32 %v687_v56, %v683_v46 }
 0x194   : > { %v639_v38 = vmul.f32 %v2959_v36, %v637_v8  ;;  %vm645_vm15 = vweird.f32 %v2959_v36  ;;  %v521_v8 = vmul.f32 %v519_v11, %v3523_v14  ;;  %v790_v14 = vmul.f32 %v789_v24, %v3414_v51 }
 0x195   : > { %vm646_vm1 = vmor %vm644_vm0, %vm645_vm15  ;;  %v695_v18 = vadd.f32 %v693_v62, %v689_v48 }
 0x196   : > { %v640_v43 = vmul.f32 %v2959_v36, %v639_v38  ;;  %v792_v45 = vadd.f32 %v790_v14, %v787_v39  ;;  %v830_v14 = vmul.f32 %v3592_v44, %v3325_v0  ;;  %v791_v44 = vmul.f32 %v789_v24, %v3407_v49 }
 0x197   : > { %v705_v34 = vpop.permute.xlu1 %704 }
 0x198   : > { %v641_v55 = vmul.f32 0.5, %v640_v43  ;;  %v710_v47 = vsel %vm448_vm9, %v705_v34, %v707_v31  ;;  %v815_v34 = vstv %s3655_s29  ;;  %s2739_s29 = sld [smem:[#allocation8 + $0x281]] }
 0x199   : > { %v714_v3 = vadd.f32 %v710_v47, %v694_v29  ;;  %v737_v4 = vpop.permute.xlu0 %736  ;;  %v750_v47 = vmul.f32 %v749_v40, %v3514_v33  ;;  %v816_v61 = vmul.f32 %v815_v34, %v3443_v6 }
 0x19a   : > { %v642_v58 = vsub.f32 1.5, %v641_v55 }
 0x19b   : > { %v720_v7 = vadd.f32 %v718_v54, %v714_v3  ;;  %v821_v3 = vstv %s3671_s9  ;;  %s2742_s9 = sld [smem:[#allocation8 + $0x284]] }
 0x19c   : > { %v643_v12 = vmul.f32 %v2959_v36, %v642_v58 }
 0x19d   : > { %v726_v9 = vadd.f32 %v724_v10, %v720_v7 }
 0x19e   : > { %v647_v13 = vsel %vm646_vm1, %v2959_v36, %v643_v12 }
 0x19f   : > { %v649_v52 = vmul.f32 %v648_v60, %v647_v13  ;;  %v709_v22 = vpop.permute.xlu1 %708  ;;  %v751_v60 = vmul.f32 %v749_v40, %v3506_v59 }
 0x1a0   : > { %v711_v23 = vsel %vm448_vm9, %v707_v31, %v709_v22 }
 0x1a1   : > { %v650_v29 = vmul.f32 %v649_v52, %v3558_v16  ;;  %v651_v30 = vmul.f32 %v649_v52, %v3561_v20  ;;  %v654_v32 = vmul.f32 %v649_v52, %v3615_v5  ;;  %v715_v35 = vadd.f32 %v711_v23, %v695_v18  ;;  %v803_v36 = vpop.permute.xlu0 %802 }
 0x1a2   : > { %v859_v5 = vstv %s2723_s27  ;;  %v853_v23 = vstv %s3701_s11  ;;  %s3779_s27 = sld [smem:[#allocation8 + $0x202]] }
 0x1a3   : > { %v3664_v50 = vadd.f32 %v650_v29, %v520_v26  ;;  %v3666_v37 = vadd.f32 %v651_v30, %v521_v8  ;;  %v3668_v38 = vadd.f32 %v654_v32, %v524_v27  ;;  %v721_v16 = vadd.f32 %v719_v21, %v715_v35  ;;  %s3827_s11 = sld [smem:[#allocation8 + $0x280]] }
 0x1a4   : > { %v860_v31 = vmul.f32 %v859_v5, %v3331_v2  ;;  %v862_v58 = vmul.f32 %v859_v5, %v3325_v0  ;;  %v847_v26 = vstv %s3699_s10  ;;  %v854_v35 = vmul.f32 %v853_v23, %v3496_v42  ;;  %s2732_s10 = sld [smem:[#allocation8 + $0x205]] }
 0x1a5   : > { %v727_v20 = vadd.f32 %v725_v17, %v721_v16  ;;  %v848_v29 = vmul.f32 %v847_v26, %v3476_v28  ;;  %v861_v17 = vmul.f32 %v859_v5, %v3328_v1  ;;  %v925_v16 = vstv %s2728_s13  ;;  %s3829_s13 = sld [smem:[#allocation8 + $0x206]] }
 0x1a6   : > { %866 = vrot.lane.b32.xlu0 %v860_v31, %s3171_s6  ;;  %v927_v40 = vmul.f32 %v925_v16, %v3328_v1  ;;  %v928_v31 = vmul.f32 %v925_v16, %v3325_v0  ;;  %v3724_v5 = vstv %s2731_s16  ;;  %s3832_s16 = sld [smem:[#allocation9 + $0x5]] }
 0x1a7   : > { %v739_v43 = vpop.permute.xlu1 %738  ;;  %v960_v24 = vmul.f32 %v3724_v5, %v3325_v0 }
 0x1a8   : > { %v742_v46 = vsel %vm481_vm11, %v737_v4, %v739_v43  ;;  %v822_v4 = vmul.f32 %v821_v3, %v3460_v19 }
 0x1a9   : > { %v746_v55 = vadd.f32 %v742_v46, %v726_v9  ;;  %v805_v56 = vpop.permute.xlu0 %804 }
 0x1aa   : > { %v808_v57 = vsel %vm415_vm6, %v803_v36, %v805_v56 }
 0x1ab   : > { %v812_v53 = vadd.f32 %v808_v57, %v792_v45  ;;  %v3683_v54 = vadd.f32 %v750_v47, %v746_v55  ;;  %v958_v45 = vmul.f32 %v3724_v5, %v3331_v2 }
 0x1ad   : > { %v818_v48 = vadd.f32 %v816_v61, %v812_v53  ;;  %v757_v52 = vmul.f32 %v3683_v54, %v3683_v54  ;;  %v817_v61 = vmul.f32 %v815_v34, %v3436_v63  ;;  %v849_v34 = vmul.f32 %v847_v26, %v3468_v25 }
 0x1ae   : > { %870 = vrot.lane.b32.xlu0 %v862_v58, %s3171_s6 }
 0x1af   : > { %v741_v7 = vpop.permute.xlu1 %740  ;;  %v824_v10 = vadd.f32 %v822_v4, %v818_v48 }
 0x1b0   : > { %v743_v11 = vsel %vm481_vm11, %v739_v43, %v741_v7  ;;  %v793_v43 = vadd.f32 %v791_v44, %v787_v39 }
 0x1b1   : > { %v747_v12 = vadd.f32 %v743_v11, %v727_v20  ;;  %v807_v62 = vpop.permute.xlu0 %806  ;;  %v926_v20 = vmul.f32 %v925_v16, %v3331_v2  ;;  %v823_v2 = vmul.f32 %v821_v3, %v3452_v15 }
 0x1b2   : > { %v809_v46 = vsel %vm415_vm6, %v805_v56, %v807_v62  ;;  %v855_v62 = vmul.f32 %v853_v23, %v3490_v41  ;;  %v778_v23 = vstv %s2714_s30  ;;  %s3836_s30 = sld [smem:[#allocation8 + $0x282]] }
 0x1b3   : > { %v3691_v9 = vadd.f32 %v751_v60, %v747_v12  ;;  %v813_v55 = vadd.f32 %v809_v46, %v793_v43 }
 0x1b5   : > { %v754_v13 = vadd.f32 %v3691_v9, %v3683_v54  ;;  %v758_v18 = vmul.f32 %v3691_v9, %v3691_v9  ;;  %v819_v4 = vadd.f32 %v817_v61, %v813_v55 }
 0x1b7   : > { %755 = vadd.xlane.f32.xlu2 %v754_v13  ;;  %v759_v21 = vadd.f32 %v758_v18, %v757_v52  ;;  %v3740_v13 = vstv %s2734_s17  ;;  %s3834_s17 = sld [smem:[#allocation8 + $0x208]] }
 0x1b8   : > { %v991_v52 = vmul.f32 %v3740_v13, %v3328_v1  ;;  %v992_v26 = vmul.f32 %v3740_v13, %v3325_v0 }
 0x1b9   : > { %760 = vadd.xlane.f32.xlu1 %v759_v21  ;;  %v835_v22 = vpop.permute.xlu0 %834 }
 0x1c1   : > { %v837_v8 = vpop.permute.xlu0 %836 }
 0x1c2   : > { %v840_v27 = vsel %vm448_vm9, %v835_v22, %v837_v8 }
 0x1c3   : > { %v844_v30 = vadd.f32 %v840_v27, %v824_v10  ;;  %v825_v10 = vadd.f32 %v823_v2, %v819_v4  ;;  %v945_v4 = vstv %s3779_s27  ;;  %s3905_s27 = sld [smem:[#allocation8 + $0x285]] }
 0x1c5   : > { %v850_v32 = vadd.f32 %v848_v29, %v844_v30 }
 0x1c7   : > { %v3708_v36 = vadd.f32 %v854_v35, %v850_v32  ;;  %v879_v32 = vstv %s2724_s28  ;;  %s3838_s28 = sld [smem:[#allocation10 + $0x3]] }
 0x1c8   : > { %v880_v44 = vmul.f32 %v879_v32, %v3514_v33 }
 0x1cf   : > { %838 = vrot.lane.b32.xlu2 %v830_v14, %s3170_s14 }
 0x1d2   : > { %868 = vrot.lane.b32.xlu1 %v861_v17, %s3171_s6 }
 0x1da   : > { %932 = vrot.lane.b32.xlu1 %v926_v20, %s3169_s12 }
 0x1e2   : > { %934 = vrot.lane.b32.xlu1 %v927_v40, %s3169_s12  ;;  %v881_v40 = vmul.f32 %v879_v32, %v3506_v59 }
 0x1ea   : > { %936 = vrot.lane.b32.xlu1 %v928_v31, %s3169_s12 }
 0x1f2   : > { %964 = vrot.lane.b32.xlu1 %v958_v45, %s3170_s14 }
 0x1fa   : > { %968 = vrot.lane.b32.xlu1 %v960_v24, %s3170_s14  ;;  %v919_v24 = vstv %s3748_s7  ;;  %s3842_s7 = sld [smem:[#allocation8 + $0x283]] }
 0x202   : > { %998 = vrot.lane.b32.xlu1 %v991_v52, %s3171_s6  ;;  %v3799_v52 = vld [vmem:[%s3306_s8] sm:$0xff] }
 0x20a   : > { %1000 = vrot.lane.b32.xlu1 %v992_v26, %s3171_s6 }
 0x218   : > { %v867_v3 = vpop.permute.xlu0 %866 }
 0x220   : > { %v871_v1 = vpop.permute.xlu0 %870 }
 0x22a   : > { %v756_v47 = vpop.xlane.xlu2 %755 }
 0x22b   : > { %v762_v57 = vmul.f32 0.00390625, %v756_v47 }
 0x22c   : > { %v761_v53 = vpop.xlane.xlu1 %760 }
 0x22d   : > { %v764_v58 = vmul.f32 %v762_v57, %v762_v57  ;;  %v763_v48 = vmul.f32 0.00390625, %v761_v53 }
 0x22f   : > { %v765_v39 = vsub.f32 %v763_v48, %v764_v58  ;;  %v917_v58 = vstv %s3757_s1  ;;  %s3851_s1 = sld [smem:[#allocation8 + $0x287]] }
 0x231   : > { %v767_v56 = vadd.f32 1e-05, %v765_v39 }
 0x232   : > { %v839_v7 = vpop.permute.xlu2 %838 }
 0x233   : > { %2960 = vrsqrt.f32 %v767_v56  ;;  %v841_v11 = vsel %vm448_vm9, %v837_v8, %v839_v7  ;;  %vm774_vm3 = vweird.f32 %v767_v56 }
 0x234   : > { %v845_v60 = vadd.f32 %v841_v11, %v825_v10  ;;  %v951_v10 = vstv %s3783_s19  ;;  %s3907_s19 = sld [smem:[#allocation8 + $0x286]] }
 0x236   : > { %v851_v12 = vadd.f32 %v849_v34, %v845_v60  ;;  %v952_v34 = vmul.f32 %v951_v10, %v3460_v19 }
 0x238   : > { %v857_v18 = vadd.f32 %v855_v62, %v851_v12  ;;  %v3793_v12 = vld [vmem:[%s3306_s8 + $0x8] sm:$0xff] }
 0x239   : > { %v2961_v21 = vpop.eup %2960  ;;  %v959_v62 = vmul.f32 %v3793_v12, %v3724_v5  ;;  %v3809_v5 = vld [vmem:[%s3306_s8 + $0x10] sm:$0xff] }
 0x23a   : > { %v769_v22 = vmul.f32 %v2961_v21, %v767_v56  ;;  %vm775_vm2 = vweird.f32 %v2961_v21  ;;  %v946_v56 = vmul.f32 %v945_v4, %v3443_v6 }
 0x23b   : > { %vm776_vm4 = vmor %vm774_vm3, %vm775_vm2 }
 0x23c   : > { %v770_v8 = vmul.f32 %v2961_v21, %v769_v22 }
 0x23e   : > { %v771_v27 = vmul.f32 0.5, %v770_v8 }
 0x240   : > { %v772_v29 = vsub.f32 1.5, %v771_v27  ;;  %v3813_v27 = vstv %s2742_s9  ;;  %s2753_s9 = sld [smem:[#allocation8 + $0x304]] }
 0x241   : > { %v1089_v26 = vmul.f32 %v3793_v12, %v3813_v27 }
 0x242   : > { %v773_v30 = vmul.f32 %v2961_v21, %v772_v29 }
 0x244   : > { %v777_v35 = vsel %vm776_vm4, %v2961_v21, %v773_v30  ;;  %v869_v14 = vpop.permute.xlu1 %868 }
 0x245   : > { %v779_v17 = vmul.f32 %v778_v23, %v777_v35  ;;  %v872_v16 = vsel %vm481_vm11, %v867_v3, %v869_v14  ;;  %v873_v20 = vsel %vm481_vm11, %v869_v14, %v871_v1  ;;  %v990_v3 = vmul.f32 %v3799_v52, %v3740_v13 }
 0x246   : > { %v876_v0 = vadd.f32 %v872_v16, %v3708_v36  ;;  %v877_v31 = vadd.f32 %v873_v20, %v857_v18  ;;  %v1055_v18 = vstv %s2739_s29  ;;  %v1088_v13 = vmul.f32 %v3799_v52, %v3813_v27  ;;  %s2750_s29 = sld [smem:[#allocation8 + $0x301]] }
 0x247   : > { %v780_v43 = vmul.f32 %v779_v17, %v3683_v54  ;;  %v781_v45 = vmul.f32 %v779_v17, %v3691_v9  ;;  %v784_v46 = vmul.f32 %v779_v17, %v762_v57  ;;  %v1056_v21 = vmul.f32 %v3799_v52, %v1055_v18 }
 0x248   : > { %v3759_v55 = vadd.f32 %v881_v40, %v877_v31  ;;  %v3761_v47 = vadd.f32 %v880_v44, %v876_v0  ;;  %v1057_v22 = vmul.f32 %v3793_v12, %v1055_v18  ;;  %v1058_v8 = vmul.f32 %v3809_v5, %v1055_v18 }
 0x249   : > { %v3764_v36 = vadd.f32 %v780_v43, %v3664_v50  ;;  %v3767_v61 = vadd.f32 %v781_v45, %v3666_v37  ;;  %v3770_v53 = vadd.f32 %v784_v46, %v3668_v38  ;;  %v920_v38 = vmul.f32 %v919_v24, %v3414_v51 }
 0x24a   : > { %v884_v54 = vadd.f32 %v3759_v55, %v3761_v47  ;;  %v887_v9 = vmul.f32 %v3761_v47, %v3761_v47  ;;  %v888_v57 = vmul.f32 %v3759_v55, %v3759_v55  ;;  %v921_v35 = vmul.f32 %v919_v24, %v3407_v49 }
 0x24b   : > { %v922_v48 = vadd.f32 %v920_v38, %v917_v58  ;;  %v947_v45 = vmul.f32 %v945_v4, %v3436_v63  ;;  %v977_v24 = vstv %s2732_s10  ;;  %v1047_v18 = vstv %s3832_s16  ;;  %s2756_s10 = sld [smem:[#allocation8 + $0x307]] }
 0x24c   : > { %v933_v50 = vpop.permute.xlu1 %932  ;;  %885 = vadd.xlane.f32.xlu0 %v884_v54  ;;  %v889_v37 = vadd.f32 %v888_v57, %v887_v9  ;;  %v923_v0 = vadd.f32 %v921_v35, %v917_v58  ;;  %v978_v4 = vmul.f32 %v977_v24, %v3476_v28  ;;  %s3962_s16 = sld [smem:[#allocation8 + $0x300]] }
 0x24e   : > { %890 = vadd.xlane.f32.xlu2 %v889_v37  ;;  %v1049_v37 = vstv %s3827_s11  ;;  %s3949_s11 = sld [smem:[#allocation8 + $0x288]] }
 0x254   : > { %v935_v39 = vpop.permute.xlu1 %934 }
 0x255   : > { %v938_v2 = vsel %vm415_vm6, %v933_v50, %v935_v39  ;;  %v953_v50 = vmul.f32 %v951_v10, %v3452_v15  ;;  %v1050_v10 = vmul.f32 %v1049_v37, %v3414_v51 }
 0x256   : > { %v942_v7 = vadd.f32 %v938_v2, %v922_v48 }
 0x258   : > { %v948_v11 = vadd.f32 %v946_v56, %v942_v7 }
 0x25a   : > { %v3790_v60 = vadd.f32 %v952_v34, %v948_v11  ;;  %v979_v34 = vmul.f32 %v977_v24, %v3468_v25 }
 0x25c   : > { %v937_v29 = vpop.permute.xlu1 %936 }
 0x25d   : > { %v939_v31 = vsel %vm415_vm6, %v935_v39, %v937_v29  ;;  %v983_v39 = vstv %s3829_s13  ;;  %s2736_s13 = sld [smem:[#allocation10 + $0x4]] }
 0x25e   : > { %v943_v43 = vadd.f32 %v939_v31, %v923_v0 }
 0x260   : > { %966 = vrot.lane.b32.xlu0 %v959_v62, %s3170_s14  ;;  %v949_v9 = vadd.f32 %v947_v45, %v943_v43 }
 0x262   : > { %v955_v48 = vadd.f32 %v953_v50, %v949_v9 }
 0x264   : > { %v965_v23 = vpop.permute.xlu1 %964 }
 0x266   : > { %996 = vrot.lane.b32.xlu2 %v990_v3, %s3171_s6 }
 0x26c   : > { %v969_v17 = vpop.permute.xlu1 %968 }
 0x26e   : > { %1062 = vrot.lane.b32.xlu2 %v1056_v21, %s3169_s12 }
 0x274   : > { %v999_v46 = vpop.permute.xlu1 %998 }
 0x276   : > { %1064 = vrot.lane.b32.xlu2 %v1057_v22, %s3169_s12  ;;  %v1009_v22 = vstv %s3834_s17  ;;  %s3973_s17 = sld [smem:[#allocation9 + $0x6]] }
 0x277   : > { %v1010_v45 = vmul.f32 %v1009_v22, %v3514_v33 }
 0x27e   : > { %1066 = vrot.lane.b32.xlu2 %v1058_v8, %s3169_s12  ;;  %v1001_v8 = vpop.permute.xlu1 %1000 }
 0x27f   : > { %v1003_v31 = vsel %vm481_vm11, %v999_v46, %v1001_v8  ;;  %v1090_v8 = vmul.f32 %v3809_v5, %v3813_v27 }
 0x286   : > { %1094 = vrot.lane.b32.xlu2 %v1088_v13, %s3170_s14  ;;  %v984_v13 = vmul.f32 %v983_v39, %v3496_v42 }
 0x28e   : > { %1096 = vrot.lane.b32.xlu2 %v1089_v26, %s3170_s14  ;;  %v985_v26 = vmul.f32 %v983_v39, %v3490_v41 }
 0x2bf   : > { %v886_v30 = vpop.xlane.xlu0 %885 }
 0x2c0   : > { %v3821_v1 = vmul.f32 0.00390625, %v886_v30  ;;  %v908_v30 = vstv %s3838_s28  ;;  %s3997_s28 = sld [smem:[#allocation8 + $0x303]] }
 0x2c1   : > { %v891_v32 = vpop.xlane.xlu2 %890 }
 0x2c2   : > { %v894_v14 = vmul.f32 %v3821_v1, %v3821_v1  ;;  %v893_v16 = vmul.f32 0.00390625, %v891_v32 }
 0x2c4   : > { %v895_v20 = vsub.f32 %v893_v16, %v894_v14  ;;  %v1081_v16 = vstv %s3842_s7  ;;  %s2761_s7 = sld [smem:[#allocation8 + $0x381]] }
 0x2c6   : > { %v897_v40 = vadd.f32 1e-05, %v895_v20 }
 0x2c8   : > { %2962 = vrsqrt.f32 %v897_v40  ;;  %vm904_vm7 = vweird.f32 %v897_v40 }
 0x2c9   : > { %v997_v44 = vpop.permute.xlu2 %996 }
 0x2ca   : > { %v1002_v0 = vsel %vm481_vm11, %v997_v44, %v999_v46  ;;  %v1119_v44 = vstv %s3851_s1  ;;  %s4009_s1 = sld [smem:[#allocation8 + $0x305]] }
 0x2ce   : > { %v2963_v54 = vpop.eup %2962 }
 0x2cf   : > { %v899_v57 = vmul.f32 %v2963_v54, %v897_v40  ;;  %vm905_vm5 = vweird.f32 %v2963_v54 }
 0x2d0   : > { %vm906_vm8 = vmor %vm904_vm7, %vm905_vm5 }
 0x2d1   : > { %v900_v38 = vmul.f32 %v2963_v54, %v899_v57  ;;  %v1063_v58 = vpop.permute.xlu2 %1062 }
 0x2d2   : > { %v967_v2 = vpop.permute.xlu0 %966 }
 0x2d3   : > { %v901_v56 = vmul.f32 0.5, %v900_v38  ;;  %v970_v7 = vsel %vm448_vm9, %v965_v23, %v967_v2  ;;  %v971_v11 = vsel %vm448_vm9, %v967_v2, %v969_v17  ;;  %v1075_v17 = vstv %s3836_s30  ;;  %s3993_s30 = sld [smem:[#allocation8 + $0x302]] }
 0x2d4   : > { %v974_v62 = vadd.f32 %v970_v7, %v3790_v60  ;;  %v975_v3 = vadd.f32 %v971_v11, %v955_v48  ;;  %v1052_v60 = vadd.f32 %v1050_v10, %v1047_v18  ;;  %v1076_v50 = vmul.f32 %v1075_v17, %v3443_v6 }
 0x2d5   : > { %v902_v21 = vsub.f32 1.5, %v901_v56  ;;  %v1121_v7 = vmul.f32 %v3793_v12, %v1119_v44 }
 0x2d6   : > { %v980_v29 = vadd.f32 %v978_v4, %v974_v62  ;;  %v981_v23 = vadd.f32 %v979_v34, %v975_v3 }
 0x2d7   : > { %v903_v32 = vmul.f32 %v2963_v54, %v902_v21  ;;  %1128 = vrot.lane.b32.xlu2 %v1121_v7, %s3171_s6  ;;  %v1107_v21 = vstv %s3905_s27  ;;  %s4011_s27 = sld [smem:[#allocation8 + $0x306]] }
 0x2d8   : > { %v986_v35 = vadd.f32 %v984_v13, %v980_v29  ;;  %v987_v14 = vadd.f32 %v985_v26, %v981_v23  ;;  %v1113_v26 = vstv %s3907_s19  ;;  %v1108_v29 = vmul.f32 %v1107_v21, %v3476_v28  ;;  %s2764_s19 = sld [smem:[#allocation8 + $0x384]] }
 0x2d9   : > { %v907_v20 = vsel %vm906_vm8, %v2963_v54, %v903_v32  ;;  %v3866_v43 = vpop.permute.xlu2 %1064  ;;  %v1011_v54 = vmul.f32 %v1009_v22, %v3506_v59  ;;  %v1114_v32 = vmul.f32 %v1113_v26, %v3496_v42 }
 0x2da   : > { %v909_v40 = vmul.f32 %v908_v30, %v907_v20  ;;  %v1068_v9 = vsel %vm415_vm6, %v1063_v58, %v3866_v43  ;;  %v1006_v57 = vadd.f32 %v1002_v0, %v986_v35  ;;  %v1007_v24 = vadd.f32 %v1003_v31, %v987_v14 }
 0x2db   : > { %v1072_v38 = vadd.f32 %v1068_v9, %v1052_v60  ;;  %v1082_v58 = vmul.f32 %v1081_v16, %v3460_v19  ;;  %v1120_v35 = vmul.f32 %v3799_v52, %v1119_v44  ;;  %v1185_v14 = vstv %s2750_s29  ;;  %s4035_s29 = sld [smem:[#allocation8 + $0x308]] }
 0x2dc   : > { %v910_v46 = vmul.f32 %v909_v40, %v3761_v47  ;;  %v911_v48 = vmul.f32 %v909_v40, %v3759_v55  ;;  %v914_v4 = vmul.f32 %v909_v40, %v3821_v1  ;;  %v3879_v39 = vadd.f32 %v1010_v45, %v1006_v57 }
 0x2dd   : > { %v1078_v2 = vadd.f32 %v1076_v50, %v1072_v38  ;;  %v3881_v56 = vadd.f32 %v1011_v54, %v1007_v24  ;;  %v1186_v27 = vmul.f32 %v3799_v52, %v1185_v14  ;;  %v1187_v20 = vmul.f32 %v3793_v12, %v1185_v14 }
 0x2de   : > { %v3888_v11 = vadd.f32 %v910_v46, %v3764_v36  ;;  %v3891_v10 = vadd.f32 %v911_v48, %v3767_v61  ;;  %v3894_v55 = vadd.f32 %v914_v4, %v3770_v53  ;;  %v1017_v47 = vmul.f32 %v3879_v39, %v3879_v39 }
 0x2df   : > { %v1014_v1 = vadd.f32 %v3881_v56, %v3879_v39  ;;  %v1018_v34 = vmul.f32 %v3881_v56, %v3881_v56  ;;  %v1084_v62 = vadd.f32 %v1082_v58, %v1078_v2  ;;  %v1122_v61 = vmul.f32 %v3809_v5, %v1119_v44 }
 0x2e0   : > { %v1188_v0 = vmul.f32 %v3809_v5, %v1185_v14  ;;  %v3927_v31 = vstv %s2753_s9  ;;  %v1051_v50 = vmul.f32 %v1049_v37, %v3407_v49  ;;  %v1077_v58 = vmul.f32 %v1075_v17, %v3436_v63  ;;  %s4042_s9 = sld [smem:[#allocation8 + $0x380]] }
 0x2e1   : > { %1015 = vadd.xlane.f32.xlu0 %v1014_v1  ;;  %v1067_v36 = vpop.permute.xlu2 %1066  ;;  %v1019_v3 = vadd.f32 %v1018_v34, %v1017_v47  ;;  %1130 = vrot.lane.b32.xlu2 %v1122_v61, %s3171_s6  ;;  %v1218_v45 = vmul.f32 %v3799_v52, %v3927_v31  ;;  %v1219_v40 = vmul.f32 %v3793_v12, %v3927_v31  ;;  %v3945_v47 = vstv %s2756_s10  ;;  %s4047_s10 = sld [smem:[#allocation9 + $0x7]] }
 0x2e2   : > { %v1053_v46 = vadd.f32 %v1051_v50, %v1047_v18  ;;  %v1069_v4 = vsel %vm415_vm6, %v3866_v43, %v1067_v36  ;;  %v1251_v37 = vmul.f32 %v3793_v12, %v3945_v47  ;;  %v1083_v43 = vmul.f32 %v1081_v16, %v3452_v15 }
 0x2e3   : > { %1020 = vadd.xlane.f32.xlu1 %v1019_v3  ;;  %v1038_v16 = vstv %s2736_s13  ;;  %v1139_v14 = vstv %s3949_s11  ;;  %s4051_s11 = sld [smem:[#allocation10 + $0x5]] }
 0x2e4   : > { %v1073_v2 = vadd.f32 %v1069_v4, %v1053_v46  ;;  %s4055_s13 = sld [smem:[#allocation8 + $0x382]] }
 0x2e6   : > { %v1079_v34 = vadd.f32 %v1077_v58, %v1073_v2  ;;  %v1179_v2 = vstv %s3962_s16  ;;  %v1177_v58 = vstv %s3973_s17  ;;  %s4057_s16 = sld [smem:[#allocation8 + $0x383]] }
 0x2e7   : > { %s2767_s17 = sld [smem:[#allocation8 + $0x387]] }
 0x2e8   : > { %v1085_v17 = vadd.f32 %v1083_v43, %v1079_v34 }
 0x2e9   : > { %v1095_v53 = vpop.permute.xlu2 %1094 }
 0x2f1   : > { %v1097_v22 = vpop.permute.xlu2 %1096 }
 0x2f2   : > { %v1100_v13 = vsel %vm448_vm9, %v1095_v53, %v1097_v22  ;;  %v1109_v53 = vmul.f32 %v1107_v21, %v3468_v25 }
 0x2f3   : > { %v1104_v23 = vadd.f32 %v1100_v13, %v1084_v62 }
 0x2f5   : > { %v1110_v30 = vadd.f32 %v1108_v29, %v1104_v23  ;;  %1098 = vrot.lane.b32.xlu0 %v1090_v8, %s3170_s14  ;;  %v1252_v29 = vmul.f32 %v3809_v5, %v3945_v47 }
 0x2f7   : > { %v3917_v60 = vadd.f32 %v1114_v32, %v1110_v30  ;;  %v1115_v30 = vmul.f32 %v1113_v26, %v3490_v41  ;;  %v1141_v26 = vmul.f32 %v1139_v14, %v3506_v59 }
 0x2fc   : > { %1126 = vrot.lane.b32.xlu1 %v1120_v35, %s3171_s6 }
 0x304   : > { %1192 = vrot.lane.b32.xlu1 %v1186_v27, %s3169_s12 }
 0x30c   : > { %1194 = vrot.lane.b32.xlu1 %v1187_v20, %s3169_s12 }
 0x314   : > { %1196 = vrot.lane.b32.xlu1 %v1188_v0, %s3169_s12 }
 0x31c   : > { %1224 = vrot.lane.b32.xlu1 %v1218_v45, %s3170_s14 }
 0x324   : > { %1226 = vrot.lane.b32.xlu1 %v1219_v40, %s3170_s14 }
 0x32c   : > { %1258 = vrot.lane.b32.xlu1 %v1251_v37, %s3171_s6  ;;  %v1205_v37 = vstv %s3993_s30  ;;  %s4107_s30 = sld [smem:[#allocation8 + $0x385]] }
 0x331   : > { %v1129_v7 = vpop.permute.xlu2 %1128 }
 0x334   : > { %1260 = vrot.lane.b32.xlu1 %v1252_v29, %s3171_s6  ;;  %v1315_v29 = vstv %s2761_s7  ;;  %s2772_s7 = sld [smem:[#allocation8 + $0x401]] }
 0x33b   : > { %v1131_v23 = vpop.permute.xlu2 %1130 }
 0x33c   : > { %v1133_v27 = vsel %vm481_vm11, %v1129_v7, %v1131_v23  ;;  %v1316_v23 = vmul.f32 %v3799_v52, %v1315_v29 }
 0x354   : > { %v1016_v9 = vpop.xlane.xlu0 %1015 }
 0x355   : > { %v1022_v57 = vmul.f32 0.00390625, %v1016_v9  ;;  %v1140_v9 = vmul.f32 %v1139_v14, %v3514_v33 }
 0x356   : > { %v1021_v24 = vpop.xlane.xlu1 %1020 }
 0x357   : > { %v1024_v38 = vmul.f32 %v1022_v57, %v1022_v57  ;;  %v1023_v54 = vmul.f32 0.00390625, %v1021_v24 }
 0x359   : > { %v1025_v44 = vsub.f32 %v1023_v54, %v1024_v38 }
 0x35b   : > { %v1027_v48 = vadd.f32 1e-05, %v1025_v44 }
 0x35d   : > { %2964 = vrsqrt.f32 %v1027_v48  ;;  %vm1034_vm12 = vweird.f32 %v1027_v48 }
 0x363   : > { %v2965_v1 = vpop.eup %2964 }
 0x364   : > { %v1029_v18 = vmul.f32 %v2965_v1, %v1027_v48  ;;  %vm1035_vm10 = vweird.f32 %v2965_v1 }
 0x365   : > { %vm1036_vm13 = vmor %vm1034_vm12, %vm1035_vm10 }
 0x366   : > { %v1030_v62 = vmul.f32 %v2965_v1, %v1029_v18  ;;  %v1206_v18 = vmul.f32 %v1205_v37, %v3443_v6 }
 0x367   : > { %v1099_v36 = vpop.permute.xlu0 %1098 }
 0x368   : > { %v1031_v3 = vmul.f32 0.5, %v1030_v62  ;;  %v1101_v61 = vsel %vm448_vm9, %v1097_v22, %v1099_v36  ;;  %v1211_v62 = vstv %s3997_s28  ;;  %s4109_s28 = sld [smem:[#allocation8 + $0x386]] }
 0x369   : > { %v1105_v8 = vadd.f32 %v1101_v61, %v1085_v17  ;;  %v1212_v36 = vmul.f32 %v1211_v62, %v3460_v19 }
 0x36a   : > { %v1032_v13 = vsub.f32 1.5, %v1031_v3 }
 0x36b   : > { %v1111_v32 = vadd.f32 %v1109_v53, %v1105_v8  ;;  %v1220_v53 = vmul.f32 %v3809_v5, %v3927_v31  ;;  %v1250_v8 = vmul.f32 %v3799_v52, %v3945_v47 }
 0x36c   : > { %v1033_v35 = vmul.f32 %v2965_v1, %v1032_v13 }
 0x36d   : > { %v1117_v22 = vadd.f32 %v1115_v30, %v1111_v32  ;;  %v1237_v30 = vstv %s4009_s1  ;;  %s2775_s1 = sld [smem:[#allocation8 + $0x404]] }
 0x36e   : > { %v1037_v21 = vsel %vm1036_vm13, %v2965_v1, %v1033_v35  ;;  %v1127_v20 = vpop.permute.xlu1 %1126  ;;  %v1238_v35 = vmul.f32 %v1237_v30, %v3476_v28 }
 0x36f   : > { %v1039_v0 = vmul.f32 %v1038_v16, %v1037_v21  ;;  %v1132_v45 = vsel %vm481_vm11, %v1127_v20, %v1129_v7  ;;  %v1137_v40 = vadd.f32 %v1133_v27, %v1117_v22  ;;  %v1243_v16 = vstv %s4011_s27  ;;  %s2778_s27 = sld [smem:[#allocation8 + $0x407]] }
 0x370   : > { %v1136_v24 = vadd.f32 %v1132_v45, %v3917_v60  ;;  %v1244_v22 = vmul.f32 %v1243_v16, %v3496_v42  ;;  %v1317_v21 = vmul.f32 %v3793_v12, %v1315_v29  ;;  %v1318_v20 = vmul.f32 %v3809_v5, %v1315_v29 }
 0x371   : > { %v1040_v50 = vmul.f32 %v1039_v0, %v3879_v39  ;;  %v1041_v38 = vmul.f32 %v1039_v0, %v3881_v56  ;;  %v1044_v54 = vmul.f32 %v1039_v0, %v1022_v57  ;;  %v3971_v44 = vadd.f32 %v1141_v26, %v1137_v40 }
 0x372   : > { %v3975_v46 = vadd.f32 %v1140_v9, %v1136_v24  ;;  %v4025_v0 = vstv %s2764_s19  ;;  %s4154_s19 = sld [smem:[#allocation8 + $0x388]] }
 0x373   : > { %v3978_v48 = vadd.f32 %v1040_v50, %v3888_v11  ;;  %v3981_v4 = vadd.f32 %v1041_v38, %v3891_v10  ;;  %v3984_v60 = vadd.f32 %v1044_v54, %v3894_v55  ;;  %v1148_v39 = vmul.f32 %v3971_v44, %v3971_v44 }
 0x374   : > { %v1144_v56 = vadd.f32 %v3971_v44, %v3975_v46  ;;  %v1147_v57 = vmul.f32 %v3975_v46, %v3975_v46  ;;  %v1180_v55 = vmul.f32 %v1179_v2, %v3414_v51  ;;  %v1348_v45 = vmul.f32 %v3799_v52, %v4025_v0 }
 0x375   : > { %v1349_v40 = vmul.f32 %v3793_v12, %v4025_v0  ;;  %v1181_v50 = vmul.f32 %v1179_v2, %v3407_v49 }
 0x376   : > { %v1193_v11 = vpop.permute.xlu1 %1192  ;;  %1145 = vadd.xlane.f32.xlu0 %v1144_v56  ;;  %v1149_v10 = vadd.f32 %v1148_v39, %v1147_v57  ;;  %v1182_v7 = vadd.f32 %v1180_v55, %v1177_v58  ;;  %v1269_v55 = vstv %s4035_s29  ;;  %s2758_s29 = sld [smem:[#allocation10 + $0x6]] }
 0x377   : > { %v1183_v56 = vadd.f32 %v1181_v50, %v1177_v58  ;;  %v1270_v2 = vmul.f32 %v1269_v55, %v3514_v33 }
 0x378   : > { %1150 = vadd.xlane.f32.xlu2 %v1149_v10 }
 0x37e   : > { %v1195_v1 = vpop.permute.xlu1 %1194 }
 0x37f   : > { %v1198_v34 = vsel %vm415_vm6, %v1193_v11, %v1195_v1 }
 0x380   : > { %v1202_v43 = vadd.f32 %v1198_v34, %v1182_v7 }
 0x382   : > { %v1208_v17 = vadd.f32 %v1206_v18, %v1202_v43 }
 0x384   : > { %v1214_v3 = vadd.f32 %v1212_v36, %v1208_v17  ;;  %v1207_v17 = vmul.f32 %v1205_v37, %v3436_v63 }
 0x386   : > { %v1197_v61 = vpop.permute.xlu1 %1196 }
 0x387   : > { %v1199_v11 = vsel %vm415_vm6, %v1195_v1, %v1197_v61  ;;  %v1213_v61 = vmul.f32 %v1211_v62, %v3452_v15  ;;  %v1239_v62 = vmul.f32 %v1237_v30, %v3468_v25 }
 0x388   : > { %v1203_v34 = vadd.f32 %v1199_v11, %v1183_v56  ;;  %v1271_v56 = vmul.f32 %v1269_v55, %v3506_v59 }
 0x38a   : > { %1228 = vrot.lane.b32.xlu0 %v1220_v53, %s3170_s14  ;;  %v1209_v36 = vadd.f32 %v1207_v17, %v1203_v34  ;;  %v1309_v53 = vstv %s4042_s9  ;;  %v1379_v34 = vstv %s2767_s17  ;;  %s4165_s9 = sld [smem:[#allocation8 + $0x400]] }
 0x38b   : > { %v1381_v55 = vmul.f32 %v3793_v12, %v1379_v34  ;;  %s4211_s17 = sld [smem:[#allocation8 + $0x405]] }
 0x38c   : > { %v1215_v37 = vadd.f32 %v1213_v61, %v1209_v36 }
 0x38e   : > { %v1225_v13 = vpop.permute.xlu1 %1224 }
 0x390   : > { %1256 = vrot.lane.b32.xlu2 %v1250_v8, %s3171_s6 }
 0x396   : > { %v1227_v31 = vpop.permute.xlu1 %1226 }
 0x397   : > { %v1230_v32 = vsel %vm448_vm9, %v1225_v13, %v1227_v31 }
 0x398   : > { %v1234_v47 = vadd.f32 %v1230_v32, %v1214_v3  ;;  %1322 = vrot.lane.b32.xlu2 %v1316_v23, %s3169_s12 }
 0x39a   : > { %v1240_v14 = vadd.f32 %v1238_v35, %v1234_v47  ;;  %v1310_v35 = vmul.f32 %v1309_v53, %v3414_v51 }
 0x39c   : > { %v1246_v27 = vadd.f32 %v1244_v22, %v1240_v14  ;;  %v1307_v14 = vstv %s4047_s10  ;;  %s4175_s10 = sld [smem:[#allocation9 + $0x8]] }
 0x39e   : > { %v1259_v10 = vpop.permute.xlu1 %1258 }
 0x3a0   : > { %1324 = vrot.lane.b32.xlu2 %v1317_v21, %s3169_s12 }
 0x3a6   : > { %v1261_v21 = vpop.permute.xlu1 %1260 }
 0x3a7   : > { %v1263_v30 = vsel %vm481_vm11, %v1259_v10, %v1261_v21 }
 0x3a8   : > { %1326 = vrot.lane.b32.xlu2 %v1318_v20, %s3169_s12 }
 0x3b0   : > { %1354 = vrot.lane.b32.xlu2 %v1348_v45, %s3170_s14  ;;  %v1168_v45 = vstv %s4051_s11  ;;  %s4195_s11 = sld [smem:[#allocation8 + $0x402]] }
 0x3b8   : > { %1356 = vrot.lane.b32.xlu2 %v1349_v40, %s3170_s14 }
 0x3c0   : > { %1388 = vrot.lane.b32.xlu2 %v1381_v55, %s3171_s6 }
 0x3e9   : > { %v1146_v26 = vpop.xlane.xlu0 %1145 }
 0x3ea   : > { %v4033_v9 = vmul.f32 0.00390625, %v1146_v26 }
 0x3eb   : > { %v1151_v24 = vpop.xlane.xlu2 %1150 }
 0x3ec   : > { %v1154_v38 = vmul.f32 %v4033_v9, %v4033_v9  ;;  %v1153_v54 = vmul.f32 0.00390625, %v1151_v24  ;;  %v1335_v24 = vstv %s4055_s13  ;;  %s4199_s13 = sld [smem:[#allocation8 + $0x403]] }
 0x3ed   : > { %v1337_v55 = vmul.f32 %v1335_v24, %v3436_v63 }
 0x3ee   : > { %v1155_v39 = vsub.f32 %v1153_v54, %v1154_v38 }
 0x3f0   : > { %v1157_v57 = vadd.f32 1e-05, %v1155_v39 }
 0x3f2   : > { %2966 = vrsqrt.f32 %v1157_v57  ;;  %vm1164_vm15 = vweird.f32 %v1157_v57 }
 0x3f3   : > { %v1257_v7 = vpop.permute.xlu2 %1256 }
 0x3f4   : > { %v1262_v18 = vsel %vm481_vm11, %v1257_v7, %v1259_v10  ;;  %v1341_v7 = vstv %s4057_s16  ;;  %s2783_s16 = sld [smem:[#allocation8 + $0x481]] }
 0x3f5   : > { %v1266_v43 = vadd.f32 %v1262_v18, %v1246_v27  ;;  %v1245_v27 = vmul.f32 %v1243_v16, %v3490_v41 }
 0x3f7   : > { %v4049_v58 = vadd.f32 %v1270_v2, %v1266_v43 }
 0x3f8   : > { %v2967_v1 = vpop.eup %2966 }
 0x3f9   : > { %v1159_v3 = vmul.f32 %v2967_v1, %v1157_v57  ;;  %vm1165_vm14 = vweird.f32 %v2967_v1  ;;  %v1336_v57 = vmul.f32 %v1335_v24, %v3443_v6 }
 0x3fa   : > { %vm1166_vm0 = vmor %vm1164_vm15, %vm1165_vm14 }
 0x3fb   : > { %v1160_v8 = vmul.f32 %v2967_v1, %v1159_v3  ;;  %v1323_v13 = vpop.permute.xlu2 %1322 }
 0x3fc   : > { %v1229_v29 = vpop.permute.xlu0 %1228 }
 0x3fd   : > { %v1161_v23 = vmul.f32 0.5, %v1160_v8  ;;  %v1231_v32 = vsel %vm448_vm9, %v1227_v31, %v1229_v29  ;;  %v1312_v31 = vadd.f32 %v1310_v35, %v1307_v14  ;;  %v1350_v29 = vmul.f32 %v3809_v5, %v4025_v0 }
 0x3fe   : > { %v1235_v47 = vadd.f32 %v1231_v32, %v1215_v37  ;;  %v1367_v37 = vstv %s4107_s30  ;;  %v1373_v35 = vstv %s4109_s28  ;;  %v1445_v0 = vstv %s2772_s7  ;;  %s4213_s30 = sld [smem:[#allocation8 + $0x406]] }
 0x3ff   : > { %v1162_v22 = vsub.f32 1.5, %v1161_v23  ;;  %v1374_v21 = vmul.f32 %v1373_v35, %v3496_v42  ;;  %s2786_s28 = sld [smem:[#allocation8 + $0x484]] }
 0x400   : > { %v1241_v20 = vadd.f32 %v1239_v62, %v1235_v47  ;;  %v1368_v62 = vmul.f32 %v1367_v37, %v3476_v28  ;;  %s4242_s7 = sld [smem:[#allocation8 + $0x408]] }
 0x401   : > { %v1163_v40 = vmul.f32 %v2967_v1, %v1162_v22 }
 0x402   : > { %v1247_v26 = vadd.f32 %v1245_v27, %v1241_v20  ;;  %v1380_v20 = vmul.f32 %v3799_v52, %v1379_v34 }
 0x403   : > { %v1167_v50 = vsel %vm1166_vm0, %v2967_v1, %v1163_v40  ;;  %v4071_v38 = vpop.permute.xlu2 %1324  ;;  %v1342_v1 = vmul.f32 %v1341_v7, %v3460_v19  ;;  %v1447_v40 = vmul.f32 %v3793_v12, %v1445_v0 }
 0x404   : > { %v1169_v54 = vmul.f32 %v1168_v45, %v1167_v50  ;;  %v1328_v16 = vsel %vm415_vm6, %v1323_v13, %v4071_v38  ;;  %v1267_v39 = vadd.f32 %v1263_v30, %v1247_v26  ;;  %v1446_v45 = vmul.f32 %v3799_v52, %v1445_v0 }
 0x405   : > { %v1332_v11 = vadd.f32 %v1328_v16, %v1312_v31  ;;  %v1448_v31 = vmul.f32 %v3809_v5, %v1445_v0  ;;  %v4129_v26 = vstv %s2775_s1  ;;  %v1298_v0 = vstv %s2758_s29  ;;  %s4245_s1 = sld [smem:[#allocation8 + $0x480]] }
 0x406   : > { %v1170_v18 = vmul.f32 %v1169_v54, %v3975_v46  ;;  %v1171_v2 = vmul.f32 %v1169_v54, %v3971_v44  ;;  %v1174_v10 = vmul.f32 %v1169_v54, %v4033_v9  ;;  %v4083_v43 = vadd.f32 %v1271_v56, %v1267_v39  ;;  %s4257_s29 = sld [smem:[#allocation8 + $0x482]] }
 0x407   : > { %v1338_v17 = vadd.f32 %v1336_v57, %v1332_v11  ;;  %v1277_v9 = vmul.f32 %v4049_v58, %v4049_v58  ;;  %v1478_v50 = vmul.f32 %v3799_v52, %v4129_v26  ;;  %v1479_v30 = vmul.f32 %v3793_v12, %v4129_v26 }
 0x408   : > { %v4090_v36 = vadd.f32 %v1170_v18, %v3978_v48  ;;  %v4093_v3 = vadd.f32 %v1171_v2, %v3981_v4  ;;  %v4096_v46 = vadd.f32 %v1174_v10, %v3984_v60  ;;  %v1274_v44 = vadd.f32 %v4083_v43, %v4049_v58 }
 0x409   : > { %v1278_v61 = vmul.f32 %v4083_v43, %v4083_v43  ;;  %v1344_v8 = vadd.f32 %v1342_v1, %v1338_v17  ;;  %v1382_v4 = vmul.f32 %v3809_v5, %v1379_v34  ;;  %v1311_v39 = vmul.f32 %v1309_v53, %v3407_v49 }
 0x40a   : > { %1275 = vadd.xlane.f32.xlu0 %v1274_v44  ;;  %v4140_v34 = vstv %s2778_s27  ;;  %s4249_s27 = sld [smem:[#allocation9 + $0x9]] }
 0x40b   : > { %v1327_v48 = vpop.permute.xlu2 %1326  ;;  %v1279_v13 = vadd.f32 %v1278_v61, %v1277_v9  ;;  %1390 = vrot.lane.b32.xlu2 %v1382_v4, %s3171_s6  ;;  %v1511_v2 = vmul.f32 %v3793_v12, %v4140_v34  ;;  %v1313_v10 = vadd.f32 %v1311_v39, %v1307_v14  ;;  %v1512_v61 = vmul.f32 %v3809_v5, %v4140_v34 }
 0x40c   : > { %v1329_v17 = vsel %vm415_vm6, %v4071_v38, %v1327_v48  ;;  %v1343_v38 = vmul.f32 %v1341_v7, %v3452_v15 }
 0x40d   : > { %1280 = vadd.xlane.f32.xlu1 %v1279_v13  ;;  %v1333_v53 = vadd.f32 %v1329_v17, %v1313_v10 }
 0x40f   : > { %v1339_v9 = vadd.f32 %v1337_v55, %v1333_v53  ;;  %v1437_v55 = vstv %s4175_s10  ;;  %s2789_s10 = sld [smem:[#allocation8 + $0x487]] }
 0x411   : > { %v1345_v13 = vadd.f32 %v1343_v38, %v1339_v9  ;;  %v1471_v38 = vstv %s4199_s13  ;;  %s4321_s13 = sld [smem:[#allocation8 + $0x486]] }
 0x413   : > { %v1355_v60 = vpop.permute.xlu2 %1354 }
 0x41b   : > { %v1357_v23 = vpop.permute.xlu2 %1356 }
 0x41c   : > { %v1360_v32 = vsel %vm448_vm9, %v1355_v60, %v1357_v23 }
 0x41d   : > { %v1364_v47 = vadd.f32 %v1360_v32, %v1344_v8 }
 0x41e   : > { %1358 = vrot.lane.b32.xlu0 %v1350_v29, %s3170_s14  ;;  %v1369_v29 = vmul.f32 %v1367_v37, %v3468_v25 }
 0x41f   : > { %v1370_v22 = vadd.f32 %v1368_v62, %v1364_v47 }
 0x421   : > { %v4119_v27 = vadd.f32 %v1374_v21, %v1370_v22  ;;  %v1375_v22 = vmul.f32 %v1373_v35, %v3490_v41 }
 0x423   : > { %v1389_v44 = vpop.permute.xlu2 %1388 }
 0x426   : > { %1386 = vrot.lane.b32.xlu1 %v1380_v20, %s3171_s6  ;;  %v1399_v20 = vstv %s4154_s19  ;;  %s4253_s19 = sld [smem:[#allocation10 + $0x7]] }
 0x42e   : > { %1452 = vrot.lane.b32.xlu1 %v1446_v45, %s3169_s12 }
 0x436   : > { %1454 = vrot.lane.b32.xlu1 %v1447_v40, %s3169_s12 }
 0x43e   : > { %1456 = vrot.lane.b32.xlu1 %v1448_v31, %s3169_s12 }
 0x446   : > { %1484 = vrot.lane.b32.xlu1 %v1478_v50, %s3170_s14  ;;  %v1401_v50 = vmul.f32 %v1399_v20, %v3506_v59 }
 0x44e   : > { %1486 = vrot.lane.b32.xlu1 %v1479_v30, %s3170_s14 }
 0x456   : > { %1518 = vrot.lane.b32.xlu1 %v1511_v2, %s3171_s6 }
 0x45e   : > { %1520 = vrot.lane.b32.xlu1 %v1512_v61, %s3171_s6 }
 0x465   : > { %v1391_v47 = vpop.permute.xlu2 %1390 }
 0x466   : > { %v1393_v40 = vsel %vm481_vm11, %v1389_v44, %v1391_v47 }
 0x47d   : > { %v1276_v54 = vpop.xlane.xlu0 %1275 }
 0x47e   : > { %v1282_v16 = vmul.f32 0.00390625, %v1276_v54  ;;  %v1400_v54 = vmul.f32 %v1399_v20, %v3514_v33  ;;  %v1503_v20 = vstv %s4213_s30  ;;  %s2805_s30 = sld [smem:[#allocation8 + $0x581]] }
 0x480   : > { %v1284_v56 = vmul.f32 %v1282_v16, %v1282_v16  ;;  %v1281_v57 = vpop.xlane.xlu1 %1280 }
 0x481   : > { %v1283_v11 = vmul.f32 0.00390625, %v1281_v57 }
 0x483   : > { %v1285_v18 = vsub.f32 %v1283_v11, %v1284_v56 }
 0x485   : > { %v1287_v1 = vadd.f32 1e-05, %v1285_v18 }
 0x487   : > { %2968 = vrsqrt.f32 %v1287_v1  ;;  %vm1294_vm2 = vweird.f32 %v1287_v1 }
 0x48d   : > { %v2969_v8 = vpop.eup %2968 }
 0x48e   : > { %v1289_v14 = vmul.f32 %v2969_v8, %v1287_v1  ;;  %vm1295_vm1 = vweird.f32 %v2969_v8 }
 0x48f   : > { %vm1296_vm3 = vmor %vm1294_vm2, %vm1295_vm1 }
 0x490   : > { %v1290_v48 = vmul.f32 %v2969_v8, %v1289_v14  ;;  %v1359_v4 = vpop.permute.xlu0 %1358 }
 0x491   : > { %v1361_v24 = vsel %vm448_vm9, %v1357_v23, %v1359_v4 }
 0x492   : > { %v1291_v60 = vmul.f32 0.5, %v1290_v48  ;;  %v1365_v32 = vadd.f32 %v1361_v24, %v1345_v13  ;;  %v1472_v13 = vmul.f32 %v1471_v38, %v3460_v19 }
 0x494   : > { %v1292_v62 = vsub.f32 1.5, %v1291_v60  ;;  %v1371_v21 = vadd.f32 %v1369_v29, %v1365_v32  ;;  %v1510_v60 = vmul.f32 %v3799_v52, %v4140_v34  ;;  %v1480_v29 = vmul.f32 %v3809_v5, %v4129_v26 }
 0x496   : > { %v1293_v7 = vmul.f32 %v2969_v8, %v1292_v62  ;;  %v1377_v45 = vadd.f32 %v1375_v22, %v1371_v21  ;;  %v1575_v62 = vstv %s2783_s16  ;;  %v1497_v22 = vstv %s4211_s17  ;;  %s2794_s16 = sld [smem:[#allocation8 + $0x501]] }
 0x497   : > { %v1576_v47 = vmul.f32 %v3799_v52, %v1575_v62  ;;  %s2800_s17 = sld [smem:[#allocation8 + $0x507]] }
 0x498   : > { %v1297_v23 = vsel %vm1296_vm3, %v2969_v8, %v1293_v7  ;;  %v1387_v31 = vpop.permute.xlu1 %1386  ;;  %v1397_v37 = vadd.f32 %v1393_v40, %v1377_v45  ;;  %v1504_v45 = vmul.f32 %v1503_v20, %v3496_v42  ;;  %v1577_v40 = vmul.f32 %v3793_v12, %v1575_v62 }
 0x499   : > { %v1299_v30 = vmul.f32 %v1298_v0, %v1297_v23  ;;  %v1392_v35 = vsel %vm481_vm11, %v1387_v31, %v1389_v44  ;;  %v1465_v44 = vstv %s4195_s11  ;;  %v1498_v0 = vmul.f32 %v1497_v22, %v3476_v28  ;;  %s4317_s11 = sld [smem:[#allocation8 + $0x485]] }
 0x49a   : > { %v1396_v39 = vadd.f32 %v1392_v35, %v4119_v27  ;;  %v4171_v56 = vadd.f32 %v1401_v50, %v1397_v37  ;;  %v1466_v8 = vmul.f32 %v1465_v44, %v3443_v6  ;;  %v1578_v31 = vmul.f32 %v3809_v5, %v1575_v62 }
 0x49b   : > { %v1300_v57 = vmul.f32 %v1299_v30, %v4049_v58  ;;  %v1301_v11 = vmul.f32 %v1299_v30, %v4083_v43  ;;  %v1304_v18 = vmul.f32 %v1299_v30, %v1282_v16  ;;  %v1439_v16 = vstv %s4165_s9  ;;  %s4266_s9 = sld [smem:[#allocation8 + $0x483]] }
 0x49c   : > { %v4177_v2 = vadd.f32 %v1400_v54, %v1396_v39  ;;  %v1408_v10 = vmul.f32 %v4171_v56, %v4171_v56  ;;  %v4227_v37 = vstv %s2786_s28  ;;  %v1441_v35 = vmul.f32 %v1439_v16, %v3407_v49  ;;  %s2816_s28 = sld [smem:[#allocation8 + $0x601]] }
 0x49d   : > { %v4182_v17 = vadd.f32 %v1300_v57, %v4090_v36  ;;  %v4185_v27 = vadd.f32 %v1301_v11, %v4093_v3  ;;  %v4188_v1 = vadd.f32 %v1304_v18, %v4096_v46  ;;  %v1440_v3 = vmul.f32 %v1439_v16, %v3414_v51 }
 0x49e   : > { %v1404_v58 = vadd.f32 %v4171_v56, %v4177_v2  ;;  %v1407_v43 = vmul.f32 %v4177_v2, %v4177_v2  ;;  %v1608_v50 = vmul.f32 %v3799_v52, %v4227_v37  ;;  %v1609_v30 = vmul.f32 %v3793_v12, %v4227_v37 }
 0x49f   : > { %v1442_v46 = vadd.f32 %v1440_v3, %v1437_v55  ;;  %v1443_v54 = vadd.f32 %v1441_v35, %v1437_v55  ;;  %v1473_v16 = vmul.f32 %v1471_v38, %v3452_v15  ;;  %v1529_v38 = vstv %s4242_s7  ;;  %s2780_s7 = sld [smem:[#allocation10 + $0x8]] }
 0x4a0   : > { %v1453_v53 = vpop.permute.xlu1 %1452  ;;  %1405 = vadd.xlane.f32.xlu0 %v1404_v58  ;;  %v1409_v36 = vadd.f32 %v1408_v10, %v1407_v43  ;;  %v1467_v58 = vmul.f32 %v1465_v44, %v3436_v63 }
 0x4a2   : > { %1410 = vadd.xlane.f32.xlu2 %v1409_v36 }
 0x4a8   : > { %v1455_v9 = vpop.permute.xlu1 %1454 }
 0x4a9   : > { %v1458_v61 = vsel %vm415_vm6, %v1453_v53, %v1455_v9 }
 0x4aa   : > { %v1462_v14 = vadd.f32 %v1458_v61, %v1442_v46 }
 0x4ac   : > { %v1468_v48 = vadd.f32 %v1466_v8, %v1462_v14  ;;  %v1505_v8 = vmul.f32 %v1503_v20, %v3490_v41 }
 0x4ae   : > { %v1474_v4 = vadd.f32 %v1472_v13, %v1468_v48 }
 0x4b0   : > { %v1457_v24 = vpop.permute.xlu1 %1456 }
 0x4b1   : > { %v1459_v39 = vsel %vm415_vm6, %v1455_v9, %v1457_v24  ;;  %v1499_v9 = vmul.f32 %v1497_v22, %v3468_v25 }
 0x4b2   : > { %v1463_v11 = vadd.f32 %v1459_v39, %v1443_v54  ;;  %v1595_v54 = vstv %s4257_s29  ;;  %s4430_s29 = sld [smem:[#allocation8 + $0x502]] }
 0x4b4   : > { %1516 = vrot.lane.b32.xlu0 %v1510_v60, %s3171_s6  ;;  %v1469_v53 = vadd.f32 %v1467_v58, %v1463_v11  ;;  %v1569_v60 = vstv %s4245_s1  ;;  %s2790_s1 = sld [smem:[#allocation8 + $0x488]] }
 0x4b6   : > { %v1475_v3 = vadd.f32 %v1473_v16, %v1469_v53  ;;  %v1601_v53 = vstv %s4266_s9  ;;  %s4436_s9 = sld [smem:[#allocation8 + $0x503]] }
 0x4b8   : > { %v1485_v32 = vpop.permute.xlu1 %1484 }
 0x4ba   : > { %1488 = vrot.lane.b32.xlu2 %v1480_v29, %s3170_s14 }
 0x4c0   : > { %v1487_v34 = vpop.permute.xlu1 %1486 }
 0x4c1   : > { %v1490_v21 = vsel %vm448_vm9, %v1485_v32, %v1487_v34  ;;  %v1531_v32 = vmul.f32 %v1529_v38, %v3506_v59 }
 0x4c2   : > { %v1494_v26 = vadd.f32 %v1490_v21, %v1474_v4  ;;  %1582 = vrot.lane.b32.xlu2 %v1576_v47, %s3169_s12 }
 0x4c4   : > { %v1500_v7 = vadd.f32 %v1498_v0, %v1494_v26  ;;  %v1570_v0 = vmul.f32 %v1569_v60, %v3414_v51  ;;  %v1530_v26 = vmul.f32 %v1529_v38, %v3514_v33 }
 0x4c6   : > { %v1506_v23 = vadd.f32 %v1504_v45, %v1500_v7  ;;  %v1567_v45 = vstv %s4249_s27  ;;  %s4399_s27 = sld [smem:[#allocation8 + $0x500]] }
 0x4c7   : > { %v1572_v35 = vadd.f32 %v1570_v0, %v1567_v45 }
 0x4c8   : > { %v1519_v43 = vpop.permute.xlu1 %1518 }
 0x4ca   : > { %1584 = vrot.lane.b32.xlu2 %v1577_v40, %s3169_s12 }
 0x4d0   : > { %v1521_v14 = vpop.permute.xlu1 %1520 }
 0x4d1   : > { %v1523_v24 = vsel %vm481_vm11, %v1519_v43, %v1521_v14 }
 0x4d2   : > { %1586 = vrot.lane.b32.xlu2 %v1578_v31, %s3169_s12 }
 0x4da   : > { %1614 = vrot.lane.b32.xlu2 %v1608_v50, %s3170_s14  ;;  %v1428_v50 = vstv %s4253_s19  ;;  %s4408_s19 = sld [smem:[#allocation9 + $0xa]] }
 0x4e2   : > { %1616 = vrot.lane.b32.xlu2 %v1609_v30, %s3170_s14 }
 0x513   : > { %v1406_v5 = vpop.xlane.xlu0 %1405 }
 0x514   : > { %v4237_v57 = vmul.f32 0.00390625, %v1406_v5 }
 0x515   : > { %v1411_v18 = vpop.xlane.xlu2 %1410 }
 0x516   : > { %v1414_v52 = vmul.f32 %v4237_v57, %v4237_v57  ;;  %v1413_v10 = vmul.f32 0.00390625, %v1411_v18 }
 0x518   : > { %v1415_v12 = vsub.f32 %v1413_v10, %v1414_v52 }
 0x51a   : > { %v1417_v36 = vadd.f32 1e-05, %v1415_v12 }
 0x51c   : > { %2970 = vrsqrt.f32 %v1417_v36  ;;  %vm1424_vm5 = vweird.f32 %v1417_v36 }
 0x51d   : > { %v1489_v55 = vpop.permute.xlu2 %1488 }
 0x51e   : > { %v1491_v46 = vsel %vm448_vm9, %v1487_v34, %v1489_v55  ;;  %v1639_v55 = vstv %s2789_s10  ;;  %s2804_s10 = sld [smem:[#allocation8 + $0x580]] }
 0x51f   : > { %v1495_v44 = vadd.f32 %v1491_v46, %v1475_v3 }
 0x521   : > { %v1501_v61 = vadd.f32 %v1499_v9, %v1495_v44  ;;  %v1602_v9 = vmul.f32 %v1601_v53, %v3460_v19  ;;  %v4297_v44 = vld [vmem:[%s3306_s8] sm:$0xff] }
 0x522   : > { %v2971_v48 = vpop.eup %2970 }
 0x523   : > { %v1419_v13 = vmul.f32 %v2971_v48, %v1417_v36  ;;  %v1507_v4 = vadd.f32 %v1505_v8, %v1501_v61  ;;  %vm1425_vm4 = vweird.f32 %v2971_v48  ;;  %v1640_v61 = vmul.f32 %v4297_v44, %v1639_v55 }
 0x524   : > { %vm1426_vm7 = vmor %vm1424_vm5, %vm1425_vm4 }
 0x525   : > { %v1420_v29 = vmul.f32 %v2971_v48, %v1419_v13  ;;  %v1527_v62 = vadd.f32 %v1523_v24, %v1507_v4  ;;  %v1583_v47 = vpop.permute.xlu2 %1582  ;;  %1646 = vrot.lane.b32.xlu2 %v1640_v61, %s3171_s6  ;;  %v4328_v4 = vld [vmem:[%s3306_s8 + $0x8] sm:$0xff] }
 0x526   : > { %v1517_v22 = vpop.permute.xlu0 %1516  ;;  %v1641_v24 = vmul.f32 %v4328_v4, %v1639_v55 }
 0x527   : > { %v1421_v34 = vmul.f32 0.5, %v1420_v29  ;;  %v4260_v21 = vadd.f32 %v1531_v32, %v1527_v62  ;;  %v1522_v20 = vsel %vm481_vm11, %v1517_v22, %v1519_v43  ;;  %v1596_v43 = vmul.f32 %v1595_v54, %v3443_v6 }
 0x528   : > { %v1526_v7 = vadd.f32 %v1522_v20, %v1506_v23  ;;  %v1633_v32 = vstv %s4321_s13  ;;  %s2806_s13 = sld [smem:[#allocation8 + $0x582]] }
 0x529   : > { %v1422_v40 = vsub.f32 1.5, %v1421_v34  ;;  %v1538_v5 = vmul.f32 %v4260_v21, %v4260_v21  ;;  %v1634_v22 = vmul.f32 %v1633_v32, %v3496_v42  ;;  %v1705_v34 = vstv %s2794_s16  ;;  %s4471_s16 = sld [smem:[#allocation8 + $0x583]] }
 0x52a   : > { %v4270_v31 = vadd.f32 %v1530_v26, %v1526_v7  ;;  %v1706_v0 = vmul.f32 %v4297_v44, %v1705_v34  ;;  %v1707_v26 = vmul.f32 %v4328_v4, %v1705_v34 }
 0x52b   : > { %v1423_v30 = vmul.f32 %v2971_v48, %v1422_v40 }
 0x52c   : > { %v1534_v39 = vadd.f32 %v4260_v21, %v4270_v31  ;;  %v1537_v23 = vmul.f32 %v4270_v31, %v4270_v31 }
 0x52d   : > { %v1427_v11 = vsel %vm1426_vm7, %v2971_v48, %v1423_v30  ;;  %v4282_v18 = vpop.permute.xlu2 %1584  ;;  %v4313_v48 = vld [vmem:[%s3306_s8 + $0x10] sm:$0xff]  ;;  %s2797_s8 = sld [smem:[#allocation8 + $0x504]] }
 0x52e   : > { %v1429_v52 = vmul.f32 %v1428_v50, %v1427_v11  ;;  %v1588_v10 = vsel %vm415_vm6, %v1583_v47, %v4282_v18  ;;  %1535 = vadd.xlane.f32.xlu0 %v1534_v39  ;;  %v1539_v58 = vadd.f32 %v1538_v5, %v1537_v23  ;;  %v1642_v38 = vmul.f32 %v4313_v48, %v1639_v55 }
 0x52f   : > { %v1592_v12 = vadd.f32 %v1588_v10, %v1572_v35  ;;  %v1708_v7 = vmul.f32 %v4313_v48, %v1705_v34  ;;  %v4357_v35 = vstv %s2800_s17  ;;  %v1835_v5 = vstv %s2805_s30  ;;  %s2814_s17 = sld [smem:[#allocation9 + $0xc]] }
 0x530   : > { %v1430_v36 = vmul.f32 %v1429_v52, %v4177_v2  ;;  %v1431_v16 = vmul.f32 %v1429_v52, %v4171_v56  ;;  %v1434_v3 = vmul.f32 %v1429_v52, %v4237_v57  ;;  %1540 = vadd.xlane.f32.xlu1 %v1539_v58  ;;  %1650 = vrot.lane.b32.xlu2 %v1642_v38, %s3171_s6  ;;  %v1965_v58 = vstv %s2816_s28  ;;  %s2817_s30 = sld [smem:[#allocation8 + $0x602]] }
 0x531   : > { %v1598_v46 = vadd.f32 %v1596_v43, %v1592_v12  ;;  %v1771_v39 = vmul.f32 %v4328_v4, %v4357_v35  ;;  %v1772_v23 = vmul.f32 %v4313_v48, %v4357_v35  ;;  %v1836_v11 = vmul.f32 %v4297_v44, %v1835_v5  ;;  %s4487_s28 = sld [smem:[#allocation8 + $0x603]] }
 0x532   : > { %v4301_v8 = vadd.f32 %v1430_v36, %v4182_v17  ;;  %v4304_v14 = vadd.f32 %v1431_v16, %v4185_v27  ;;  %v4307_v56 = vadd.f32 %v1434_v3, %v4188_v1  ;;  %v1610_v27 = vmul.f32 %v4313_v48, %v4227_v37 }
 0x533   : > { %v1604_v2 = vadd.f32 %v1602_v9, %v1598_v46  ;;  %v1627_v1 = vstv %s4317_s11  ;;  %v4349_v40 = vstv %s2797_s8  ;;  %v1837_v52 = vmul.f32 %v4328_v4, %v1835_v5  ;;  %s2803_s11 = sld [smem:[#allocation9 + $0xb]] }
 0x534   : > { %v1628_v37 = vmul.f32 %v1627_v1, %v3476_v28  ;;  %v1738_v50 = vmul.f32 %v4297_v44, %v4349_v40  ;;  %v1740_v30 = vmul.f32 %v4313_v48, %v4349_v40  ;;  %v1838_v10 = vmul.f32 %v4313_v48, %v1835_v5  ;;  %s2815_s8 = sld [smem:[#allocation8 + $0x600]] }
 0x535   : > { %v4310_v57 = vpop.permute.xlu2 %1586  ;;  %v1966_v43 = vmul.f32 %v4297_v44, %v1965_v58  ;;  %v1571_v3 = vmul.f32 %v1569_v60, %v3407_v49  ;;  %v1967_v9 = vmul.f32 %v4328_v4, %v1965_v58  ;;  %v1968_v60 = vmul.f32 %v4313_v48, %v1965_v58 }
 0x536   : > { %v1659_v5 = vstv %s2790_s1  ;;  %s2808_s1 = sld [smem:[#allocation8 + $0x584]] }
 0x53d   : > { %v1615_v17 = vpop.permute.xlu2 %1614 }
 0x542   : > { %1618 = vrot.lane.b32.xlu0 %v1610_v27, %s3170_s14 }
 0x545   : > { %v4325_v13 = vpop.permute.xlu2 %1616 }
 0x546   : > { %v1620_v29 = vsel %vm448_vm9, %v1615_v17, %v4325_v13  ;;  %v1589_v17 = vsel %vm415_vm6, %v4282_v18, %v4310_v57  ;;  %v1603_v18 = vmul.f32 %v1601_v53, %v3452_v15 }
 0x547   : > { %v1624_v62 = vadd.f32 %v1620_v29, %v1604_v2  ;;  %v1573_v2 = vadd.f32 %v1571_v3, %v1567_v45 }
 0x549   : > { %v1630_v47 = vadd.f32 %v1628_v37, %v1624_v62  ;;  %1648 = vrot.lane.b32.xlu1 %v1641_v24, %s3171_s6  ;;  %v1593_v27 = vadd.f32 %v1589_v17, %v1573_v2  ;;  %v1597_v24 = vmul.f32 %v1595_v54, %v3436_v63  ;;  %v1629_v54 = vmul.f32 %v1627_v1, %v3468_v25 }
 0x54a   : > { %v1699_v17 = vstv %s4399_s27  ;;  %s2799_s27 = sld [smem:[#allocation8 + $0x506]] }
 0x54b   : > { %v4341_v20 = vadd.f32 %v1634_v22, %v1630_v47  ;;  %v1599_v62 = vadd.f32 %v1597_v24, %v1593_v27  ;;  %v1697_v27 = vstv %s4408_s19  ;;  %v1725_v24 = vstv %s4430_s29  ;;  %s4524_s19 = sld [smem:[#allocation8 + $0x508]] }
 0x54c   : > { %s2791_s29 = sld [smem:[#allocation10 + $0x9]] }
 0x54d   : > { %v1605_v47 = vadd.f32 %v1603_v18, %v1599_v62  ;;  %v1726_v62 = vmul.f32 %v1725_v24, %v3443_v6  ;;  %v1731_v18 = vstv %s4436_s9  ;;  %s2838_s9 = sld [smem:[#allocation8 + $0x701]] }
 0x551   : > { %1712 = vrot.lane.b32.xlu1 %v1706_v0, %s3169_s12 }
 0x559   : > { %1714 = vrot.lane.b32.xlu1 %v1707_v26, %s3169_s12 }
 0x561   : > { %1716 = vrot.lane.b32.xlu1 %v1708_v7, %s3169_s12 }
 0x569   : > { %1744 = vrot.lane.b32.xlu1 %v1738_v50, %s3170_s14 }
 0x571   : > { %1748 = vrot.lane.b32.xlu1 %v1740_v30, %s3170_s14  ;;  %v1635_v30 = vmul.f32 %v1633_v32, %v3490_v41  ;;  %v1661_v32 = vmul.f32 %v1659_v5, %v3506_v59 }
 0x579   : > { %1778 = vrot.lane.b32.xlu1 %v1771_v39, %s3171_s6  ;;  %v1558_v39 = vstv %s2780_s7  ;;  %s2827_s7 = sld [smem:[#allocation8 + $0x681]] }
 0x57f   : > { %v1647_v29 = vpop.permute.xlu2 %1646 }
 0x581   : > { %1780 = vrot.lane.b32.xlu1 %v1772_v23, %s3171_s6 }
 0x589   : > { %1842 = vrot.lane.b32.xlu1 %v1836_v11, %s3169_s12 }
 0x58a   : > { %v1651_v23 = vpop.permute.xlu2 %1650 }
 0x591   : > { %1844 = vrot.lane.b32.xlu1 %v1837_v52, %s3169_s12 }
 0x599   : > { %1846 = vrot.lane.b32.xlu1 %v1838_v10, %s3169_s12 }
 0x5a1   : > { %1972 = vrot.lane.b32.xlu1 %v1966_v43, %s3169_s12  ;;  %v1536_v12 = vpop.xlane.xlu0 %1535  ;;  %v1660_v43 = vmul.f32 %v1659_v5, %v3514_v33  ;;  %v1855_v5 = vstv %s2806_s13  ;;  %s2849_s13 = sld [smem:[#allocation8 + $0x781]] }
 0x5a2   : > { %v1542_v36 = vmul.f32 0.00390625, %v1536_v12 }
 0x5a3   : > { %v1541_v16 = vpop.xlane.xlu1 %1540 }
 0x5a4   : > { %v1544_v55 = vmul.f32 %v1542_v36, %v1542_v36  ;;  %v1543_v46 = vmul.f32 0.00390625, %v1541_v16 }
 0x5a6   : > { %v1545_v61 = vsub.f32 %v1543_v46, %v1544_v55 }
 0x5a8   : > { %v1547_v38 = vadd.f32 1e-05, %v1545_v61 }
 0x5a9   : > { %1974 = vrot.lane.b32.xlu1 %v1967_v9, %s3169_s12 }
 0x5aa   : > { %2972 = vrsqrt.f32 %v1547_v38  ;;  %vm1554_vm10 = vweird.f32 %v1547_v38 }
 0x5b0   : > { %v2973_v37 = vpop.eup %2972 }
 0x5b1   : > { %v1549_v45 = vmul.f32 %v2973_v37, %v1547_v38  ;;  %1976 = vrot.lane.b32.xlu1 %v1968_v60, %s3169_s12  ;;  %vm1555_vm8 = vweird.f32 %v2973_v37 }
 0x5b2   : > { %vm1556_vm12 = vmor %vm1554_vm10, %vm1555_vm8 }
 0x5b3   : > { %v1550_v57 = vmul.f32 %v2973_v37, %v1549_v45 }
 0x5b4   : > { %v1619_v22 = vpop.permute.xlu0 %1618 }
 0x5b5   : > { %v1551_v34 = vmul.f32 0.5, %v1550_v57  ;;  %v1621_v0 = vsel %vm448_vm9, %v4325_v13, %v1619_v22 }
 0x5b6   : > { %v1625_v26 = vadd.f32 %v1621_v0, %v1605_v47  ;;  %v1732_v47 = vmul.f32 %v1731_v18, %v3460_v19  ;;  %v1770_v0 = vmul.f32 %v4297_v44, %v4357_v35 }
 0x5b7   : > { %v1552_v7 = vsub.f32 1.5, %v1551_v34 }
 0x5b8   : > { %v1631_v50 = vadd.f32 %v1629_v54, %v1625_v26  ;;  %v1739_v54 = vmul.f32 %v4328_v4, %v4349_v40  ;;  %v1827_v40 = vstv %s2803_s11  ;;  %s2819_s11 = sld [smem:[#allocation8 + $0x604]] }
 0x5b9   : > { %v1553_v53 = vmul.f32 %v2973_v37, %v1552_v7 }
 0x5ba   : > { %v1637_v11 = vadd.f32 %v1635_v30, %v1631_v50 }
 0x5bb   : > { %v1557_v13 = vsel %vm1556_vm12, %v2973_v37, %v1553_v53  ;;  %v1649_v52 = vpop.permute.xlu1 %1648 }
 0x5bc   : > { %v1559_v10 = vmul.f32 %v1558_v39, %v1557_v13  ;;  %v1652_v1 = vsel %vm481_vm11, %v1647_v29, %v1649_v52  ;;  %v1653_v58 = vsel %vm481_vm11, %v1649_v52, %v1651_v23  ;;  %v1829_v39 = vstv %s2804_s10  ;;  %s2798_s10 = sld [smem:[#allocation8 + $0x505]] }
 0x5bd   : > { %v1656_v12 = vadd.f32 %v1652_v1, %v4341_v20  ;;  %v1657_v16 = vadd.f32 %v1653_v58, %v1637_v11  ;;  %v1830_v53 = vmul.f32 %v1829_v39, %v3414_v51  ;;  %v1856_v52 = vmul.f32 %v1855_v5, %v3443_v6 }
 0x5be   : > { %v1560_v3 = vmul.f32 %v1559_v10, %v4270_v31  ;;  %v1561_v55 = vmul.f32 %v1559_v10, %v4260_v21  ;;  %v1564_v46 = vmul.f32 %v1559_v10, %v1542_v36  ;;  %v1831_v1 = vmul.f32 %v1829_v39, %v3407_v49 }
 0x5bf   : > { %v4410_v9 = vadd.f32 %v1660_v43, %v1656_v12  ;;  %v4412_v61 = vadd.f32 %v1661_v32, %v1657_v16  ;;  %v1832_v23 = vadd.f32 %v1830_v53, %v1827_v40  ;;  %v1861_v58 = vstv %s4471_s16  ;;  %s4714_s16 = sld [smem:[#allocation8 + $0x703]] }
 0x5c0   : > { %v4415_v2 = vadd.f32 %v1560_v3, %v4301_v8  ;;  %v4418_v20 = vadd.f32 %v1561_v55, %v4304_v14  ;;  %v4421_v31 = vadd.f32 %v1564_v46, %v4307_v56  ;;  %v1700_v56 = vmul.f32 %v1699_v17, %v3414_v51 }
 0x5c1   : > { %v1664_v21 = vadd.f32 %v4412_v61, %v4410_v9  ;;  %v1667_v36 = vmul.f32 %v4410_v9, %v4410_v9  ;;  %v1668_v38 = vmul.f32 %v4412_v61, %v4412_v61  ;;  %v1862_v32 = vmul.f32 %v1861_v58, %v3460_v19 }
 0x5c2   : > { %v1702_v60 = vadd.f32 %v1700_v56, %v1697_v27  ;;  %v1833_v12 = vadd.f32 %v1831_v1, %v1827_v40  ;;  %v1857_v46 = vmul.f32 %v1855_v5, %v3436_v63  ;;  %v1957_v56 = vstv %s2814_s17  ;;  %s2811_s17 = sld [smem:[#allocation8 + $0x587]] }
 0x5c3   : > { %v1713_v8 = vpop.permute.xlu1 %1712  ;;  %1665 = vadd.xlane.f32.xlu2 %v1664_v21  ;;  %v1669_v14 = vadd.f32 %v1668_v38, %v1667_v36  ;;  %v1959_v38 = vstv %s2815_s8  ;;  %v1991_v39 = vstv %s4487_s28  ;;  %s2830_s8 = sld [smem:[#allocation8 + $0x684]] }
 0x5c4   : > { %v1992_v53 = vmul.f32 %v1991_v39, %v3460_v19  ;;  %s4760_s28 = sld [smem:[#allocation8 + $0x783]] }
 0x5c5   : > { %1670 = vadd.xlane.f32.xlu0 %v1669_v14  ;;  %v1960_v14 = vmul.f32 %v1959_v38, %v3414_v51 }
 0x5cb   : > { %v4441_v29 = vpop.permute.xlu1 %1714 }
 0x5cc   : > { %v1718_v37 = vsel %vm415_vm6, %v1713_v8, %v4441_v29 }
 0x5cd   : > { %v1722_v45 = vadd.f32 %v1718_v37, %v1702_v60  ;;  %v1962_v60 = vadd.f32 %v1960_v14, %v1957_v56  ;;  %v1985_v37 = vstv %s2817_s30  ;;  %v1733_v14 = vmul.f32 %v1731_v18, %v3452_v15  ;;  %s2841_s30 = sld [smem:[#allocation8 + $0x704]] }
 0x5cf   : > { %v1728_v57 = vadd.f32 %v1726_v62, %v1722_v45 }
 0x5d1   : > { %v4452_v22 = vadd.f32 %v1732_v47, %v1728_v57  ;;  %v1986_v57 = vmul.f32 %v1985_v37, %v3443_v6 }
 0x5d3   : > { %v4454_v34 = vpop.permute.xlu1 %1716 }
 0x5d9   : > { %1776 = vrot.lane.b32.xlu0 %v1770_v0, %s3171_s6  ;;  %v1961_v0 = vmul.f32 %v1959_v38, %v3407_v49 }
 0x5db   : > { %v4461_v26 = vpop.permute.xlu1 %1744  ;;  %1746 = vrot.lane.b32.xlu2 %v1739_v54, %s3170_s14 }
 0x5e3   : > { %v4464_v7 = vpop.permute.xlu1 %1748 }
 0x5eb   : > { %v4466_v50 = vpop.permute.xlu1 %1778 }
 0x5f3   : > { %v4468_v30 = vpop.permute.xlu1 %1780 }
 0x5fb   : > { %v1843_v35 = vpop.permute.xlu1 %1842 }
 0x603   : > { %v1845_v11 = vpop.permute.xlu1 %1844 }
 0x604   : > { %v1848_v13 = vsel %vm415_vm6, %v1843_v35, %v1845_v11  ;;  %v1963_v35 = vadd.f32 %v1961_v0, %v1957_v56 }
 0x605   : > { %v1852_v10 = vadd.f32 %v1848_v13, %v1832_v23 }
 0x607   : > { %v1858_v43 = vadd.f32 %v1856_v52, %v1852_v10  ;;  %v1701_v10 = vmul.f32 %v1699_v17, %v3407_v49  ;;  %v1727_v17 = vmul.f32 %v1725_v24, %v3436_v63 }
 0x609   : > { %v4480_v16 = vadd.f32 %v1862_v32, %v1858_v43  ;;  %v1703_v1 = vadd.f32 %v1701_v10, %v1697_v27  ;;  %v1719_v43 = vsel %vm415_vm6, %v4441_v29, %v4454_v34  ;;  %v4510_v32 = vstv %s2827_s7  ;;  %s2822_s7 = sld [smem:[#allocation8 + $0x607]] }
 0x60b   : > { %v1847_v3 = vpop.permute.xlu1 %1846 }
 0x60c   : > { %v1849_v55 = vsel %vm415_vm6, %v1845_v11, %v1847_v3  ;;  %v1987_v11 = vmul.f32 %v1985_v37, %v3436_v63 }
 0x60d   : > { %v1853_v21 = vadd.f32 %v1849_v55, %v1833_v12  ;;  %v1723_v12 = vadd.f32 %v1719_v43, %v1703_v1  ;;  %v2098_v55 = vmul.f32 %v4313_v48, %v4510_v32 }
 0x60f   : > { %v4484_v36 = vadd.f32 %v1857_v46, %v1853_v21  ;;  %2106 = vrot.lane.b32.xlu1 %v2098_v55, %s3169_s12  ;;  %v4522_v21 = vstv %s2808_s1  ;;  %v1729_v38 = vadd.f32 %v1727_v17, %v1723_v12  ;;  %s2852_s1 = sld [smem:[#allocation8 + $0x784]] }
 0x610   : > { %v1868_v56 = vmul.f32 %v4297_v44, %v4522_v21 }
 0x611   : > { %v1735_v37 = vadd.f32 %v1733_v14, %v1729_v38  ;;  %v1688_v14 = vstv %s2791_s29  ;;  %s2828_s29 = sld [smem:[#allocation8 + $0x682]] }
 0x613   : > { %v1973_v8 = vpop.permute.xlu1 %1972 }
 0x617   : > { %1874 = vrot.lane.b32.xlu1 %v1868_v56, %s3170_s14 }
 0x61b   : > { %v1975_v62 = vpop.permute.xlu1 %1974 }
 0x61c   : > { %v1978_v45 = vsel %vm415_vm6, %v1973_v8, %v1975_v62 }
 0x61d   : > { %v1982_v47 = vadd.f32 %v1978_v45, %v1962_v60  ;;  %v1757_v60 = vstv %s2798_s10  ;;  %v1763_v45 = vstv %s2799_s27  ;;  %s2833_s10 = sld [smem:[#allocation8 + $0x687]] }
 0x61e   : > { %v1758_v0 = vmul.f32 %v1757_v60, %v3476_v28  ;;  %v1759_v18 = vmul.f32 %v1757_v60, %v3468_v25  ;;  %s2844_s27 = sld [smem:[#allocation8 + $0x707]] }
 0x61f   : > { %v1988_v54 = vadd.f32 %v1986_v57, %v1982_v47 }
 0x621   : > { %v4496_v23 = vadd.f32 %v1992_v53, %v1988_v54  ;;  %v1765_v53 = vmul.f32 %v1763_v45, %v3490_v41 }
 0x623   : > { %v1977_v40 = vpop.permute.xlu1 %1976 }
 0x624   : > { %v1979_v5 = vsel %vm415_vm6, %v1975_v62, %v1977_v40 }
 0x625   : > { %v1983_v13 = vadd.f32 %v1979_v5, %v1963_v35 }
 0x627   : > { %v4500_v52 = vadd.f32 %v1987_v11, %v1983_v13  ;;  %v1764_v11 = vmul.f32 %v1763_v45, %v3496_v42 }
 0x636   : > { %v1666_v3 = vpop.xlane.xlu2 %1665 }
 0x637   : > { %v4514_v46 = vmul.f32 0.00390625, %v1666_v3  ;;  %v1870_v3 = vmul.f32 %v4313_v48, %v4522_v21 }
 0x638   : > { %v1671_v27 = vpop.xlane.xlu0 %1670 }
 0x639   : > { %v1674_v29 = vmul.f32 %v4514_v46, %v4514_v46  ;;  %v1673_v34 = vmul.f32 0.00390625, %v1671_v27  ;;  %1878 = vrot.lane.b32.xlu1 %v1870_v3, %s3170_s14  ;;  %v2029_v3 = vstv %s2822_s7  ;;  %s2820_s7 = sld [smem:[#allocation8 + $0x605]] }
 0x63b   : > { %v1675_v8 = vsub.f32 %v1673_v34, %v1674_v29 }
 0x63d   : > { %v1677_v24 = vadd.f32 1e-05, %v1675_v8 }
 0x63e   : > { %v1747_v62 = vpop.permute.xlu2 %1746 }
 0x63f   : > { %2974 = vrsqrt.f32 %v1677_v24  ;;  %v1750_v57 = vsel %vm448_vm9, %v4461_v26, %v1747_v62  ;;  %v1751_v47 = vsel %vm448_vm9, %v1747_v62, %v4464_v7  ;;  %v1783_v26 = vsel %vm481_vm11, %v4466_v50, %v4468_v30 }
 0x640   : > { %v1754_v54 = vadd.f32 %v1750_v57, %v4452_v22  ;;  %v1755_v35 = vadd.f32 %v1751_v47, %v1735_v37  ;;  %v1789_v7 = vstv %s4524_s19  ;;  %vm1684_vm14 = vweird.f32 %v1677_v24  ;;  %s2825_s19 = sld [smem:[#allocation9 + $0xd]] }
 0x641   : > { %v1791_v12 = vmul.f32 %v1789_v7, %v3506_v59  ;;  %v1790_v38 = vmul.f32 %v1789_v7, %v3514_v33  ;;  %v2225_v37 = vstv %s2838_s9  ;;  %v1869_v7 = vmul.f32 %v4328_v4, %v4522_v21  ;;  %s4654_s9 = sld [smem:[#allocation8 + $0x683]] }
 0x642   : > { %v1760_v40 = vadd.f32 %v1758_v0, %v1754_v54  ;;  %v1761_v5 = vadd.f32 %v1759_v18, %v1755_v35  ;;  %v2228_v45 = vmul.f32 %v4313_v48, %v2225_v37 }
 0x644   : > { %v1767_v13 = vadd.f32 %v1765_v53, %v1761_v5  ;;  %v1766_v10 = vadd.f32 %v1764_v11, %v1760_v40  ;;  %2236 = vrot.lane.b32.xlu1 %v2228_v45, %s3169_s12  ;;  %v1997_v11 = vstv %s2819_s11  ;;  %v2289_v45 = vstv %s2844_s27  ;;  %s4656_s11 = sld [smem:[#allocation8 + $0x585]] }
 0x645   : > { %v2975_v1 = vpop.eup %2974  ;;  %s4732_s27 = sld [smem:[#allocation9 + $0xf]] }
 0x646   : > { %v1679_v43 = vmul.f32 %v2975_v1, %v1677_v24  ;;  %v1787_v22 = vadd.f32 %v1783_v26, %v1767_v13  ;;  %vm1685_vm13 = vweird.f32 %v2975_v1  ;;  %v2096_v26 = vmul.f32 %v4297_v44, %v4510_v32 }
 0x647   : > { %vm1686_vm15 = vmor %vm1684_vm14, %vm1685_vm13  ;;  %v1899_v13 = vstv %s2811_s17  ;;  %s4663_s17 = sld [smem:[#allocation8 + $0x586]] }
 0x648   : > { %v1680_v55 = vmul.f32 %v2975_v1, %v1679_v43  ;;  %v4548_v17 = vadd.f32 %v1791_v12, %v1787_v22  ;;  %v2227_v43 = vmul.f32 %v4328_v4, %v2225_v37  ;;  %v1998_v22 = vmul.f32 %v4297_v44, %v1997_v11 }
 0x649   : > { %v1999_v12 = vmul.f32 %v4328_v4, %v1997_v11 }
 0x64a   : > { %v1681_v27 = vmul.f32 0.5, %v1680_v55  ;;  %v1798_v0 = vmul.f32 %v4548_v17, %v4548_v17  ;;  %v2032_v55 = vmul.f32 %v4313_v48, %v2029_v3 }
 0x64b   : > { %v1777_v30 = vpop.permute.xlu0 %1776 }
 0x64c   : > { %v1682_v29 = vsub.f32 1.5, %v1681_v27  ;;  %v1782_v34 = vsel %vm481_vm11, %v1777_v30, %v4466_v50 }
 0x64d   : > { %v1786_v8 = vadd.f32 %v1782_v34, %v1766_v10  ;;  %v1902_v10 = vmul.f32 %v4313_v48, %v1899_v13 }
 0x64e   : > { %v1683_v56 = vmul.f32 %v2975_v1, %v1682_v29  ;;  %v2387_v29 = vstv %s2852_s1  ;;  %s4721_s1 = sld [smem:[#allocation8 + $0x780]] }
 0x64f   : > { %v4554_v60 = vadd.f32 %v1790_v38, %v1786_v8  ;;  %v2390_v34 = vmul.f32 %v4313_v48, %v2387_v29 }
 0x650   : > { %v1687_v62 = vsel %vm1686_vm15, %v2975_v1, %v1683_v56  ;;  %v2226_v1 = vmul.f32 %v4297_v44, %v2225_v37  ;;  %v1900_v37 = vmul.f32 %v4297_v44, %v1899_v13 }
 0x651   : > { %v1689_v57 = vmul.f32 %v1688_v14, %v1687_v62  ;;  %v1794_v47 = vadd.f32 %v4548_v17, %v4554_v60  ;;  %v1797_v50 = vmul.f32 %v4554_v60, %v4554_v60  ;;  %v2159_v14 = vstv %s2833_s10  ;;  %s2821_s10 = sld [smem:[#allocation8 + $0x606]] }
 0x652   : > { %v2162_v56 = vmul.f32 %v4313_v48, %v2159_v14  ;;  %v1901_v62 = vmul.f32 %v4328_v4, %v1899_v13 }
 0x653   : > { %v1690_v24 = vmul.f32 %v1689_v57, %v4410_v9  ;;  %v1691_v18 = vmul.f32 %v1689_v57, %v4412_v61  ;;  %v1694_v54 = vmul.f32 %v1689_v57, %v4514_v46  ;;  %1795 = vadd.xlane.f32.xlu0 %v1794_v47  ;;  %v1799_v35 = vadd.f32 %v1798_v0, %v1797_v50 }
 0x654   : > { %v2000_v9 = vmul.f32 %v4313_v48, %v1997_v11  ;;  %v2355_v61 = vstv %s2849_s13  ;;  %v2292_v57 = vmul.f32 %v4313_v48, %v2289_v45  ;;  %v2030_v0 = vmul.f32 %v4297_v44, %v2029_v3  ;;  %s4658_s13 = sld [smem:[#allocation10 + $0xa]] }
 0x655   : > { %v4568_v53 = vadd.f32 %v1690_v24, %v4415_v2  ;;  %v4571_v40 = vadd.f32 %v1691_v18, %v4418_v20  ;;  %v4574_v5 = vadd.f32 %v1694_v54, %v4421_v31  ;;  %1800 = vadd.xlane.f32.xlu2 %v1799_v35  ;;  %v2358_v46 = vmul.f32 %v4313_v48, %v2355_v61 }
 0x656   : > { %2008 = vrot.lane.b32.xlu1 %v2000_v9, %s3170_s14  ;;  %v2097_v2 = vmul.f32 %v4328_v4, %v4510_v32  ;;  %v2127_v20 = vstv %s2830_s8  ;;  %v2257_v32 = vstv %s2841_s30  ;;  %v2356_v27 = vmul.f32 %v4297_v44, %v2355_v61  ;;  %s4661_s8 = sld [smem:[#allocation8 + $0x700]] }
 0x657   : > { %v2130_v31 = vmul.f32 %v4313_v48, %v2127_v20  ;;  %v2260_v21 = vmul.f32 %v4313_v48, %v2257_v32  ;;  %v2357_v30 = vmul.f32 %v4328_v4, %v2355_v61  ;;  %v2128_v38 = vmul.f32 %v4297_v44, %v2127_v20  ;;  %s4687_s30 = sld [smem:[#allocation8 + $0x702]] }
 0x658   : > { %v2129_v8 = vmul.f32 %v4328_v4, %v2127_v20  ;;  %v2258_v47 = vmul.f32 %v4297_v44, %v2257_v32  ;;  %v2259_v50 = vmul.f32 %v4328_v4, %v2257_v32  ;;  %v2031_v24 = vmul.f32 %v4328_v4, %v2029_v3 }
 0x659   : > { %v2388_v54 = vmul.f32 %v4297_v44, %v2387_v29  ;;  %v2389_v11 = vmul.f32 %v4328_v4, %v2387_v29  ;;  %v2161_v9 = vmul.f32 %v4328_v4, %v2159_v14  ;;  %v2291_v61 = vmul.f32 %v4328_v4, %v2289_v45 }
 0x65e   : > { %2366 = vrot.lane.b32.xlu1 %v2358_v46, %s3169_s12 }
 0x666   : > { %2138 = vrot.lane.b32.xlu1 %v2130_v31, %s3170_s14 }
 0x667   : > { %2104 = vrot.lane.b32.xlu0 %v2097_v2, %s3169_s12 }
 0x66d   : > { %2102 = vrot.lane.b32.xlu2 %v2096_v26, %s3169_s12 }
 0x66e   : > { %1910 = vrot.lane.b32.xlu1 %v1902_v10, %s3171_s6 }
 0x66f   : > { %1876 = vrot.lane.b32.xlu0 %v1869_v7, %s3170_s14 }
 0x675   : > { %2232 = vrot.lane.b32.xlu2 %v2226_v1, %s3169_s12  ;;  %v2290_v1 = vmul.f32 %v4297_v44, %v2289_v45 }
 0x676   : > { %2268 = vrot.lane.b32.xlu1 %v2260_v21, %s3170_s14 }
 0x677   : > { %2234 = vrot.lane.b32.xlu0 %v2227_v43, %s3169_s12 }
 0x67d   : > { %2004 = vrot.lane.b32.xlu2 %v1998_v22, %s3170_s14 }
 0x67e   : > { %2040 = vrot.lane.b32.xlu1 %v2032_v55, %s3171_s6  ;;  %v2087_v55 = vstv %s2825_s19  ;;  %s2832_s19 = sld [smem:[#allocation8 + $0x686]] }
 0x67f   : > { %2006 = vrot.lane.b32.xlu0 %v1999_v12, %s3170_s14 }
 0x681   : > { %v2107_v2 = vpop.permute.xlu1 %2106 }
 0x685   : > { %2362 = vrot.lane.b32.xlu2 %v2356_v27, %s3169_s12 }
 0x686   : > { %2398 = vrot.lane.b32.xlu1 %v2390_v34, %s3170_s14 }
 0x687   : > { %2364 = vrot.lane.b32.xlu0 %v2357_v30, %s3169_s12  ;;  %s2855_s12 = sld [smem:[#allocation8 + $0x787]] }
 0x689   : > { %v1875_v43 = vpop.permute.xlu1 %1874 }
 0x68d   : > { %2134 = vrot.lane.b32.xlu2 %v2128_v38, %s3170_s14  ;;  %v2419_v18 = vstv %s2855_s12  ;;  %s4744_s12 = sld [smem:[#allocation8 + $0x782]] }
 0x68e   : > { %2170 = vrot.lane.b32.xlu1 %v2162_v56, %s3171_s6  ;;  %v2422_v35 = vmul.f32 %v4313_v48, %v2419_v18  ;;  %v2421_v46 = vmul.f32 %v4328_v4, %v2419_v18  ;;  %v2160_v48 = vmul.f32 %v4297_v44, %v2159_v14  ;;  %v2420_v3 = vmul.f32 %v4297_v44, %v2419_v18 }
 0x68f   : > { %2136 = vrot.lane.b32.xlu0 %v2129_v8, %s3170_s14  ;;  %v2115_v14 = vstv %s2828_s29  ;;  %v2121_v18 = vstv %s4654_s9  ;;  %s4783_s29 = sld [smem:[#allocation8 + $0x588]] }
 0x690   : > { %s4808_s9 = sld [smem:[#allocation8 + $0x705]] }
 0x695   : > { %1906 = vrot.lane.b32.xlu2 %v1900_v37, %s3171_s6 }
 0x696   : > { %2300 = vrot.lane.b32.xlu1 %v2292_v57, %s3171_s6  ;;  %v2116_v57 = vmul.f32 %v2115_v14, %v3443_v6 }
 0x697   : > { %1908 = vrot.lane.b32.xlu0 %v1901_v62, %s3171_s6 }
 0x69d   : > { %2264 = vrot.lane.b32.xlu2 %v2258_v47, %s3170_s14  ;;  %v2117_v47 = vmul.f32 %v2115_v14, %v3436_v63 }
 0x69e   : > { %2430 = vrot.lane.b32.xlu1 %v2422_v35, %s3171_s6 }
 0x69f   : > { %2266 = vrot.lane.b32.xlu0 %v2259_v50, %s3170_s14 }
 0x6a5   : > { %2036 = vrot.lane.b32.xlu2 %v2030_v0, %s3171_s6 }
 0x6a7   : > { %2038 = vrot.lane.b32.xlu0 %v2031_v24, %s3171_s6 }
 0x6ab   : > { %v1879_v30 = vpop.permute.xlu1 %1878 }
 0x6ad   : > { %2394 = vrot.lane.b32.xlu2 %v2388_v54, %s3170_s14 }
 0x6af   : > { %2396 = vrot.lane.b32.xlu0 %v2389_v11, %s3170_s14  ;;  %s2826_s14 = sld [smem:[#allocation8 + $0x680]] }
 0x6b5   : > { %2166 = vrot.lane.b32.xlu2 %v2160_v48, %s3171_s6  ;;  %v2089_v21 = vstv %s2826_s14  ;;  %v1887_v48 = vstv %s4656_s11  ;;  %s2831_s14 = sld [smem:[#allocation8 + $0x685]] }
 0x6b6   : > { %v2090_v22 = vmul.f32 %v2089_v21, %v3414_v51  ;;  %v2091_v12 = vmul.f32 %v2089_v21, %v3407_v49  ;;  %v4674_v11 = vpop.permute.xlu1 %2236  ;;  %v1893_v21 = vstv %s4663_s17  ;;  %s4810_s11 = sld [smem:[#allocation8 + $0x706]] }
 0x6b7   : > { %2168 = vrot.lane.b32.xlu0 %v2161_v9, %s3171_s6  ;;  %v2122_v9 = vmul.f32 %v2121_v18, %v3460_v19  ;;  %v1895_v14 = vmul.f32 %v1893_v21, %v3490_v41  ;;  %s4863_s17 = sld [smem:[#allocation8 + $0x786]] }
 0x6b8   : > { %v2092_v34 = vadd.f32 %v2090_v22, %v2087_v55  ;;  %v2093_v38 = vadd.f32 %v2091_v12, %v2087_v55 }
 0x6bd   : > { %2296 = vrot.lane.b32.xlu2 %v2290_v1, %s3171_s6  ;;  %v1888_v1 = vmul.f32 %v1887_v48, %v3476_v28 }
 0x6bf   : > { %2298 = vrot.lane.b32.xlu0 %v2291_v61, %s3171_s6  ;;  %v1818_v61 = vstv %s4658_s13  ;;  %s4835_s13 = sld [smem:[#allocation8 + $0x608]] }
 0x6c5   : > { %2426 = vrot.lane.b32.xlu2 %v2420_v3, %s3171_s6 }
 0x6c6   : > { %v1796_v20 = vpop.xlane.xlu0 %1795 }
 0x6c7   : > { %v4643_v31 = vmul.f32 0.00390625, %v1796_v20  ;;  %2428 = vrot.lane.b32.xlu0 %v2421_v46, %s3171_s6  ;;  %s4669_s6 = sld [smem:[#allocation9 + $0xe]] }
 0x6c8   : > { %v1801_v26 = vpop.xlane.xlu2 %1800 }
 0x6c9   : > { %v1804_v7 = vmul.f32 %v4643_v31, %v4643_v31  ;;  %v1803_v13 = vmul.f32 0.00390625, %v1801_v26 }
 0x6cb   : > { %v1805_v10 = vsub.f32 %v1803_v13, %v1804_v7  ;;  %v1863_v7 = vmul.f32 %v1861_v58, %v3452_v15 }
 0x6cd   : > { %v1807_v4 = vadd.f32 1e-05, %v1805_v10 }
 0x6cf   : > { %2976 = vrsqrt.f32 %v1807_v4  ;;  %vm1814_vm1 = vweird.f32 %v1807_v4 }
 0x6d0   : > { %v2103_v32 = vpop.permute.xlu2 %2102 }
 0x6d5   : > { %v2977_v27 = vpop.eup %2976 }
 0x6d6   : > { %v1809_v29 = vmul.f32 %v2977_v27, %v1807_v4  ;;  %vm1815_vm0 = vweird.f32 %v2977_v27  ;;  %v1865_v4 = vadd.f32 %v1863_v7, %v4484_v36 }
 0x6d7   : > { %vm1816_vm2 = vmor %vm1814_vm1, %vm1815_vm0 }
 0x6d8   : > { %v1810_v8 = vmul.f32 %v2977_v27, %v1809_v29  ;;  %v2233_v44 = vpop.permute.xlu2 %2232 }
 0x6d9   : > { %v2105_v56 = vpop.permute.xlu0 %2104 }
 0x6da   : > { %v1811_v37 = vmul.f32 0.5, %v1810_v8  ;;  %v2108_v62 = vsel %vm415_vm6, %v2103_v32, %v2105_v56  ;;  %v2109_v45 = vsel %vm415_vm6, %v2105_v56, %v2107_v2  ;;  %v2219_v2 = vstv %s4661_s8  ;;  %s2853_s8 = sld [smem:[#allocation8 + $0x785]] }
 0x6db   : > { %v2112_v50 = vadd.f32 %v2108_v62, %v2092_v34  ;;  %v2113_v0 = vadd.f32 %v2109_v45, %v2093_v38  ;;  %v2220_v3 = vmul.f32 %v2219_v2, %v3414_v51  ;;  %v1889_v34 = vmul.f32 %v1887_v48, %v3468_v25 }
 0x6dc   : > { %v1812_v24 = vsub.f32 1.5, %v1811_v37  ;;  %v2217_v38 = vstv %s4669_s6  ;;  %s2834_s6 = sld [smem:[#allocation8 + $0x688]] }
 0x6dd   : > { %v2118_v54 = vadd.f32 %v2116_v57, %v2112_v50  ;;  %v4672_v35 = vadd.f32 %v2117_v47, %v2113_v0  ;;  %v2222_v56 = vadd.f32 %v2220_v3, %v2217_v38 }
 0x6de   : > { %v1813_v46 = vmul.f32 %v2977_v27, %v1812_v24  ;;  %v2251_v24 = vstv %s4714_s16  ;;  %s2856_s16 = sld [smem:[#allocation8 + $0x788]] }
 0x6df   : > { %v4682_v20 = vadd.f32 %v2122_v9, %v2118_v54  ;;  %v1993_v54 = vmul.f32 %v1991_v39, %v3452_v15  ;;  %v2017_v9 = vstv %s2820_s7  ;;  %s4954_s7 = sld [smem:[#allocation10 + $0xb]] }
 0x6e0   : > { %v1817_v26 = vsel %vm1816_vm2, %v2977_v27, %v1813_v46  ;;  %v2005_v13 = vpop.permute.xlu2 %2004 }
 0x6e1   : > { %v1819_v10 = vmul.f32 %v1818_v61, %v1817_v26  ;;  %v1877_v32 = vpop.permute.xlu0 %1876  ;;  %v2349_v61 = vstv %s4721_s1  ;;  %v1995_v48 = vadd.f32 %v1993_v54, %v4500_v52  ;;  %s4958_s1 = sld [smem:[#allocation10 + $0xc]] }
 0x6e2   : > { %v1880_v22 = vsel %vm448_vm9, %v1875_v43, %v1877_v32  ;;  %v1881_v12 = vsel %vm448_vm9, %v1877_v32, %v1879_v30  ;;  %v1894_v43 = vmul.f32 %v1893_v21, %v3496_v42  ;;  %v2023_v32 = vstv %s2821_s10  ;;  %s4960_s10 = sld [smem:[#allocation10 + $0xd]] }
 0x6e3   : > { %v1820_v58 = vmul.f32 %v1819_v10, %v4554_v60  ;;  %v1821_v55 = vmul.f32 %v1819_v10, %v4548_v17  ;;  %v1824_v27 = vmul.f32 %v1819_v10, %v4643_v31  ;;  %v1884_v29 = vadd.f32 %v1880_v22, %v4480_v16  ;;  %v2009_v31 = vpop.permute.xlu1 %2008 }
 0x6e4   : > { %v1885_v36 = vadd.f32 %v1881_v12, %v1865_v4  ;;  %v2018_v10 = vmul.f32 %v2017_v9, %v3476_v28  ;;  %v2019_v21 = vmul.f32 %v2017_v9, %v3468_v25  ;;  %v2350_v52 = vmul.f32 %v2349_v61, %v3414_v51 }
 0x6e5   : > { %v4705_v30 = vadd.f32 %v1820_v58, %v4568_v53  ;;  %v4708_v8 = vadd.f32 %v1821_v55, %v4571_v40  ;;  %v4711_v60 = vadd.f32 %v1824_v27, %v4574_v5  ;;  %v1890_v17 = vadd.f32 %v1888_v1, %v1884_v29 }
 0x6e6   : > { %v1891_v16 = vadd.f32 %v1889_v34, %v1885_v36  ;;  %v2245_v40 = vstv %s4687_s30  ;;  %v2347_v12 = vstv %s4732_s27  ;;  %v2024_v27 = vmul.f32 %v2023_v32, %v3496_v42  ;;  %s2845_s30 = sld [smem:[#allocation8 + $0x708]] }
 0x6e7   : > { %v4718_v53 = vadd.f32 %v1894_v43, %v1890_v17  ;;  %v2246_v57 = vmul.f32 %v2245_v40, %v3443_v6  ;;  %v2375_v51 = vstv %s4744_s12  ;;  %s4962_s27 = sld [smem:[#allocation10 + $0xe]] }
 0x6e8   : > { %v2363_v37 = vpop.permute.xlu2 %2362  ;;  %v4723_v5 = vadd.f32 %v1895_v14, %v1891_v16  ;;  %s4973_s12 = sld [smem:[#allocation10 + $0xf]] }
 0x6e9   : > { %v4725_v62 = vpop.permute.xlu0 %2234 }
 0x6ea   : > { %v2238_v45 = vsel %vm415_vm6, %v2233_v44, %v4725_v62  ;;  %v2252_v44 = vmul.f32 %v2251_v24, %v3460_v19 }
 0x6eb   : > { %v2242_v47 = vadd.f32 %v2238_v45, %v2222_v56  ;;  %v4734_v0 = vpop.permute.xlu1 %2366  ;;  %v2381_v45 = vstv %s4760_s28  ;;  %s2478_s28 = sld [smem:[#allocation2]] }
 0x6ed   : > { %v2248_v50 = vadd.f32 %v2246_v57, %v2242_v47  ;;  %v2123_v57 = vmul.f32 %v2121_v18, %v3452_v15  ;;  %v2382_v47 = vmul.f32 %v2381_v45, %v3460_v19 }
 0x6ef   : > { %v4747_v7 = vadd.f32 %v2252_v44, %v2248_v50  ;;  %v2147_v50 = vstv %s2831_s14  ;;  %v2125_v54 = vadd.f32 %v2123_v57, %v4672_v35  ;;  %v2153_v44 = vstv %s2832_s19  ;;  %s2684_s14 = sshll.u32 %s3302_s24, 4  ;;  %s2865_s19 = sshll.u32 %s3229_s26, 4 }
 0x6f0   : > { %v2135_v46 = vpop.permute.xlu2 %2134  ;;  %v2148_v19 = vmul.f32 %v2147_v50, %v3476_v28  ;;  %v2154_v35 = vmul.f32 %v2153_v44, %v3496_v42 }
 0x6f1   : > { %v2007_v26 = vpop.permute.xlu0 %2006 }
 0x6f2   : > { %v2010_v39 = vsel %vm448_vm9, %v2005_v13, %v2007_v26  ;;  %v2011_v1 = vsel %vm448_vm9, %v2007_v26, %v2009_v31  ;;  %v2025_v13 = vmul.f32 %v2023_v32, %v3490_v41  ;;  %v2376_v31 = vmul.f32 %v2375_v51, %v3443_v6 }
 0x6f3   : > { %v2014_v4 = vadd.f32 %v2010_v39, %v4496_v23  ;;  %v2015_v22 = vadd.f32 %v2011_v1, %v1995_v48  ;;  %v2139_v55 = vpop.permute.xlu1 %2138  ;;  %v2352_v23 = vadd.f32 %v2350_v52, %v2347_v12  ;;  %v2149_v26 = vmul.f32 %v2147_v50, %v3468_v25 }
 0x6f4   : > { %v2351_v50 = vmul.f32 %v2349_v61, %v3407_v49 }
 0x6f5   : > { %v2020_v3 = vadd.f32 %v2018_v10, %v2014_v4  ;;  %v2021_v58 = vadd.f32 %v2019_v21, %v2015_v22  ;;  %v2239_v22 = vsel %vm415_vm6, %v4725_v62, %v4674_v11 }
 0x6f6   : > { %v2353_v61 = vadd.f32 %v2351_v50, %v2347_v12  ;;  %v2377_v12 = vmul.f32 %v2375_v51, %v3436_v63  ;;  %v2383_v51 = vmul.f32 %v2381_v45, %v3452_v15 }
 0x6f7   : > { %v4764_v29 = vadd.f32 %v2024_v27, %v2020_v3  ;;  %v4766_v34 = vadd.f32 %v2025_v13, %v2021_v58 }
 0x6f8   : > { %v1907_v17 = vpop.permute.xlu2 %1906 }
 0x6f9   : > { %v4769_v36 = vpop.permute.xlu0 %2364 }
 0x6fa   : > { %v2368_v43 = vsel %vm415_vm6, %v2363_v37, %v4769_v36  ;;  %v2221_v37 = vmul.f32 %v2219_v2, %v3407_v49 }
 0x6fb   : > { %v2372_v16 = vadd.f32 %v2368_v43, %v2352_v23  ;;  %v1911_v56 = vpop.permute.xlu1 %1910 }
 0x6fc   : > { %v2223_v1 = vadd.f32 %v2221_v37, %v2217_v38  ;;  %v2247_v38 = vmul.f32 %v2245_v40, %v3436_v63 }
 0x6fd   : > { %v2378_v14 = vadd.f32 %v2376_v31, %v2372_v16 }
 0x6fe   : > { %v2243_v58 = vadd.f32 %v2239_v22, %v2223_v1 }
 0x6ff   : > { %v4789_v9 = vadd.f32 %v2382_v47, %v2378_v14  ;;  %v2277_v47 = vstv %s4808_s9 }
 0x700   : > { %v2265_v2 = vpop.permute.xlu2 %2264  ;;  %v2249_v31 = vadd.f32 %v2247_v38, %v2243_v58 }
 0x701   : > { %v2137_v6 = vpop.permute.xlu0 %2136 }
 0x702   : > { %v2140_v48 = vsel %vm448_vm9, %v2135_v46, %v2137_v6  ;;  %v2141_v18 = vsel %vm448_vm9, %v2137_v6, %v2139_v55  ;;  %v2155_v46 = vmul.f32 %v2153_v44, %v3490_v41  ;;  %v2283_v44 = vstv %s4810_s11  ;;  %s2564_s11 = scalar_lea.hbm %s5034_s5, %s2865_s19 }
 0x703   : > { %v2144_v10 = vadd.f32 %v2140_v48, %v4682_v20  ;;  %v2145_v39 = vadd.f32 %v2141_v18, %v2125_v54  ;;  %v2269_v4 = vpop.permute.xlu1 %2268  ;;  %v1919_v20 = vstv %s4783_s29  ;;  %v2278_v18 = vmul.f32 %v2277_v47, %v3476_v28  ;;  %s2568_s26 = sshll.u32 %s2564_s11, 4  ;;  %s2569_s26 = int_to_ptr.hbm [resolvable:$true] %s2568_s26 }
 0x704   : > { %v1920_v62 = vmul.f32 %v1919_v20, %v3514_v33  ;;  %v1921_v13 = vmul.f32 %v1919_v20, %v3506_v59  ;;  %v2284_v49 = vmul.f32 %v2283_v44, %v3496_v42  ;;  %v2285_v1 = vmul.f32 %v2283_v44, %v3490_v41 }
 0x705   : > { %v2150_v32 = vadd.f32 %v2148_v19, %v2144_v10  ;;  %v2151_v21 = vadd.f32 %v2149_v26, %v2145_v39  ;;  %v2279_v19 = vmul.f32 %v2277_v47, %v3468_v25 }
 0x707   : > { %v4803_v52 = vadd.f32 %v2154_v35, %v2150_v32  ;;  %v4805_v3 = vadd.f32 %v2155_v46, %v2151_v21 }
 0x708   : > { %v2037_v40 = vpop.permute.xlu2 %2036 }
 0x709   : > { %v1909_v55 = vpop.permute.xlu0 %1908 }
 0x70a   : > { %v1912_v27 = vsel %vm481_vm11, %v1907_v17, %v1909_v55  ;;  %v1913_v11 = vsel %vm481_vm11, %v1909_v55, %v1911_v56  ;;  %v2253_v56 = vmul.f32 %v2251_v24, %v3452_v15 }
 0x70b   : > { %v1916_v23 = vadd.f32 %v1912_v27, %v4718_v53  ;;  %v1917_v43 = vadd.f32 %v1913_v11, %v4723_v5  ;;  %v2041_v5 = vpop.permute.xlu1 %2040 }
 0x70c   : > { %v2255_v37 = vadd.f32 %v2253_v56, %v2249_v31 }
 0x70d   : > { %v4821_v16 = vadd.f32 %v1920_v62, %v1916_v23  ;;  %v4823_v14 = vadd.f32 %v1921_v13, %v1917_v43  ;;  %v2407_v43 = vstv %s2853_s8 }
 0x70e   : > { %v2409_v15 = vmul.f32 %v2407_v43, %v3468_v25 }
 0x70f   : > { %v1924_v17 = vadd.f32 %v4823_v14, %v4821_v16  ;;  %v1927_v57 = vmul.f32 %v4821_v16, %v4821_v16  ;;  %v1928_v53 = vmul.f32 %v4823_v14, %v4823_v14 }
 0x711   : > { %1925 = vadd.xlane.f32.xlu2 %v1924_v17  ;;  %v2267_v54 = vpop.permute.xlu0 %2266  ;;  %v1929_v6 = vadd.f32 %v1928_v53, %v1927_v57  ;;  %v2413_v57 = vstv %s4863_s17  ;;  %v2408_v53 = vmul.f32 %v2407_v43, %v3476_v28  ;;  %s2553_s17 = scalar_lea.sflag [#allocation5], %s3302_s24 }
 0x712   : > { %v2270_v24 = vsel %vm448_vm9, %v2265_v2, %v2267_v54  ;;  %v2271_v48 = vsel %vm448_vm9, %v2267_v54, %v2269_v4  ;;  %v2369_v2 = vsel %vm415_vm6, %v4769_v36, %v4734_v0  ;;  %v2395_v4 = vpop.permute.xlu2 %2394  ;;  %v2415_v44 = vmul.f32 %v2413_v57, %v3490_v41 }
 0x713   : > { %v2274_v26 = vadd.f32 %v2270_v24, %v4747_v7  ;;  %v2275_v10 = vadd.f32 %v2271_v48, %v2255_v37  ;;  %1930 = vadd.xlane.f32.xlu0 %v1929_v6  ;;  %v2049_v7 = vstv %s4835_s13  ;;  %v2373_v46 = vadd.f32 %v2369_v2, %v2353_v61  ;;  %v2399_v20 = vpop.permute.xlu1 %2398  ;;  %s285_s13 = scalar_lea.vmem [#allocation12], %s2684_s14 }
 0x714   : > { %v2050_v0 = vmul.f32 %v2049_v7, %v3514_v33  ;;  %v2051_v36 = vmul.f32 %v2049_v7, %v3506_v59  ;;  %v2414_v6 = vmul.f32 %v2413_v57, %v3496_v42  ;;  %v2309_v7 = vstv %s2845_s30  ;;  %s2566_s8 = sshll.u32 %s285_s13, 4  ;;  %s2567_s8 = int_to_ptr.vmem [resolvable:$true] %s2566_s8 }
 0x715   : > { %v2280_v39 = vadd.f32 %v2278_v18, %v2274_v26  ;;  %v2281_v35 = vadd.f32 %v2279_v19, %v2275_v10  ;;  %v2379_v11 = vadd.f32 %v2377_v12, %v2373_v46  ;;  %v2179_v18 = vstv %s2834_s6  ;;  %s3093_s6 = sshra.s32 %s2569_s26, 4  ;;  %s3094_s6 = int_to_ptr.hbm [resolvable:$true] %s3093_s6 }
 0x716   : > { %v2181_v26 = vmul.f32 %v2179_v18, %v3506_v59  ;;  %s3095_s30 = scalar_lea.hbm %s3094_s6, 16  ;;  %p3100_p13 = scmp.lt.s32.totalorder %s3094_s6, %s5034_s5 }
 0x717   : > { %v4853_v32 = vadd.f32 %v2284_v49, %v2280_v39  ;;  %v4855_v21 = vadd.f32 %v2285_v1, %v2281_v35  ;;  %p3096_p1 = scmp.ne.s32.totalorder %s3094_s6, %s3095_s30 }
 0x719   : > { %v2039_v22 = vpop.permute.xlu0 %2038  ;;  %p3097_p3 = pnand %p3096_p1, %p3271_p0 }
 0x71a   : > { %v2042_v58 = vsel %vm481_vm11, %v2037_v40, %v2039_v22  ;;  %v2043_v55 = vsel %vm481_vm11, %v2039_v22, %v2041_v5  ;;  %v2167_v50 = vpop.permute.xlu2 %2166  ;;  %v2310_v22 = vmul.f32 %v2309_v7, %v3514_v33 }
 0x71b   : > { %v2046_v38 = vadd.f32 %v2042_v58, %v4764_v29  ;;  %v2047_v27 = vadd.f32 %v2043_v55, %v4766_v34  ;;  %v2385_v34 = vadd.f32 %v2383_v51, %v2379_v11  ;;  %v2171_v47 = vpop.permute.xlu1 %2170  ;;  %v2439_v51 = vstv %s2856_s16  ;;  %p3098_p4 = pneg %p3097_p3 }
 0x71c   : > { %v2440_v43 = vmul.f32 %v2439_v51, %v3514_v33 }
 0x71d   : > { %v4869_v62 = vadd.f32 %v2050_v0, %v2046_v38  ;;  %v4871_v13 = vadd.f32 %v2051_v36, %v2047_v27 }
 0x71f   : > { %v2054_v63 = vadd.f32 %v4871_v13, %v4869_v62  ;;  %v2057_v23 = vmul.f32 %v4869_v62, %v4869_v62  ;;  %v2058_v29 = vmul.f32 %v4871_v13, %v4871_v13 }
 0x721   : > { %2055 = vadd.xlane.f32.xlu1 %v2054_v63  ;;  %v2397_v31 = vpop.permute.xlu0 %2396  ;;  %v2059_v40 = vadd.f32 %v2058_v29, %v2057_v23 }
 0x722   : > { %v2400_v17 = vsel %vm448_vm9, %v2395_v4, %v2397_v31  ;;  %v2401_v56 = vsel %vm448_vm9, %v2397_v31, %v2399_v20  ;;  %v2297_v39 = vpop.permute.xlu2 %2296  ;;  %v2311_v20 = vmul.f32 %v2309_v7, %v3506_v59 }
 0x723   : > { %v2404_v45 = vadd.f32 %v2400_v17, %v4789_v9  ;;  %v2405_v5 = vadd.f32 %v2401_v56, %v2385_v34  ;;  %2060 = vadd.xlane.f32.xlu2 %v2059_v40  ;;  %v2180_v9 = vmul.f32 %v2179_v18, %v3514_v33  ;;  %v2301_v61 = vpop.permute.xlu1 %2300  ;;  %v2441_v34 = vmul.f32 %v2439_v51, %v3506_v59 }
 0x725   : > { %v2410_v37 = vadd.f32 %v2408_v53, %v2404_v45  ;;  %v2411_v54 = vadd.f32 %v2409_v15, %v2405_v5 }
 0x727   : > { %v2416_v24 = vadd.f32 %v2414_v6, %v2410_v37  ;;  %v2417_v48 = vadd.f32 %v2415_v44, %v2411_v54 }
 0x729   : > { %v2169_v19 = vpop.permute.xlu0 %2168 }
 0x72a   : > { %v2172_v28 = vsel %vm481_vm11, %v2167_v50, %v2169_v19  ;;  %v2173_v25 = vsel %vm481_vm11, %v2169_v19, %v2171_v47  ;;  %v2427_v38 = vpop.permute.xlu2 %2426 }
 0x72b   : > { %v2176_v10 = vadd.f32 %v2172_v28, %v4803_v52  ;;  %v2177_v49 = vadd.f32 %v2173_v25, %v4805_v3  ;;  %v2431_v36 = vpop.permute.xlu1 %2430 }
 0x72d   : > { %v4896_v42 = vadd.f32 %v2180_v9, %v2176_v10  ;;  %v4898_v41 = vadd.f32 %v2181_v26, %v2177_v49 }
 0x72f   : > { %v2184_v35 = vadd.f32 %v4898_v41, %v4896_v42  ;;  %v2187_v1 = vmul.f32 %v4896_v42, %v4896_v42  ;;  %v2188_v2 = vmul.f32 %v4898_v41, %v4898_v41 }
 0x731   : > { %2185 = vadd.xlane.f32.xlu0 %v2184_v35  ;;  %v2299_v52 = vpop.permute.xlu0 %2298  ;;  %v2189_v3 = vadd.f32 %v2188_v2, %v2187_v1 }
 0x732   : > { %v2302_v4 = vsel %vm481_vm11, %v2297_v39, %v2299_v52  ;;  %v2303_v46 = vsel %vm481_vm11, %v2299_v52, %v2301_v61 }
 0x733   : > { %v2306_v12 = vadd.f32 %v2302_v4, %v4853_v32  ;;  %v2307_v58 = vadd.f32 %v2303_v46, %v4855_v21  ;;  %2190 = vadd.xlane.f32.xlu2 %v2189_v3 }
 0x735   : > { %v4912_v55 = vadd.f32 %v2310_v22, %v2306_v12  ;;  %v4914_v0 = vadd.f32 %v2311_v20, %v2307_v58 }
 0x737   : > { %v2314_v27 = vadd.f32 %v4914_v0, %v4912_v55  ;;  %v2317_v11 = vmul.f32 %v4912_v55, %v4912_v55  ;;  %v2318_v63 = vmul.f32 %v4914_v0, %v4914_v0 }
 0x739   : > { %2315 = vadd.xlane.f32.xlu1 %v2314_v27  ;;  %v2429_v32 = vpop.permute.xlu0 %2428  ;;  %v2319_v21 = vadd.f32 %v2318_v63, %v2317_v11 }
 0x73a   : > { %v2432_v23 = vsel %vm481_vm11, %v2427_v38, %v2429_v32  ;;  %v2433_v29 = vsel %vm481_vm11, %v2429_v32, %v2431_v36 }
 0x73b   : > { %v2436_v31 = vadd.f32 %v2432_v23, %v2416_v24  ;;  %v2437_v40 = vadd.f32 %v2433_v29, %v2417_v48  ;;  %2320 = vadd.xlane.f32.xlu0 %v2319_v21 }
 0x73d   : > { %v4926_v17 = vadd.f32 %v2440_v43, %v2436_v31  ;;  %v4928_v56 = vadd.f32 %v2441_v34, %v2437_v40 }
 0x73f   : > { %v2444_v57 = vadd.f32 %v4928_v56, %v4926_v17  ;;  %v2447_v53 = vmul.f32 %v4926_v17, %v4926_v17  ;;  %v2448_v15 = vmul.f32 %v4928_v56, %v4928_v56 }
 0x741   : > { %2445 = vadd.xlane.f32.xlu2 %v2444_v57  ;;  %v2449_v33 = vadd.f32 %v2448_v15, %v2447_v53 }
 0x743   : > { %2450 = vadd.xlane.f32.xlu1 %v2449_v33 }
 0x784   : > { %v1926_v59 = vpop.xlane.xlu2 %1925 }
 0x785   : > { %v4936_v45 = vmul.f32 0.00390625, %v1926_v59 }
 0x786   : > { %v1931_v5 = vpop.xlane.xlu0 %1930 }
 0x787   : > { %v1934_v50 = vmul.f32 %v4936_v45, %v4936_v45  ;;  %v1933_v37 = vmul.f32 0.00390625, %v1931_v5 }
 0x789   : > { %v1935_v48 = vsub.f32 %v1933_v37, %v1934_v50  ;;  %v1948_v50 = vstv %s4954_s7 }
 0x78b   : > { %v1937_v19 = vadd.f32 1e-05, %v1935_v48 }
 0x78d   : > { %2978 = vrsqrt.f32 %v1937_v19  ;;  %vm1944_vm9 = vweird.f32 %v1937_v19 }
 0x793   : > { %v2979_v10 = vpop.eup %2978 }
 0x794   : > { %v2056_v47 = vpop.xlane.xlu1 %2055  ;;  %v1939_v1 = vmul.f32 %v2979_v10, %v1937_v19  ;;  %vm1945_vm6 = vweird.f32 %v2979_v10 }
 0x795   : > { %v4940_v54 = vmul.f32 0.00390625, %v2056_v47  ;;  %vm1946_vm3 = vmor %vm1944_vm9, %vm1945_vm6 }
 0x796   : > { %v2061_v6 = vpop.xlane.xlu2 %2060  ;;  %v1940_v4 = vmul.f32 %v2979_v10, %v1939_v1 }
 0x797   : > { %v2064_v44 = vmul.f32 %v4940_v54, %v4940_v54  ;;  %v2063_v24 = vmul.f32 0.00390625, %v2061_v6 }
 0x798   : > { %v1941_v36 = vmul.f32 0.5, %v1940_v4 }
 0x799   : > { %v2065_v18 = vsub.f32 %v2063_v24, %v2064_v44  ;;  %v2078_v24 = vstv %s4958_s1  ;;  %s3099_s1 = scalar_lea.hbm %s5034_s5, 32 }
 0x79a   : > { %v1942_v21 = vsub.f32 1.5, %v1941_v36  ;;  %p3101_p8 = scmp.lt.s32.totalorder %s3099_s1, %s3095_s30 }
 0x79b   : > { %v2067_v28 = vadd.f32 1e-05, %v2065_v18 }
 0x79c   : > { %v1943_v53 = vmul.f32 %v2979_v10, %v1942_v21  ;;  %v2468_v21 = vstv %s4973_s12  ;;  %p3102_p7 = por %p3101_p8, %p3100_p13 }
 0x79d   : > { %2980 = vrsqrt.f32 %v2067_v28  ;;  %vm2074_vm4 = vweird.f32 %v2067_v28 }
 0x79e   : > { %v1947_v37 = vsel %vm1946_vm3, %v2979_v10, %v1943_v53  ;;  %p3103_p9 = pnand %p3102_p7, %p3098_p4 }
 0x7a3   : > { %v2981_v39 = vpop.eup %2980 }
 0x7a4   : > { %v2186_v25 = vpop.xlane.xlu0 %2185  ;;  %v2069_v7 = vmul.f32 %v2981_v39, %v2067_v28  ;;  %vm2075_vm11 = vweird.f32 %v2981_v39 }
 0x7a5   : > { %v4944_v9 = vmul.f32 0.00390625, %v2186_v25  ;;  %vm2076_vm5 = vmor %vm2074_vm4, %vm2075_vm11  ;;  %v1949_v25 = vmul.f32 %v1948_v50, %v1947_v37 }
 0x7a6   : > { %v2191_v26 = vpop.xlane.xlu2 %2190  ;;  %v2070_v12 = vmul.f32 %v2981_v39, %v2069_v7 }
 0x7a7   : > { %v2194_v49 = vmul.f32 %v4944_v9, %v4944_v9  ;;  %v2193_v61 = vmul.f32 0.00390625, %v2191_v26  ;;  %v1950_v1 = vmul.f32 %v1949_v25, %v4821_v16  ;;  %v1954_v7 = vmul.f32 %v1949_v25, %v4936_v45 }
 0x7a8   : > { %v2071_v11 = vmul.f32 0.5, %v2070_v12 }
 0x7a9   : > { %v2195_v35 = vsub.f32 %v2193_v61, %v2194_v49  ;;  %v2208_v61 = vstv %s4960_s10 }
 0x7aa   : > { %v2072_v31 = vsub.f32 1.5, %v2071_v11 }
 0x7ab   : > { %v2197_v2 = vadd.f32 1e-05, %v2195_v35 }
 0x7ac   : > { %v2316_v52 = vpop.xlane.xlu1 %2315  ;;  %v2073_v5 = vmul.f32 %v2981_v39, %v2072_v31 }
 0x7ad   : > { %2982 = vrsqrt.f32 %v2197_v2  ;;  %v4948_v3 = vmul.f32 0.00390625, %v2316_v52  ;;  %vm2204_vm8 = vweird.f32 %v2197_v2  ;;  %v2338_v52 = vstv %s4962_s27 }
 0x7ae   : > { %v2321_v46 = vpop.xlane.xlu0 %2320  ;;  %v2077_v48 = vsel %vm2076_vm5, %v2981_v39, %v2073_v5 }
 0x7af   : > { %v2324_v22 = vmul.f32 %v4948_v3, %v4948_v3  ;;  %v2323_v20 = vmul.f32 0.00390625, %v2321_v46  ;;  %v2079_v10 = vmul.f32 %v2078_v24, %v2077_v48 }
 0x7b1   : > { %v2325_v58 = vsub.f32 %v2323_v20, %v2324_v22  ;;  %v2080_v20 = vmul.f32 %v2079_v10, %v4869_v62  ;;  %v2081_v12 = vmul.f32 %v2079_v10, %v4871_v13  ;;  %v2084_v45 = vmul.f32 %v2079_v10, %v4940_v54 }
 0x7b3   : > { %v2983_v38 = vpop.eup %2982  ;;  %v2327_v27 = vadd.f32 1e-05, %v2325_v58 }
 0x7b4   : > { %v2199_v63 = vmul.f32 %v2983_v38, %v2197_v2  ;;  %v2446_v51 = vpop.xlane.xlu2 %2445  ;;  %vm2205_vm7 = vweird.f32 %v2983_v38  ;;  %v1951_v2 = vmul.f32 %v1949_v25, %v4823_v14  ;;  %v1955_v14 = vadd.f32 %v1954_v7, %v4711_v60 }
 0x7b5   : > { %2984 = vrsqrt.f32 %v2327_v27  ;;  %v4952_v32 = vmul.f32 0.00390625, %v2446_v51  ;;  %vm4966_vm10 = vmor %vm2204_vm8, %vm2205_vm7  ;;  %vm2334_vm13 = vweird.f32 %v2327_v27 }
 0x7b6   : > { %v2200_v23 = vmul.f32 %v2983_v38, %v2199_v63  ;;  %v2451_v29 = vpop.xlane.xlu1 %2450  ;;  %v1953_v16 = vadd.f32 %v1951_v2, %v4708_v8  ;;  %v2085_v60 = vadd.f32 %v2084_v45, %v1955_v14 }
 0x7b7   : > { %v2454_v43 = vmul.f32 %v4952_v32, %v4952_v32  ;;  %v2453_v34 = vmul.f32 0.00390625, %v2451_v29 }
 0x7b8   : > { %v2201_v40 = vmul.f32 0.5, %v2200_v23  ;;  %v2083_v62 = vadd.f32 %v2081_v12, %v1953_v16 }
 0x7b9   : > { %v2455_v57 = vsub.f32 %v2453_v34, %v2454_v43 }
 0x7ba   : > { %v2202_v33 = vsub.f32 1.5, %v2201_v40 }
 0x7bb   : > { %v2985_v15 = vpop.eup %2984  ;;  %v2457_v59 = vadd.f32 1e-05, %v2455_v57 }
 0x7bc   : > { %v2329_v47 = vmul.f32 %v2985_v15, %v2327_v27  ;;  %v2203_v44 = vmul.f32 %v2983_v38, %v2202_v33  ;;  %vm2335_vm12 = vweird.f32 %v2985_v15 }
 0x7bd   : > { %2986 = vrsqrt.f32 %v2457_v59  ;;  %vm2336_vm14 = vmor %vm2334_vm13, %vm2335_vm12  ;;  %vm2464_vm0 = vweird.f32 %v2457_v59 }
 0x7be   : > { %v2330_v6 = vmul.f32 %v2985_v15, %v2329_v47  ;;  %v2207_v28 = vsel %vm4966_vm10, %v2983_v38, %v2203_v44  ;;  %v1952_v38 = vadd.f32 %v1950_v1, %v4705_v30 }
 0x7bf   : > { %v2209_v4 = vmul.f32 %v2208_v61, %v2207_v28 }
 0x7c0   : > { %v2331_v18 = vmul.f32 0.5, %v2330_v6  ;;  %v2082_v51 = vadd.f32 %v2080_v20, %v1952_v38 }
 0x7c1   : > { %v2210_v27 = vmul.f32 %v2209_v4, %v4896_v42  ;;  %v2211_v11 = vmul.f32 %v2209_v4, %v4898_v41  ;;  %v2214_v13 = vmul.f32 %v2209_v4, %v4944_v9 }
 0x7c2   : > { %v2332_v26 = vsub.f32 1.5, %v2331_v18 }
 0x7c3   : > { %v2987_v49 = vpop.eup %2986  ;;  %v2212_v41 = vadd.f32 %v2210_v27, %v2082_v51  ;;  %v2213_v29 = vadd.f32 %v2211_v11, %v2083_v62  ;;  %v2215_v34 = vadd.f32 %v2214_v13, %v2085_v60 }
 0x7c4   : > { %v2333_v35 = vmul.f32 %v2985_v15, %v2332_v26  ;;  %v2459_v39 = vmul.f32 %v2987_v49, %v2457_v59  ;;  %vm2465_vm15 = vweird.f32 %v2987_v49  ;;  %v2479_v59 = vstv %s2478_s28 }
 0x7c5   : > { %vm2466_vm1 = vmor %vm2464_vm0, %vm2465_vm15 }
 0x7c6   : > { %v2337_v46 = vsel %vm2336_vm14, %v2985_v15, %v2333_v35  ;;  %v2460_v22 = vmul.f32 %v2987_v49, %v2459_v39 }
 0x7c7   : > { %v2339_v58 = vmul.f32 %v2338_v52, %v2337_v46 }
 0x7c8   : > { %v2461_v36 = vmul.f32 0.5, %v2460_v22 }
 0x7c9   : > { %v2340_v23 = vmul.f32 %v2339_v58, %v4912_v55  ;;  %v2341_v30 = vmul.f32 %v2339_v58, %v4914_v0  ;;  %v2344_v54 = vmul.f32 %v2339_v58, %v4948_v3 }
 0x7ca   : > { %v2462_v63 = vsub.f32 1.5, %v2461_v36 }
 0x7cb   : > { %v2342_v31 = vadd.f32 %v2340_v23, %v2212_v41  ;;  %v2343_v40 = vadd.f32 %v2341_v30, %v2213_v29  ;;  %v2345_v9 = vadd.f32 %v2344_v54, %v2215_v34 }
 0x7cc   : > { %v2463_v8 = vmul.f32 %v2987_v49, %v2462_v63 }
 0x7ce   : > { %v2467_v42 = vsel %vm2466_vm1, %v2987_v49, %v2463_v8 }
 0x7cf   : > { %v2469_v43 = vmul.f32 %v2468_v21, %v2467_v42 }
 0x7d1   : > { %v2470_v57 = vmul.f32 %v2469_v43, %v4926_v17  ;;  %v2471_v55 = vmul.f32 %v2469_v43, %v4928_v56  ;;  %v2474_v0 = vmul.f32 %v2469_v43, %v4952_v32 }
 0x7d3   : > { %v2472_v53 = vadd.f32 %v2470_v57, %v2342_v31  ;;  %v2473_v15 = vadd.f32 %v2471_v55, %v2343_v40  ;;  %v2475_v33 = vadd.f32 %v2474_v0, %v2345_v9 }
 0x7d5   : > { %v2476_v3 = vsub.f32 %v2472_v53, %v2475_v33  ;;  %v2477_v5 = vsub.f32 %v2473_v15, %v2475_v33 }
 0x7d7   : > { %v2480_v47 = vadd.f32 %v2479_v59, %v2476_v3  ;;  %v2481_v50 = vadd.f32 %v2479_v59, %v2477_v5 }
 0x7d9   : > { %v2482_v37 = vadd.f32 %v2481_v50, %v2480_v47  ;;  %v2485_v6 = vmul.f32 %v2480_v47, %v2480_v47  ;;  %v2486_v44 = vmul.f32 %v2481_v50, %v2481_v50 }
 0x7db   : > { %2483 = vadd.xlane.f32.xlu0 %v2482_v37  ;;  %v2487_v24 = vadd.f32 %v2486_v44, %v2485_v6 }
 0x7dd   : > { %2488 = vadd.xlane.f32.xlu2 %v2487_v24 }
 0x84e   : > { %v2484_v48 = vpop.xlane.xlu0 %2483 }
 0x84f   : > { %v2490_v17 = vmul.f32 0.00390625, %v2484_v48 }
 0x850   : > { %v2489_v18 = vpop.xlane.xlu2 %2488 }
 0x851   : > { %v2491_v56 = vmul.f32 0.00390625, %v2489_v18  ;;  %v2492_v25 = vmul.f32 %v2490_v17, %v2490_v17  ;;  %v2494_v39 = vsub.f32 %v2480_v47, %v2490_v17  ;;  %v2495_v1 = vsub.f32 %v2481_v50, %v2490_v17 }
 0x853   : > { %v2493_v32 = vsub.f32 %v2491_v56, %v2492_v25 }
 0x855   : > { %v2496_v19 = vadd.f32 1e-05, %v2493_v32 }
 0x857   : > { %2988 = vrsqrt.f32 %v2496_v19  ;;  %vm2503_vm6 = vweird.f32 %v2496_v19 }
 0x85d   : > { %v2989_v26 = vpop.eup %2988 }
 0x85e   : > { %v2498_v49 = vmul.f32 %v2989_v26, %v2496_v19  ;;  %vm2504_vm2 = vweird.f32 %v2989_v26 }
 0x85f   : > { %vm2505_vm9 = vmor %vm2503_vm6, %vm2504_vm2 }
 0x860   : > { %v2499_v10 = vmul.f32 %v2989_v26, %v2498_v49 }
 0x862   : > { %v2500_v61 = vmul.f32 0.5, %v2499_v10 }
 0x864   : > { %v2501_v28 = vsub.f32 1.5, %v2500_v61 }
 0x866   : > { %v2502_v35 = vmul.f32 %v2989_v26, %v2501_v28 }
 0x868   : > { %v2506_v2 = vsel %vm2505_vm9, %v2989_v26, %v2502_v35 }
 0x869   : > { %v2507_v7 = vmul.f32 %v2506_v2, %v2494_v39  ;;  %v2508_v52 = vmul.f32 %v2506_v2, %v2495_v1 }
 0x86b   : > { %v2858_v4 = vmul.f32 -1.442695, %v2507_v7  ;;  %v2859_v46 = vmul.f32 -1.442695, %v2508_v52 }
 0x86d   : > { %2990 = vpow2.f32 %v2858_v4 }
 0x86e   : > { %2992 = vpow2.f32 %v2859_v46 }
 0x873   : > { %v2991_v22 = vpop.eup %2990 }
 0x874   : > { %v2993_v20 = vpop.eup %2992  ;;  %v2515_v12 = vadd.f32 1.0, %v2991_v22 }
 0x875   : > { %v2516_v58 = vadd.f32 1.0, %v2993_v20 }
 0x876   : > { %2994 = vrcp.f32 %v2515_v12  ;;  %v2528_v27 = vand.u32 2147483648, %v2515_v12  ;;  %v2526_v51 = vand.u32 2147483647, %v2515_v12  ;;  %vm2522_vm4 = vweird.f32 %v2515_v12 }
 0x877   : > { %2996 = vrcp.f32 %v2516_v58  ;;  %v2543_v62 = vand.u32 2147483648, %v2516_v58  ;;  %v2541_v21 = vand.u32 2147483647, %v2516_v58  ;;  %vm2537_vm7 = vweird.f32 %v2516_v58 }
 0x878   : > { %v2529_v30 = vor.u32 1.1754944e-38, %v2528_v27  ;;  %vm2527_vm8 = vcmp.eq.f32.partialorder %v2526_v51, 8.507059e+37 }
 0x879   : > { %v2544_v54 = vor.u32 1.1754944e-38, %v2543_v62  ;;  %vm2542_vm12 = vcmp.eq.f32.partialorder %v2541_v21, 8.507059e+37 }
 0x87c   : > { %v2995_v36 = vpop.eup %2994 }
 0x87d   : > { %v2997_v38 = vpop.eup %2996  ;;  %v2518_v16 = vmul.f32 %v2995_v36, %v2515_v12  ;;  %vm2523_vm11 = vweird.f32 %v2995_v36 }
 0x87e   : > { %v2533_v14 = vmul.f32 %v2997_v38, %v2516_v58  ;;  %vm2538_vm3 = vweird.f32 %v2997_v38  ;;  %vm2524_vm5 = vmor %vm2522_vm4, %vm2523_vm11 }
 0x87f   : > { %v2519_v45 = vsub.f32 1.0, %v2518_v16  ;;  %vm2539_vm10 = vmor %vm2537_vm7, %vm2538_vm3 }
 0x880   : > { %v2534_v11 = vsub.f32 1.0, %v2533_v14 }
 0x881   : > { %v2520_v63 = vmul.f32 %v2995_v36, %v2519_v45 }
 0x882   : > { %v2535_v13 = vmul.f32 %v2997_v38, %v2534_v11 }
 0x883   : > { %v2521_v23 = vadd.f32 %v2995_v36, %v2520_v63 }
 0x884   : > { %v2536_v8 = vadd.f32 %v2997_v38, %v2535_v13 }
 0x885   : > { %v2525_v60 = vsel %vm2524_vm5, %v2995_v36, %v2521_v23 }
 0x886   : > { %v2530_v42 = vsel %vm2527_vm8, %v2529_v30, %v2525_v60  ;;  %v2540_v41 = vsel %vm2539_vm10, %v2997_v38, %v2536_v8 }
 0x887   : > { %v2545_v29 = vsel %vm2542_vm12, %v2544_v54, %v2540_v41  ;;  %2550 = vst [vmem:[%s285_s13] sm:$0xff] %v2530_v42 }
 0x888   : > { %2551 = vst [vmem:[%s285_s13 + $0x8] sm:$0xff] %v2545_v29 }
 0x889   : > { %3106 = shalt.err (!%p3103_p9)
}
 0x88a   : > { %2883 = dma.vmem_to_hbm [thread:$0]  (%p3271_p0), %s2567_s8, 256, %s2569_s26, %s2553_s17  }
 0x88b PF: > { %s2580_s24 = sand.u32 1, %s3145_s20   ;;  %p5052_p10 = scmp.ge.s32.totalorder %s3157_s23, 2 }
 0x88c   : > { %s2581_s12 = scalar_lea.sflag [#allocation5], %s2580_s24 }
 0x88d   : > { %p2900_p11 = pnand %p5052_p10, %p3277_p6 }
 0x88f   : > { %p2901_p12 = pneg %p2900_p11 }
 0x891   : > { %3140 = dma.done.wait (%p2901_p12), %s2581_s12, 256  }
 0x892   : > { %3142 = vsyncadd (%p2901_p12), %s2581_s12, 4294967040  ;;  %p22_p2 = scmp.ge.s32.totalorder %s3251_s15, 4   ;;  %s5053_s20 = smov %s3149_s21 }
 0x893   : > { %s5054_s21 = smov %s3153_s22  ;;  %s5055_s22 = smov %s3263_s18 }
 0x894   : > { %s5056_s23 = smov %s3251_s15  ;;  %24 = sbr.rel (!%p22_p2) target bundleno = 11 (0xb), region = 101 }
 0x899   :  { %2587 = vsyncpa [#allocation4], 1 }
 0x89a   :  { %2589 = vsyncpa [#allocation4 + $0x1], 1 }
 0x89b   :  { %2590 = vsyncpa [#allocation5], 1 }
 0x89c   :  { %2592 = vsyncpa [#allocation5 + $0x1], 1 }
 0x89d   :  { %2593 = vsyncpa [#allocation6], 1 }
 0x89e   :  { %2595 = vsyncpa [#allocation6 + $0x1], 1 }
 0x89f   :  { %2596 = vsyncpa [#allocation7], 1 }
 0x8a0   :  { %2598 = vsyncpa [#allocation7 + $0x1], 1 }
 0x8a1   :  { %2599 = vsyncpa [#allocation11], 1 }

</bundles_post_ra>
